<compile_context>
chip_gen: v7x
topology: tpu7x:2x2x1
jax: 0.10.0
libtpu: 0.0.40
codegen_flags: <defaults>
</compile_context>

<pallas_src>
import functools

import jax
import jax.numpy as jnp
from jax import lax
from jax.experimental import pallas as pl
from jax.experimental.pallas import tpu as pltpu

_LANE = 128


def _round_up(x, m):
    return ((x + m - 1) // m) * m


def _pick_strip_rows(h, target=8):
    # Largest divisor of H that is <= target (so output strips tile H exactly).
    for d in range(min(target, h), 0, -1):
        if h % d == 0:
            return d
    return h


def _resblock_kernel(x_ref, w1_ref, b1_ref, w2_ref, b2_ref, o_ref, h_ref,
                     *, valid_h):
    # x_ref : (1, TH+4, WE1+2, CP)  input strip incl. 2-px halo / zero ring
    # w*_ref: (9, CP, CP)           per-tap weights, k = ky*3+kx, (cin, cout)
    # b*_ref: (1, CP) f32
    # o_ref : (1, TH, W, CP)
    # h_ref : VMEM scratch (TH+2, WE1, CP) — conv1 activation + 1-px zero ring
    TH = o_ref.shape[1]
    W = o_ref.shape[2]
    CP = o_ref.shape[3]
    W2 = _round_up(W, 8)        # 8-aligned conv2 compute width
    WE1 = W2 + 8                # 8-aligned conv1 (extended) compute width
    HE = TH + 2
    s = pl.program_id(1)

    def conv3x3(load_tap, w_ref, b_ref, rows, cols):
        # 9 accumulating (rows*cols, CP) x (CP, CP) MXU matmuls; each tap is
        # sliced straight from VMEM so only one tap is live at a time.
        acc = jnp.zeros((rows * cols, CP), jnp.float32)
        for k in range(9):
            dy, dx = divmod(k, 3)
            tap = load_tap(dy, dx).reshape(rows * cols, CP)
            acc = acc + lax.dot_general(
                tap, w_ref[k],
                dimension_numbers=(((1,), (0,)), ((), ())),
                preferred_element_type=jnp.float32)
        return acc + b_ref[...].astype(jnp.float32)

    # ---- conv1 + ReLU over the extended (TH+2, WE1) region --------------
    acc1 = conv3x3(lambda dy, dx: x_ref[0, dy:dy + HE, dx:dx + WE1, :],
                   w1_ref, b1_ref, HE, WE1)
    h = jnp.maximum(acc1, 0.0).reshape(HE, WE1, CP)

    # conv2 zero-pads the *activation*: ring positions outside the real image
    # must be exactly zero (not relu(b1)).  Mask with global row/col indices.
    row_g = s * TH - 1 + lax.broadcasted_iota(jnp.int32, (HE, WE1, 1), 0)
    col_g = lax.broadcasted_iota(jnp.int32, (HE, WE1, 1), 1) - 1
    valid = ((row_g >= 0) & (row_g < valid_h) & (col_g >= 0) & (col_g < W))
    h_ref[...] = jnp.where(valid, h, 0.0).astype(h_ref.dtype)

    # ---- conv2 + residual + ReLU over the (TH, W2) output region ---------
    acc2 = conv3x3(lambda dy, dx: h_ref[dy:dy + TH, dx:dx + W2, :],
                   w2_ref, b2_ref, TH, W2)
    res = x_ref[0, 2:2 + TH, 2:2 + W2, :].astype(jnp.float32)
    out = jnp.maximum(acc2.reshape(TH, W2, CP) + res, 0.0)
    if W2 != W:
        out = out[:, :W, :]
    o_ref[0] = out.astype(o_ref.dtype)


@functools.partial(jax.jit, static_argnames=("strip_rows",))
def residual_block(x_nchw, w1, b1, w2, b2, *, strip_rows=None):
    """x_nchw: (B, C, H, W); w*: (C, C, 3, 3) OIHW; b*: (C,). Returns (B, C, H, W)."""
    B, C, H, W = x_nchw.shape
    dt = x_nchw.dtype
    CP = _round_up(C, _LANE)                 # lane-dense channels / MXU N dim
    TH = _pick_strip_rows(H, 8) if strip_rows is None else strip_rows
    assert H % TH == 0
    NS = H // TH
    W2 = _round_up(W, 8)
    WE1 = W2 + 8

    # NCHW -> NHWC, zero ring (2 px top/bottom-left, alignment pad on the
    # right) and channel pad to CP.
    x = jnp.transpose(x_nchw, (0, 2, 3, 1))
    x = jnp.pad(x, ((0, 0), (2, 2), (2, WE1 - W), (0, CP - C)))
    # Overlapping row strips (2-row halo each side), gathered host-side so the
    # kernel only needs plain Blocked specs.  Shape (B*NS, TH+4, WE1+2, CP).
    x_strips = jnp.stack([x[:, s * TH:s * TH + TH + 4] for s in range(NS)],
                         axis=1).reshape(B * NS, TH + 4, WE1 + 2, CP)

    def prep_w(w):
        wm = jnp.transpose(w, (2, 3, 1, 0))                     # (ky,kx,cin,cout)
        wm = jnp.pad(wm, ((0, 0), (0, 0), (0, CP - C), (0, CP - C)))
        return wm.reshape(9, CP, CP).astype(dt)

    def prep_b(b):
        return jnp.pad(b, (0, CP - C)).reshape(1, CP).astype(jnp.float32)

    w1m, w2m = prep_w(w1), prep_w(w2)
    b1r, b2r = prep_b(b1), prep_b(b2)

    kernel = functools.partial(_resblock_kernel, valid_h=H)

    out_nhwc = pl.pallas_call(
        kernel,
        out_shape=jax.ShapeDtypeStruct((B, H, W, CP), dt),
        grid_spec=pltpu.PrefetchScalarGridSpec(
            num_scalar_prefetch=0,
            grid=(B, NS),
            in_specs=[
                pl.BlockSpec((1, TH + 4, WE1 + 2, CP),
                             lambda b, s: (b * NS + s, 0, 0, 0)),
                pl.BlockSpec((9, CP, CP), lambda b, s: (0, 0, 0)),
                pl.BlockSpec((1, CP), lambda b, s: (0, 0)),
                pl.BlockSpec((9, CP, CP), lambda b, s: (0, 0, 0)),
                pl.BlockSpec((1, CP), lambda b, s: (0, 0)),
            ],
            out_specs=pl.BlockSpec((1, TH, W, CP), lambda b, s: (b, s, 0, 0)),
            scratch_shapes=[pltpu.VMEM((TH + 2, WE1, CP), dt)],
        ),
        compiler_params=pltpu.CompilerParams(
            dimension_semantics=("parallel", "parallel"),
            vmem_limit_bytes=48 * 1024 * 1024),
    )(x_strips, w1m, b1r, w2m, b2r)

    # Drop padded channels, back to NCHW.
    return jnp.transpose(out_nhwc[..., :C], (0, 3, 1, 2))


def _reference(x, w1, b1, w2, b2):
    """Pure-JAX NCHW reference (matches PyTorch Conv2d semantics)."""
    dn = lax.conv_dimension_numbers(x.shape, w1.shape, ("NCHW", "OIHW", "NCHW"))
    conv = lambda v, w, b: lax.conv_general_dilated(
        v, w, window_strides=(1, 1), padding="SAME",
        dimension_numbers=dn) + b.reshape(1, -1, 1, 1)
    h = jnp.maximum(conv(x, w1, b1), 0.0)
    return jnp.maximum(conv(h, w2, b2) + x, 0.0)


if __name__ == "__main__":
    B, C, H, W = 2, 4, 16, 16
    key = jax.random.PRNGKey(0)
    kx, k1, kb1, k2, kb2 = jax.random.split(key, 5)

    x = jax.random.normal(kx, (B, C, H, W), dtype=jnp.float32)
    fan_in = C * 3 * 3
    w1 = jax.random.normal(k1, (C, C, 3, 3), dtype=jnp.float32) / jnp.sqrt(fan_in)
    b1 = jax.random.normal(kb1, (C,), dtype=jnp.float32) * 0.1
    w2 = jax.random.normal(k2, (C, C, 3, 3), dtype=jnp.float32) / jnp.sqrt(fan_in)
    b2 = jax.random.normal(kb2, (C,), dtype=jnp.float32) * 0.1

    out = jax.block_until_ready(residual_block(x, w1, b1, w2, b2))

    ref = _reference(x, w1, b1, w2, b2)
    assert out.shape == (B, C, H, W), out.shape
    assert jnp.allclose(out, ref, atol=1e-4, rtol=1e-4), float(
        jnp.max(jnp.abs(out - ref)))

    print("KERNEL_OK")
</pallas_src>

<mosaic_0001>
module attributes {stable_mosaic.version = 11 : i64} {
  func.func @_resblock_kernel(%arg0: i32, %arg1: i32, %arg2: memref<1x12x26x128xf32, #tpu.memory_space<vmem>>, %arg3: memref<9x128x128xf32, #tpu.memory_space<vmem>>, %arg4: memref<1x128xf32, #tpu.memory_space<vmem>>, %arg5: memref<9x128x128xf32, #tpu.memory_space<vmem>>, %arg6: memref<1x128xf32, #tpu.memory_space<vmem>>, %arg7: memref<1x8x16x128xf32, #tpu.memory_space<vmem>>, %arg8: memref<10x24x128xf32, #tpu.memory_space<vmem>>) attributes {dimension_semantics = [#tpu.dimension_semantics<parallel>, #tpu.dimension_semantics<parallel>], iteration_bounds = array<i64: 2, 2>, scalar_prefetch = 0 : i64, scratch_operands = 1 : i64, tpu.core_type = #tpu.core_type<tc>, window_params = [{transform_indices = @transform_0, window_bounds = array<i64: 1, 12, 26, 128>}, {pipeline_mode = #tpu.pipeline_mode<synchronous>, transform_indices = @transform_1, window_bounds = array<i64: 9, 128, 128>}, {pipeline_mode = #tpu.pipeline_mode<synchronous>, transform_indices = @transform_2, window_bounds = array<i64: 1, 128>}, {pipeline_mode = #tpu.pipeline_mode<synchronous>, transform_indices = @transform_3, window_bounds = array<i64: 9, 128, 128>}, {pipeline_mode = #tpu.pipeline_mode<synchronous>, transform_indices = @transform_4, window_bounds = array<i64: 1, 128>}, {transform_indices = @transform_5, window_bounds = array<i64: 1, 8, 16, 128>}]} {
    %cst = arith.constant 0.000000e+00 : f32
    %0 = vector.broadcast %cst : f32 to vector<240x128xf32>
    %c0 = arith.constant 0 : index
    %c0_0 = arith.constant 0 : index
    %c0_1 = arith.constant 0 : index
    %c0_2 = arith.constant 0 : index
    %1 = vector.load %arg2[%c0, %c0_0, %c0_1, %c0_2] : memref<1x12x26x128xf32, #tpu.memory_space<vmem>>, vector<1x10x24x128xf32>
    %2 = vector.shape_cast %1 : vector<1x10x24x128xf32> to vector<10x24x128xf32>
    %3 = vector.shape_cast %2 : vector<10x24x128xf32> to vector<240x128xf32>
    %c0_3 = arith.constant 0 : index
    %c0_4 = arith.constant 0 : index
    %c0_5 = arith.constant 0 : index
    %4 = vector.load %arg3[%c0_3, %c0_4, %c0_5] : memref<9x128x128xf32, #tpu.memory_space<vmem>>, vector<1x128x128xf32>
    %5 = vector.shape_cast %4 : vector<1x128x128xf32> to vector<128x128xf32>
    %cst_6 = arith.constant dense<0.000000e+00> : vector<240x128xf32>
    %6 = tpu.matmul %3, %5, %cst_6 {dimension_numbers = #tpu.dot_dimension_numbers<[1], [0], [0], [1], [0, 0, 1, 1], [], []>} : vector<240x128xf32>, vector<128x128xf32>, vector<240x128xf32> -> vector<240x128xf32>
    %7 = arith.addf %0, %6 : vector<240x128xf32>
    %c0_7 = arith.constant 0 : index
    %c0_8 = arith.constant 0 : index
    %c1 = arith.constant 1 : index
    %c0_9 = arith.constant 0 : index
    %8 = vector.load %arg2[%c0_7, %c0_8, %c1, %c0_9] : memref<1x12x26x128xf32, #tpu.memory_space<vmem>>, vector<1x10x24x128xf32>
    %9 = vector.shape_cast %8 : vector<1x10x24x128xf32> to vector<10x24x128xf32>
    %10 = vector.shape_cast %9 : vector<10x24x128xf32> to vector<240x128xf32>
    %c1_10 = arith.constant 1 : index
    %c0_11 = arith.constant 0 : index
    %c0_12 = arith.constant 0 : index
    %11 = vector.load %arg3[%c1_10, %c0_11, %c0_12] : memref<9x128x128xf32, #tpu.memory_space<vmem>>, vector<1x128x128xf32>
    %12 = vector.shape_cast %11 : vector<1x128x128xf32> to vector<128x128xf32>
    %cst_13 = arith.constant dense<0.000000e+00> : vector<240x128xf32>
    %13 = tpu.matmul %10, %12, %cst_13 {dimension_numbers = #tpu.dot_dimension_numbers<[1], [0], [0], [1], [0, 0, 1, 1], [], []>} : vector<240x128xf32>, vector<128x128xf32>, vector<240x128xf32> -> vector<240x128xf32>
    %14 = arith.addf %7, %13 : vector<240x128xf32>
    %c0_14 = arith.constant 0 : index
    %c0_15 = arith.constant 0 : index
    %c2 = arith.constant 2 : index
    %c0_16 = arith.constant 0 : index
    %15 = vector.load %arg2[%c0_14, %c0_15, %c2, %c0_16] : memref<1x12x26x128xf32, #tpu.memory_space<vmem>>, vector<1x10x24x128xf32>
    %16 = vector.shape_cast %15 : vector<1x10x24x128xf32> to vector<10x24x128xf32>
    %17 = vector.shape_cast %16 : vector<10x24x128xf32> to vector<240x128xf32>
    %c2_17 = arith.constant 2 : index
    %c0_18 = arith.constant 0 : index
    %c0_19 = arith.constant 0 : index
    %18 = vector.load %arg3[%c2_17, %c0_18, %c0_19] : memref<9x128x128xf32, #tpu.memory_space<vmem>>, vector<1x128x128xf32>
    %19 = vector.shape_cast %18 : vector<1x128x128xf32> to vector<128x128xf32>
    %cst_20 = arith.constant dense<0.000000e+00> : vector<240x128xf32>
    %20 = tpu.matmul %17, %19, %cst_20 {dimension_numbers = #tpu.dot_dimension_numbers<[1], [0], [0], [1], [0, 0, 1, 1], [], []>} : vector<240x128xf32>, vector<128x128xf32>, vector<240x128xf32> -> vector<240x128xf32>
    %21 = arith.addf %14, %20 : vector<240x128xf32>
    %c0_21 = arith.constant 0 : index
    %c1_22 = arith.constant 1 : index
    %c0_23 = arith.constant 0 : index
    %c0_24 = arith.constant 0 : index
    %22 = vector.load %arg2[%c0_21, %c1_22, %c0_23, %c0_24] : memref<1x12x26x128xf32, #tpu.memory_space<vmem>>, vector<1x10x24x128xf32>
    %23 = vector.shape_cast %22 : vector<1x10x24x128xf32> to vector<10x24x128xf32>
    %24 = vector.shape_cast %23 : vector<10x24x128xf32> to vector<240x128xf32>
    %c3 = arith.constant 3 : index
    %c0_25 = arith.constant 0 : index
    %c0_26 = arith.constant 0 : index
    %25 = vector.load %arg3[%c3, %c0_25, %c0_26] : memref<9x128x128xf32, #tpu.memory_space<vmem>>, vector<1x128x128xf32>
    %26 = vector.shape_cast %25 : vector<1x128x128xf32> to vector<128x128xf32>
    %cst_27 = arith.constant dense<0.000000e+00> : vector<240x128xf32>
    %27 = tpu.matmul %24, %26, %cst_27 {dimension_numbers = #tpu.dot_dimension_numbers<[1], [0], [0], [1], [0, 0, 1, 1], [], []>} : vector<240x128xf32>, vector<128x128xf32>, vector<240x128xf32> -> vector<240x128xf32>
    %28 = arith.addf %21, %27 : vector<240x128xf32>
    %c0_28 = arith.constant 0 : index
    %c1_29 = arith.constant 1 : index
    %c1_30 = arith.constant 1 : index
    %c0_31 = arith.constant 0 : index
    %29 = vector.load %arg2[%c0_28, %c1_29, %c1_30, %c0_31] : memref<1x12x26x128xf32, #tpu.memory_space<vmem>>, vector<1x10x24x128xf32>
    %30 = vector.shape_cast %29 : vector<1x10x24x128xf32> to vector<10x24x128xf32>
    %31 = vector.shape_cast %30 : vector<10x24x128xf32> to vector<240x128xf32>
    %c4 = arith.constant 4 : index
    %c0_32 = arith.constant 0 : index
    %c0_33 = arith.constant 0 : index
    %32 = vector.load %arg3[%c4, %c0_32, %c0_33] : memref<9x128x128xf32, #tpu.memory_space<vmem>>, vector<1x128x128xf32>
    %33 = vector.shape_cast %32 : vector<1x128x128xf32> to vector<128x128xf32>
    %cst_34 = arith.constant dense<0.000000e+00> : vector<240x128xf32>
    %34 = tpu.matmul %31, %33, %cst_34 {dimension_numbers = #tpu.dot_dimension_numbers<[1], [0], [0], [1], [0, 0, 1, 1], [], []>} : vector<240x128xf32>, vector<128x128xf32>, vector<240x128xf32> -> vector<240x128xf32>
    %35 = arith.addf %28, %34 : vector<240x128xf32>
    %c0_35 = arith.constant 0 : index
    %c1_36 = arith.constant 1 : index
    %c2_37 = arith.constant 2 : index
    %c0_38 = arith.constant 0 : index
    %36 = vector.load %arg2[%c0_35, %c1_36, %c2_37, %c0_38] : memref<1x12x26x128xf32, #tpu.memory_space<vmem>>, vector<1x10x24x128xf32>
    %37 = vector.shape_cast %36 : vector<1x10x24x128xf32> to vector<10x24x128xf32>
    %38 = vector.shape_cast %37 : vector<10x24x128xf32> to vector<240x128xf32>
    %c5 = arith.constant 5 : index
    %c0_39 = arith.constant 0 : index
    %c0_40 = arith.constant 0 : index
    %39 = vector.load %arg3[%c5, %c0_39, %c0_40] : memref<9x128x128xf32, #tpu.memory_space<vmem>>, vector<1x128x128xf32>
    %40 = vector.shape_cast %39 : vector<1x128x128xf32> to vector<128x128xf32>
    %cst_41 = arith.constant dense<0.000000e+00> : vector<240x128xf32>
    %41 = tpu.matmul %38, %40, %cst_41 {dimension_numbers = #tpu.dot_dimension_numbers<[1], [0], [0], [1], [0, 0, 1, 1], [], []>} : vector<240x128xf32>, vector<128x128xf32>, vector<240x128xf32> -> vector<240x128xf32>
    %42 = arith.addf %35, %41 : vector<240x128xf32>
    %c0_42 = arith.constant 0 : index
    %c2_43 = arith.constant 2 : index
    %c0_44 = arith.constant 0 : index
    %c0_45 = arith.constant 0 : index
    %43 = vector.load %arg2[%c0_42, %c2_43, %c0_44, %c0_45] : memref<1x12x26x128xf32, #tpu.memory_space<vmem>>, vector<1x10x24x128xf32>
    %44 = vector.shape_cast %43 : vector<1x10x24x128xf32> to vector<10x24x128xf32>
    %45 = vector.shape_cast %44 : vector<10x24x128xf32> to vector<240x128xf32>
    %c6 = arith.constant 6 : index
    %c0_46 = arith.constant 0 : index
    %c0_47 = arith.constant 0 : index
    %46 = vector.load %arg3[%c6, %c0_46, %c0_47] : memref<9x128x128xf32, #tpu.memory_space<vmem>>, vector<1x128x128xf32>
    %47 = vector.shape_cast %46 : vector<1x128x128xf32> to vector<128x128xf32>
    %cst_48 = arith.constant dense<0.000000e+00> : vector<240x128xf32>
    %48 = tpu.matmul %45, %47, %cst_48 {dimension_numbers = #tpu.dot_dimension_numbers<[1], [0], [0], [1], [0, 0, 1, 1], [], []>} : vector<240x128xf32>, vector<128x128xf32>, vector<240x128xf32> -> vector<240x128xf32>
    %49 = arith.addf %42, %48 : vector<240x128xf32>
    %c0_49 = arith.constant 0 : index
    %c2_50 = arith.constant 2 : index
    %c1_51 = arith.constant 1 : index
    %c0_52 = arith.constant 0 : index
    %50 = vector.load %arg2[%c0_49, %c2_50, %c1_51, %c0_52] : memref<1x12x26x128xf32, #tpu.memory_space<vmem>>, vector<1x10x24x128xf32>
    %51 = vector.shape_cast %50 : vector<1x10x24x128xf32> to vector<10x24x128xf32>
    %52 = vector.shape_cast %51 : vector<10x24x128xf32> to vector<240x128xf32>
    %c7 = arith.constant 7 : index
    %c0_53 = arith.constant 0 : index
    %c0_54 = arith.constant 0 : index
    %53 = vector.load %arg3[%c7, %c0_53, %c0_54] : memref<9x128x128xf32, #tpu.memory_space<vmem>>, vector<1x128x128xf32>
    %54 = vector.shape_cast %53 : vector<1x128x128xf32> to vector<128x128xf32>
    %cst_55 = arith.constant dense<0.000000e+00> : vector<240x128xf32>
    %55 = tpu.matmul %52, %54, %cst_55 {dimension_numbers = #tpu.dot_dimension_numbers<[1], [0], [0], [1], [0, 0, 1, 1], [], []>} : vector<240x128xf32>, vector<128x128xf32>, vector<240x128xf32> -> vector<240x128xf32>
    %56 = arith.addf %49, %55 : vector<240x128xf32>
    %c0_56 = arith.constant 0 : index
    %c2_57 = arith.constant 2 : index
    %c2_58 = arith.constant 2 : index
    %c0_59 = arith.constant 0 : index
    %57 = vector.load %arg2[%c0_56, %c2_57, %c2_58, %c0_59] : memref<1x12x26x128xf32, #tpu.memory_space<vmem>>, vector<1x10x24x128xf32>
    %58 = vector.shape_cast %57 : vector<1x10x24x128xf32> to vector<10x24x128xf32>
    %59 = vector.shape_cast %58 : vector<10x24x128xf32> to vector<240x128xf32>
    %c8 = arith.constant 8 : index
    %c0_60 = arith.constant 0 : index
    %c0_61 = arith.constant 0 : index
    %60 = vector.load %arg3[%c8, %c0_60, %c0_61] : memref<9x128x128xf32, #tpu.memory_space<vmem>>, vector<1x128x128xf32>
    %61 = vector.shape_cast %60 : vector<1x128x128xf32> to vector<128x128xf32>
    %cst_62 = arith.constant dense<0.000000e+00> : vector<240x128xf32>
    %62 = tpu.matmul %59, %61, %cst_62 {dimension_numbers = #tpu.dot_dimension_numbers<[1], [0], [0], [1], [0, 0, 1, 1], [], []>} : vector<240x128xf32>, vector<128x128xf32>, vector<240x128xf32> -> vector<240x128xf32>
    %63 = arith.addf %56, %62 : vector<240x128xf32>
    %c0_63 = arith.constant 0 : index
    %c0_64 = arith.constant 0 : index
    %64 = vector.load %arg4[%c0_63, %c0_64] : memref<1x128xf32, #tpu.memory_space<vmem>>, vector<1x128xf32>
    %65 = vector.broadcast %64 : vector<1x128xf32> to vector<240x128xf32>
    %66 = arith.addf %63, %65 : vector<240x128xf32>
    %cst_65 = arith.constant 0.000000e+00 : f32
    %67 = vector.broadcast %cst_65 : f32 to vector<240x128xf32>
    %68 = arith.maximumf %66, %67 : vector<240x128xf32>
    %69 = vector.shape_cast %68 : vector<240x128xf32> to vector<10x24x128xf32>
    %c8_i32 = arith.constant 8 : i32
    %70 = arith.muli %arg1, %c8_i32 : i32
    %c1_i32 = arith.constant 1 : i32
    %71 = arith.subi %70, %c1_i32 : i32
    %72 = tpu.iota {dimensions = array<i32: 0>} : vector<10x24x1xi32>
    %73 = vector.broadcast %71 : i32 to vector<10x24x1xi32>
    %74 = arith.addi %73, %72 : vector<10x24x1xi32>
    %75 = tpu.iota {dimensions = array<i32: 1>} : vector<10x24x1xi32>
    %c1_i32_66 = arith.constant 1 : i32
    %76 = vector.broadcast %c1_i32_66 : i32 to vector<10x24x1xi32>
    %77 = arith.subi %75, %76 : vector<10x24x1xi32>
    %c0_i32 = arith.constant 0 : i32
    %78 = vector.broadcast %c0_i32 : i32 to vector<10x24x1xi32>
    %79 = arith.cmpi sge, %74, %78 : vector<10x24x1xi32>
    %c16_i32 = arith.constant 16 : i32
    %80 = vector.broadcast %c16_i32 : i32 to vector<10x24x1xi32>
    %81 = arith.cmpi slt, %74, %80 : vector<10x24x1xi32>
    %82 = arith.andi %79, %81 : vector<10x24x1xi1>
    %c0_i32_67 = arith.constant 0 : i32
    %83 = vector.broadcast %c0_i32_67 : i32 to vector<10x24x1xi32>
    %84 = arith.cmpi sge, %77, %83 : vector<10x24x1xi32>
    %85 = arith.andi %82, %84 : vector<10x24x1xi1>
    %c16_i32_68 = arith.constant 16 : i32
    %86 = vector.broadcast %c16_i32_68 : i32 to vector<10x24x1xi32>
    %87 = arith.cmpi slt, %77, %86 : vector<10x24x1xi32>
    %88 = arith.andi %85, %87 : vector<10x24x1xi1>
    %cst_69 = arith.constant 0.000000e+00 : f32
    %89 = vector.shape_cast %88 : vector<10x24x1xi1> to vector<10x24x1xi1>
    %90 = vector.broadcast %89 : vector<10x24x1xi1> to vector<10x24x128xi1>
    %91 = vector.broadcast %cst_69 : f32 to vector<10x24x128xf32>
    %92 = arith.select %90, %69, %91 : vector<10x24x128xi1>, vector<10x24x128xf32>
    %c0_70 = arith.constant 0 : index
    %c0_71 = arith.constant 0 : index
    %c0_72 = arith.constant 0 : index
    %93 = vector.load %arg8[%c0_70, %c0_71, %c0_72] : memref<10x24x128xf32, #tpu.memory_space<vmem>>, vector<10x24x128xf32>
    tpu.vector_store %arg8[%c0_70, %c0_71, %c0_72], %92 {strides = array<i32>} : memref<10x24x128xf32, #tpu.memory_space<vmem>>, vector<10x24x128xf32>,
    %cst_73 = arith.constant 0.000000e+00 : f32
    %94 = vector.broadcast %cst_73 : f32 to vector<128x128xf32>
    %c0_74 = arith.constant 0 : index
    %c0_75 = arith.constant 0 : index
    %c0_76 = arith.constant 0 : index
    %95 = vector.load %arg8[%c0_74, %c0_75, %c0_76] : memref<10x24x128xf32, #tpu.memory_space<vmem>>, vector<8x16x128xf32>
    %96 = vector.shape_cast %95 : vector<8x16x128xf32> to vector<128x128xf32>
    %c0_77 = arith.constant 0 : index
    %c0_78 = arith.constant 0 : index
    %c0_79 = arith.constant 0 : index
    %97 = vector.load %arg5[%c0_77, %c0_78, %c0_79] : memref<9x128x128xf32, #tpu.memory_space<vmem>>, vector<1x128x128xf32>
    %98 = vector.shape_cast %97 : vector<1x128x128xf32> to vector<128x128xf32>
    %cst_80 = arith.constant dense<0.000000e+00> : vector<128x128xf32>
    %99 = tpu.matmul %96, %98, %cst_80 {dimension_numbers = #tpu.dot_dimension_numbers<[1], [0], [0], [1], [0, 0, 1, 1], [], []>} : vector<128x128xf32>, vector<128x128xf32>, vector<128x128xf32> -> vector<128x128xf32>
    %100 = arith.addf %94, %99 : vector<128x128xf32>
    %c0_81 = arith.constant 0 : index
    %c1_82 = arith.constant 1 : index
    %c0_83 = arith.constant 0 : index
    %101 = vector.load %arg8[%c0_81, %c1_82, %c0_83] : memref<10x24x128xf32, #tpu.memory_space<vmem>>, vector<8x16x128xf32>
    %102 = vector.shape_cast %101 : vector<8x16x128xf32> to vector<128x128xf32>
    %c1_84 = arith.constant 1 : index
    %c0_85 = arith.constant 0 : index
    %c0_86 = arith.constant 0 : index
    %103 = vector.load %arg5[%c1_84, %c0_85, %c0_86] : memref<9x128x128xf32, #tpu.memory_space<vmem>>, vector<1x128x128xf32>
    %104 = vector.shape_cast %103 : vector<1x128x128xf32> to vector<128x128xf32>
    %cst_87 = arith.constant dense<0.000000e+00> : vector<128x128xf32>
    %105 = tpu.matmul %102, %104, %cst_87 {dimension_numbers = #tpu.dot_dimension_numbers<[1], [0], [0], [1], [0, 0, 1, 1], [], []>} : vector<128x128xf32>, vector<128x128xf32>, vector<128x128xf32> -> vector<128x128xf32>
    %106 = arith.addf %100, %105 : vector<128x128xf32>
    %c0_88 = arith.constant 0 : index
    %c2_89 = arith.constant 2 : index
    %c0_90 = arith.constant 0 : index
    %107 = vector.load %arg8[%c0_88, %c2_89, %c0_90] : memref<10x24x128xf32, #tpu.memory_space<vmem>>, vector<8x16x128xf32>
    %108 = vector.shape_cast %107 : vector<8x16x128xf32> to vector<128x128xf32>
    %c2_91 = arith.constant 2 : index
    %c0_92 = arith.constant 0 : index
    %c0_93 = arith.constant 0 : index
    %109 = vector.load %arg5[%c2_91, %c0_92, %c0_93] : memref<9x128x128xf32, #tpu.memory_space<vmem>>, vector<1x128x128xf32>
    %110 = vector.shape_cast %109 : vector<1x128x128xf32> to vector<128x128xf32>
    %cst_94 = arith.constant dense<0.000000e+00> : vector<128x128xf32>
    %111 = tpu.matmul %108, %110, %cst_94 {dimension_numbers = #tpu.dot_dimension_numbers<[1], [0], [0], [1], [0, 0, 1, 1], [], []>} : vector<128x128xf32>, vector<128x128xf32>, vector<128x128xf32> -> vector<128x128xf32>
    %112 = arith.addf %106, %111 : vector<128x128xf32>
    %c1_95 = arith.constant 1 : index
    %c0_96 = arith.constant 0 : index
    %c0_97 = arith.constant 0 : index
    %113 = vector.load %arg8[%c1_95, %c0_96, %c0_97] : memref<10x24x128xf32, #tpu.memory_space<vmem>>, vector<8x16x128xf32>
    %114 = vector.shape_cast %113 : vector<8x16x128xf32> to vector<128x128xf32>
    %c3_98 = arith.constant 3 : index
    %c0_99 = arith.constant 0 : index
    %c0_100 = arith.constant 0 : index
    %115 = vector.load %arg5[%c3_98, %c0_99, %c0_100] : memref<9x128x128xf32, #tpu.memory_space<vmem>>, vector<1x128x128xf32>
    %116 = vector.shape_cast %115 : vector<1x128x128xf32> to vector<128x128xf32>
    %cst_101 = arith.constant dense<0.000000e+00> : vector<128x128xf32>
    %117 = tpu.matmul %114, %116, %cst_101 {dimension_numbers = #tpu.dot_dimension_numbers<[1], [0], [0], [1], [0, 0, 1, 1], [], []>} : vector<128x128xf32>, vector<128x128xf32>, vector<128x128xf32> -> vector<128x128xf32>
    %118 = arith.addf %112, %117 : vector<128x128xf32>
    %c1_102 = arith.constant 1 : index
    %c1_103 = arith.constant 1 : index
    %c0_104 = arith.constant 0 : index
    %119 = vector.load %arg8[%c1_102, %c1_103, %c0_104] : memref<10x24x128xf32, #tpu.memory_space<vmem>>, vector<8x16x128xf32>
    %120 = vector.shape_cast %119 : vector<8x16x128xf32> to vector<128x128xf32>
    %c4_105 = arith.constant 4 : index
    %c0_106 = arith.constant 0 : index
    %c0_107 = arith.constant 0 : index
    %121 = vector.load %arg5[%c4_105, %c0_106, %c0_107] : memref<9x128x128xf32, #tpu.memory_space<vmem>>, vector<1x128x128xf32>
    %122 = vector.shape_cast %121 : vector<1x128x128xf32> to vector<128x128xf32>
    %cst_108 = arith.constant dense<0.000000e+00> : vector<128x128xf32>
    %123 = tpu.matmul %120, %122, %cst_108 {dimension_numbers = #tpu.dot_dimension_numbers<[1], [0], [0], [1], [0, 0, 1, 1], [], []>} : vector<128x128xf32>, vector<128x128xf32>, vector<128x128xf32> -> vector<128x128xf32>
    %124 = arith.addf %118, %123 : vector<128x128xf32>
    %c1_109 = arith.constant 1 : index
    %c2_110 = arith.constant 2 : index
    %c0_111 = arith.constant 0 : index
    %125 = vector.load %arg8[%c1_109, %c2_110, %c0_111] : memref<10x24x128xf32, #tpu.memory_space<vmem>>, vector<8x16x128xf32>
    %126 = vector.shape_cast %125 : vector<8x16x128xf32> to vector<128x128xf32>
    %c5_112 = arith.constant 5 : index
    %c0_113 = arith.constant 0 : index
    %c0_114 = arith.constant 0 : index
    %127 = vector.load %arg5[%c5_112, %c0_113, %c0_114] : memref<9x128x128xf32, #tpu.memory_space<vmem>>, vector<1x128x128xf32>
    %128 = vector.shape_cast %127 : vector<1x128x128xf32> to vector<128x128xf32>
    %cst_115 = arith.constant dense<0.000000e+00> : vector<128x128xf32>
    %129 = tpu.matmul %126, %128, %cst_115 {dimension_numbers = #tpu.dot_dimension_numbers<[1], [0], [0], [1], [0, 0, 1, 1], [], []>} : vector<128x128xf32>, vector<128x128xf32>, vector<128x128xf32> -> vector<128x128xf32>
    %130 = arith.addf %124, %129 : vector<128x128xf32>
    %c2_116 = arith.constant 2 : index
    %c0_117 = arith.constant 0 : index
    %c0_118 = arith.constant 0 : index
    %131 = vector.load %arg8[%c2_116, %c0_117, %c0_118] : memref<10x24x128xf32, #tpu.memory_space<vmem>>, vector<8x16x128xf32>
    %132 = vector.shape_cast %131 : vector<8x16x128xf32> to vector<128x128xf32>
    %c6_119 = arith.constant 6 : index
    %c0_120 = arith.constant 0 : index
    %c0_121 = arith.constant 0 : index
    %133 = vector.load %arg5[%c6_119, %c0_120, %c0_121] : memref<9x128x128xf32, #tpu.memory_space<vmem>>, vector<1x128x128xf32>
    %134 = vector.shape_cast %133 : vector<1x128x128xf32> to vector<128x128xf32>
    %cst_122 = arith.constant dense<0.000000e+00> : vector<128x128xf32>
    %135 = tpu.matmul %132, %134, %cst_122 {dimension_numbers = #tpu.dot_dimension_numbers<[1], [0], [0], [1], [0, 0, 1, 1], [], []>} : vector<128x128xf32>, vector<128x128xf32>, vector<128x128xf32> -> vector<128x128xf32>
    %136 = arith.addf %130, %135 : vector<128x128xf32>
    %c2_123 = arith.constant 2 : index
    %c1_124 = arith.constant 1 : index
    %c0_125 = arith.constant 0 : index
    %137 = vector.load %arg8[%c2_123, %c1_124, %c0_125] : memref<10x24x128xf32, #tpu.memory_space<vmem>>, vector<8x16x128xf32>
    %138 = vector.shape_cast %137 : vector<8x16x128xf32> to vector<128x128xf32>
    %c7_126 = arith.constant 7 : index
    %c0_127 = arith.constant 0 : index
    %c0_128 = arith.constant 0 : index
    %139 = vector.load %arg5[%c7_126, %c0_127, %c0_128] : memref<9x128x128xf32, #tpu.memory_space<vmem>>, vector<1x128x128xf32>
    %140 = vector.shape_cast %139 : vector<1x128x128xf32> to vector<128x128xf32>
    %cst_129 = arith.constant dense<0.000000e+00> : vector<128x128xf32>
    %141 = tpu.matmul %138, %140, %cst_129 {dimension_numbers = #tpu.dot_dimension_numbers<[1], [0], [0], [1], [0, 0, 1, 1], [], []>} : vector<128x128xf32>, vector<128x128xf32>, vector<128x128xf32> -> vector<128x128xf32>
    %142 = arith.addf %136, %141 : vector<128x128xf32>
    %c2_130 = arith.constant 2 : index
    %c2_131 = arith.constant 2 : index
    %c0_132 = arith.constant 0 : index
    %143 = vector.load %arg8[%c2_130, %c2_131, %c0_132] : memref<10x24x128xf32, #tpu.memory_space<vmem>>, vector<8x16x128xf32>
    %144 = vector.shape_cast %143 : vector<8x16x128xf32> to vector<128x128xf32>
    %c8_133 = arith.constant 8 : index
    %c0_134 = arith.constant 0 : index
    %c0_135 = arith.constant 0 : index
    %145 = vector.load %arg5[%c8_133, %c0_134, %c0_135] : memref<9x128x128xf32, #tpu.memory_space<vmem>>, vector<1x128x128xf32>
    %146 = vector.shape_cast %145 : vector<1x128x128xf32> to vector<128x128xf32>
    %cst_136 = arith.constant dense<0.000000e+00> : vector<128x128xf32>
    %147 = tpu.matmul %144, %146, %cst_136 {dimension_numbers = #tpu.dot_dimension_numbers<[1], [0], [0], [1], [0, 0, 1, 1], [], []>} : vector<128x128xf32>, vector<128x128xf32>, vector<128x128xf32> -> vector<128x128xf32>
    %148 = arith.addf %142, %147 : vector<128x128xf32>
    %c0_137 = arith.constant 0 : index
    %c0_138 = arith.constant 0 : index
    %149 = vector.load %arg6[%c0_137, %c0_138] : memref<1x128xf32, #tpu.memory_space<vmem>>, vector<1x128xf32>
    %150 = vector.broadcast %149 : vector<1x128xf32> to vector<128x128xf32>
    %151 = arith.addf %148, %150 : vector<128x128xf32>
    %c0_139 = arith.constant 0 : index
    %c2_140 = arith.constant 2 : index
    %c2_141 = arith.constant 2 : index
    %c0_142 = arith.constant 0 : index
    %152 = vector.load %arg2[%c0_139, %c2_140, %c2_141, %c0_142] : memref<1x12x26x128xf32, #tpu.memory_space<vmem>>, vector<1x8x16x128xf32>
    %153 = vector.shape_cast %152 : vector<1x8x16x128xf32> to vector<8x16x128xf32>
    %154 = vector.shape_cast %151 : vector<128x128xf32> to vector<8x16x128xf32>
    %155 = arith.addf %154, %153 : vector<8x16x128xf32>
    %cst_143 = arith.constant 0.000000e+00 : f32
    %156 = vector.broadcast %cst_143 : f32 to vector<8x16x128xf32>
    %157 = arith.maximumf %155, %156 : vector<8x16x128xf32>
    %c0_144 = arith.constant 0 : index
    %c0_145 = arith.constant 0 : index
    %c0_146 = arith.constant 0 : index
    %c0_147 = arith.constant 0 : index
    %158 = vector.load %arg7[%c0_144, %c0_145, %c0_146, %c0_147] : memref<1x8x16x128xf32, #tpu.memory_space<vmem>>, vector<1x8x16x128xf32>
    %159 = vector.shape_cast %158 : vector<1x8x16x128xf32> to vector<8x16x128xf32>
    %160 = vector.shape_cast %157 : vector<8x16x128xf32> to vector<1x8x16x128xf32>
    tpu.vector_store %arg7[%c0_144, %c0_145, %c0_146, %c0_147], %160 {strides = array<i32>} : memref<1x8x16x128xf32, #tpu.memory_space<vmem>>, vector<1x8x16x128xf32>,
    return
  }
  func.func @transform_0(%arg0: i32, %arg1: i32) -> (i32, i32, i32, i32) {
    %c2_i32 = arith.constant 2 : i32
    %0 = arith.muli %arg0, %c2_i32 : i32
    %1 = arith.addi %0, %arg1 : i32
    %c0_i32 = arith.constant 0 : i32
    %c0_i32_0 = arith.constant 0 : i32
    %c0_i32_1 = arith.constant 0 : i32
    %c0_i32_2 = arith.constant 0 : i32
    return %1, %c0_i32, %c0_i32_0, %c0_i32_1 : i32, i32, i32, i32
  }
  func.func @transform_1(%arg0: i32, %arg1: i32) -> (i32, i32, i32) {
    %c0_i32 = arith.constant 0 : i32
    %c0_i32_0 = arith.constant 0 : i32
    %c0_i32_1 = arith.constant 0 : i32
    %c0_i32_2 = arith.constant 0 : i32
    return %c0_i32, %c0_i32_0, %c0_i32_1 : i32, i32, i32
  }
  func.func @transform_2(%arg0: i32, %arg1: i32) -> (i32, i32) {
    %c0_i32 = arith.constant 0 : i32
    %c0_i32_0 = arith.constant 0 : i32
    %c0_i32_1 = arith.constant 0 : i32
    return %c0_i32, %c0_i32_0 : i32, i32
  }
  func.func @transform_3(%arg0: i32, %arg1: i32) -> (i32, i32, i32) {
    %c0_i32 = arith.constant 0 : i32
    %c0_i32_0 = arith.constant 0 : i32
    %c0_i32_1 = arith.constant 0 : i32
    %c0_i32_2 = arith.constant 0 : i32
    return %c0_i32, %c0_i32_0, %c0_i32_1 : i32, i32, i32
  }
  func.func @transform_4(%arg0: i32, %arg1: i32) -> (i32, i32) {
    %c0_i32 = arith.constant 0 : i32
    %c0_i32_0 = arith.constant 0 : i32
    %c0_i32_1 = arith.constant 0 : i32
    return %c0_i32, %c0_i32_0 : i32, i32
  }
  func.func @transform_5(%arg0: i32, %arg1: i32) -> (i32, i32, i32, i32) {
    %c0_i32 = arith.constant 0 : i32
    %c0_i32_0 = arith.constant 0 : i32
    %c0_i32_1 = arith.constant 0 : i32
    return %arg0, %arg1, %c0_i32, %c0_i32_0 : i32, i32, i32, i32
  }
}

</mosaic_0001>

<bundles_post_ra>
// kernel: residual_block.1
= control target key start
LH: loop header
LB: loop body
LE: loop exit
PB: predicated region body
PF: predicated region fallthrough
CT: control target
= control target key end

     0   :  { %s8492_s18 = smov 0   ;;  %s8494_s19 = smov 0   ;;  %s10720_s0 = inlined_call_operand.vmem [shape: f32[4,12,26,128], index: 0, kind: input, shape index: {}]   ;;  %s10721_s1 = inlined_call_operand.vmem [shape: f32[9,128,128], index: 1, kind: input, shape index: {}]   ;;  %s10722_s2 = inlined_call_operand.vmem [shape: f32[1,128], index: 2, kind: input, shape index: {}]   ;;  %s10723_s3 = inlined_call_operand.vmem [shape: f32[9,128,128], index: 3, kind: input, shape index: {}]   ;;  %s10724_s4 = inlined_call_operand.vmem [shape: f32[1,128], index: 4, kind: input, shape index: {}]   ;;  %s10725_s5 = inlined_call_operand.vmem [shape: f32[2,16,16,128], index: 5, kind: output, shape index: {}]  }
   0x1   :  { %s8496_s20 = smov 0   ;;  %s8498_s21 = smov 0  }
   0x2   :  { %s8500_s22 = smov 0  }
   0x3 LB: > { %s24_s23 = sadd.s32 1, %s8452_s20  ;;  %s27_s24 = sadd.s32 1, %s8456_s21  ;;  %s8460_s22 = sphi %s8500_s22, %s15_s22   ;;  %s8456_s21 = sphi %s8498_s21, %s10920_s21   ;;  %s8452_s20 = sphi %s8496_s20, %s10919_s20   ;;  %s8448_s19 = sphi %s8494_s19, %s10918_s19   ;;  %s8444_s18 = sphi %s8492_s18, %s10917_s18  }
   0x4   : > { %p25_p0 = scmp.ge.s32.totalorder %s24_s23, 2  ;;  %p5033_p1 = scmp.ge.s32.totalorder %s8460_s22, 1 }
   0x5   : > { %p209_p2 = scmp.lt.s32.totalorder %s8460_s22, 5 }
   0x6   : > { %s10922_s23 = smov (%p25_p0, %s24_s23), 0  ;;  %s10924_s24 = smov (!%p25_p0, %s27_s24), %s8456_s21 }
   0x7   : > { %p210_p3 = pnand %p5033_p1, %p209_p2  ;;  %p29_p4 = scmp.ge.s32.totalorder %s10924_s24, 2 }
   0x9   : > { %s10926_s24 = smov (%p29_p4, %s10924_s24), 0  ;;  %213 = sbr.rel (%p210_p3) target bundleno = 1160 (0x488), region = 40 }
  0x10   : > { %v5056_v0 = vld [vmem:[%s10721_s1 + $0x100] sm:$0xff]  ;;  %v5057_v1 = vld [vmem:[%s10721_s1 + $0x108] sm:$0xff]  ;;  %v5058_v2 = vld [vmem:[%s10721_s1 + $0x110] sm:$0xff]  ;;  %s5034_s6 = sshll.u32 %s8448_s19, 1  ;;  %p254_p6 = scmp.lt.s32.totalorder %s8448_s19, 1 }
  0x11   : > { %v7464_v3 = vpack.c.bf16 %v5057_v1, %v5056_v0  ;;  %v5059_v4 = vld [vmem:[%s10721_s1 + $0x118] sm:$0xff]  ;;  %s245_s9 = sadd.s32 %s8444_s18, %s5034_s6  ;;  %v5060_v6 = vld [vmem:[%s10721_s1 + $0x120] sm:$0xff]  ;;  %v5061_v7 = vld [vmem:[%s10721_s1 + $0x128] sm:$0xff]  ;;  %s9610_s6 = sshll.u32 %s8444_s18, 3 }
  0x12   : > { %v7468_v5 = vpack.c.bf16 %v5059_v4, %v5058_v2  ;;  %p246_p5 = scmp.lt.s32.totalorder %s245_s9, 3  ;;  %v7472_v8 = vpack.c.bf16 %v5061_v7, %v5060_v6  ;;  %v5062_v9 = vld [vmem:[%s10721_s1 + $0x130] sm:$0xff]  ;;  %v5063_v10 = vld [vmem:[%s10721_s1 + $0x138] sm:$0xff]  ;;  %v5064_v13 = vld [vmem:[%s10721_s1 + $0x140] sm:$0xff]  ;;  %s5350_s7 = sadd.s32 4294967295, %s9610_s6 }
  0x13   : > { %7465 = vmatprep.subr.bf16.mxu0 %v7464_v3  ;;  %v7476_v11 = vpack.c.bf16 %v5063_v10, %v5062_v9  ;;  %v5065_v14 = vld [vmem:[%s10721_s1 + $0x148] sm:$0xff]  ;;  %v5066_v16 = vld [vmem:[%s10721_s1 + $0x150] sm:$0xff]  ;;  %v5067_v17 = vld [vmem:[%s10721_s1 + $0x158] sm:$0xff]  ;;  %p256_p7 = scmp.lt.s32.totalorder %s9610_s6, 15  ;;  %s10930_s19 = smov (!%p254_p6, %s8448_s19), 1 }
  0x14   : > { %7467 = vmatpush3.bf16.msra.mxu0 %v7464_v3  ;;  %s10928_s9 = smov (!%p246_p5, %s245_s9), 3  ;;  %v7480_v15 = vpack.c.bf16 %v5065_v14, %v5064_v13  ;;  %v7484_v18 = vpack.c.bf16 %v5067_v17, %v5066_v16  ;;  %v5068_v19 = vld [vmem:[%s10721_s1 + $0x160] sm:$0xff]  ;;  %v5069_v20 = vld [vmem:[%s10721_s1 + $0x168] sm:$0xff]  ;;  %v5070_v22 = vld [vmem:[%s10721_s1 + $0x170] sm:$0xff]  ;;  %s5038_s8 = sshll.u32 %s10930_s19, 5 }
  0x15   : > { %7469 = vmatprep.subr.bf16.mxu0 %v7468_v5  ;;  %s8344_s25 = smul.u32 384, %s10928_s9  ;;  %v7488_v21 = vpack.c.bf16 %v5069_v20, %v5068_v19  ;;  %v5071_v23 = vld [vmem:[%s10721_s1 + $0x178] sm:$0xff]  ;;  %v5102_v25 = vld [vmem:[%s10721_s1 + $0x180] sm:$0xff]  ;;  %v5103_v26 = vld [vmem:[%s10721_s1 + $0x188] sm:$0xff]  ;;  %s10932_s6 = smov (!%p256_p7, %s9610_s6), 15 }
  0x16   : > { %v7492_v24 = vpack.c.bf16 %v5071_v23, %v5070_v22  ;;  %v7496_v27 = vpack.c.bf16 %v5103_v26, %v5102_v25  ;;  %v5104_v28 = vld [vmem:[%s10721_s1 + $0x190] sm:$0xff]  ;;  %v5105_v29 = vld [vmem:[%s10721_s1 + $0x198] sm:$0xff]  ;;  %v5106_v33 = vld [vmem:[%s10721_s1 + $0x1a0] sm:$0xff] }
  0x17   : > { %s8555_s28 = scalar_lea.vmem %s10720_s0, %s8344_s25  ;;  %v7500_v32 = vpack.c.bf16 %v5105_v29, %v5104_v28  ;;  %v5107_v34 = vld [vmem:[%s10721_s1 + $0x1a8] sm:$0xff]  ;;  %v5108_v38 = vld [vmem:[%s10721_s1 + $0x1b0] sm:$0xff]  ;;  %v5109_v39 = vld [vmem:[%s10721_s1 + $0x1b8] sm:$0xff] }
  0x18   : > { %7471 = vmatpush3.bf16.msra.mxu0 %v7468_v5  ;;  %v787_v12 = vld [vmem:[%s8555_s28 + $0x2] sm:$0xff]  ;;  %v788_v30 = vld [vmem:[%s8555_s28 + $0xa] sm:$0xff]  ;;  %v789_v31 = vld [vmem:[%s8555_s28 + $0x12] sm:$0xff]  ;;  %v7504_v37 = vpack.c.bf16 %v5107_v34, %v5106_v33  ;;  %v7508_v42 = vpack.c.bf16 %v5109_v39, %v5108_v38 }
  0x19   : > { %7473 = vmatprep.subr.bf16.mxu0 %v7472_v8  ;;  %6389 = vmatprep.mubr.f32.mxu0 %v787_v12  ;;  %v8603_v35 = vld [vmem:[%s8555_s28 + $0x22] sm:$0xff]  ;;  %v8606_v36 = vld [vmem:[%s8555_s28 + $0x2a] sm:$0xff]  ;;  %v8617_v40 = vld [vmem:[%s8555_s28 + $0x32] sm:$0xff] }
  0x1a   : > { %v8620_v41 = vld [vmem:[%s8555_s28 + $0x42] sm:$0xff]  ;;  %v8631_v45 = vld [vmem:[%s8555_s28 + $0x4a] sm:$0xff]  ;;  %v8634_v46 = vld [vmem:[%s8555_s28 + $0x52] sm:$0xff] }
  0x1b   : > { %v5110_v43 = vld [vmem:[%s10721_s1 + $0x1c0] sm:$0xff]  ;;  %v5111_v44 = vld [vmem:[%s10721_s1 + $0x1c8] sm:$0xff]  ;;  %v5112_v48 = vld [vmem:[%s10721_s1 + $0x1d0] sm:$0xff] }
  0x1c   : > { %7475 = vmatpush3.bf16.msra.mxu0 %v7472_v8  ;;  %v7512_v47 = vpack.c.bf16 %v5111_v44, %v5110_v43  ;;  %v5113_v49 = vld [vmem:[%s10721_s1 + $0x1d8] sm:$0xff]  ;;  %v8645_v50 = vld [vmem:[%s8555_s28 + $0x62] sm:$0xff]  ;;  %v8648_v51 = vld [vmem:[%s8555_s28 + $0x6a] sm:$0xff] }
  0x1d   : > { %7477 = vmatprep.subr.bf16.mxu0 %v7476_v11  ;;  %v7516_v52 = vpack.c.bf16 %v5113_v49, %v5112_v48  ;;  %v5114_v53 = vld [vmem:[%s10721_s1 + $0x1e0] sm:$0xff]  ;;  %v5115_v54 = vld [vmem:[%s10721_s1 + $0x1e8] sm:$0xff]  ;;  %v8659_v55 = vld [vmem:[%s8555_s28 + $0x72] sm:$0xff] }
  0x1e   : > { %v8662_v56 = vld [vmem:[%s8555_s28 + $0x82] sm:$0xff]  ;;  %v7520_v57 = vpack.c.bf16 %v5115_v54, %v5114_v53  ;;  %v5116_v58 = vld [vmem:[%s10721_s1 + $0x1f0] sm:$0xff]  ;;  %v5117_v59 = vld [vmem:[%s10721_s1 + $0x1f8] sm:$0xff] }
  0x1f   : > { %v8673_v60 = vld [vmem:[%s8555_s28 + $0x8a] sm:$0xff]  ;;  %v8676_v61 = vld [vmem:[%s8555_s28 + $0x92] sm:$0xff]  ;;  %v7524_v62 = vpack.c.bf16 %v5117_v59, %v5116_v58  ;;  %v5148_v63 = vld [vmem:[%s10721_s1 + $0x200] sm:$0xff] }
  0x20   : > { %7479 = vmatpush3.bf16.msra.mxu0 %v7476_v11  ;;  %v5149_v0 = vld [vmem:[%s10721_s1 + $0x208] sm:$0xff]  ;;  %v8695_v4 = vld [vmem:[%s8555_s28 + $0xb2] sm:$0xff]  ;;  %v5072_v17 = vld [vmem:[%s8555_s28 + $0x20] sm:$0xff] }
  0x21   : > { %7481 = vmatprep.subr.bf16.mxu0 %v7480_v15  ;;  %v8687_v1 = vld [vmem:[%s8555_s28 + $0xa2] sm:$0xff]  ;;  %v8690_v2 = vld [vmem:[%s8555_s28 + $0xaa] sm:$0xff]  ;;  %v7528_v3 = vpack.c.bf16 %v5149_v0, %v5148_v63  ;;  %v8706_v7 = vld [vmem:[%s8555_s28 + $0xd2] sm:$0xff] }
  0x22   : > { %v8698_v5 = vld [vmem:[%s8555_s28 + $0xc2] sm:$0xff]  ;;  %v8703_v6 = vld [vmem:[%s8555_s28 + $0xca] sm:$0xff]  ;;  %v8719_v10 = vld [vmem:[%s8555_s28 + $0xf2] sm:$0xff] }
  0x23   : > { %v8711_v8 = vld [vmem:[%s8555_s28 + $0xe2] sm:$0xff]  ;;  %v8714_v9 = vld [vmem:[%s8555_s28 + $0xea] sm:$0xff]  ;;  %v8730_v13 = vld [vmem:[%s8555_s28 + $0x112] sm:$0xff] }
  0x24   : > { %7483 = vmatpush3.bf16.msra.mxu0 %v7480_v15  ;;  %v8722_v11 = vld [vmem:[%s8555_s28 + $0x102] sm:$0xff]  ;;  %v8727_v12 = vld [vmem:[%s8555_s28 + $0x10a] sm:$0xff]  ;;  %v8743_v16 = vld [vmem:[%s8555_s28 + $0x132] sm:$0xff] }
  0x25   : > { %7485 = vmatprep.subr.bf16.mxu0 %v7484_v18  ;;  %v8735_v14 = vld [vmem:[%s8555_s28 + $0x122] sm:$0xff]  ;;  %v8738_v15 = vld [vmem:[%s8555_s28 + $0x12a] sm:$0xff]  ;;  %v5151_v19 = vld [vmem:[%s10721_s1 + $0x218] sm:$0xff] }
  0x26   : > { %v5073_v20 = vld [vmem:[%s8555_s28 + $0x28] sm:$0xff]  ;;  %v5152_v23 = vld [vmem:[%s10721_s1 + $0x220] sm:$0xff]  ;;  %v5154_v28 = vld [vmem:[%s10721_s1 + $0x230] sm:$0xff] }
  0x27   : > { %v8762_v25 = vld [vmem:[%s8555_s28 + $0x40] sm:$0xff]  ;;  %v8765_v26 = vld [vmem:[%s8555_s28 + $0x48] sm:$0xff]  ;;  %v5155_v29 = vld [vmem:[%s10721_s1 + $0x238] sm:$0xff] }
  0x28   : > { %7487 = vmatpush3.bf16.msra.mxu0 %v7484_v18  ;;  %v5150_v18 = vld [vmem:[%s10721_s1 + $0x210] sm:$0xff]  ;;  %v5156_v33 = vld [vmem:[%s10721_s1 + $0x240] sm:$0xff]  ;;  %v5157_v34 = vld [vmem:[%s10721_s1 + $0x248] sm:$0xff] }
  0x29   : > { %7489 = vmatprep.subr.bf16.mxu0 %v7488_v21  ;;  %v7532_v22 = vpack.c.bf16 %v5151_v19, %v5150_v18  ;;  %v8793_v38 = vld [vmem:[%s8555_s28 + $0x70] sm:$0xff]  ;;  %v7544_v39 = vpack.c.bf16 %v5157_v34, %v5156_v33  ;;  %v5159_v43 = vld [vmem:[%s10721_s1 + $0x258] sm:$0xff]  ;;  %v8804_v44 = vld [vmem:[%s8555_s28 + $0x80] sm:$0xff] }
  0x2a   : > { %v5160_v49 = vld [vmem:[%s10721_s1 + $0x260] sm:$0xff]  ;;  %v5041_v54 = vld [vmem:[%s10721_s1 + $0x88] sm:$0xff]  ;;  %v5162_v63 = vld [vmem:[%s10721_s1 + $0x270] sm:$0xff] }
  0x2b   : > { %v5040_v53 = vld [vmem:[%s10721_s1 + $0x80] sm:$0xff]  ;;  %v5163_v0 = vld [vmem:[%s10721_s1 + $0x278] sm:$0xff]  ;;  %v8847_v19 = vld [vmem:[%s8555_s28 + $0xb0] sm:$0xff] }
  0x2c   : > { %7491 = vmatpush3.bf16.msra.mxu0 %v7488_v21  ;;  %v5074_v21 = vld [vmem:[%s8555_s28 + $0x30] sm:$0xff]  ;;  %v7400_v58 = vpack.c.bf16 %v5041_v54, %v5040_v53  ;;  %v8827_v59 = vld [vmem:[%s8555_s28 + $0xa0] sm:$0xff]  ;;  %v5043_v18 = vld [vmem:[%s10721_s1 + $0x98] sm:$0xff] }
  0x2d   : > { %7493 = vmatprep.subr.bf16.mxu0 %v7492_v24  ;;  %v5046_v34 = vld [vmem:[%s10721_s1 + $0xb0] sm:$0xff]  ;;  %v8895_v53 = vld [vmem:[%s8555_s28 + $0xe8] sm:$0xff] }
  0x2e   : > { %7401 = vmatprep.subr.bf16.mxu1 %v7400_v58 }
  0x2f   : > { %7403 = vmatpush3.bf16.msra.mxu1 %v7400_v58  ;;  %v8898_v58 = vld [vmem:[%s8555_s28 + $0xf0] sm:$0xff] }
  0x30   : > { %7495 = vmatpush3.bf16.msra.mxu0 %v7492_v24  ;;  %v5153_v24 = vld [vmem:[%s10721_s1 + $0x228] sm:$0xff] }
  0x31   : > { %7497 = vmatprep.subr.bf16.mxu0 %v7496_v27 }
  0x33   : > { %6390 = vmatmul.mubr.f32.vlgmr.msra.gmra.mrb[0].mxu0 %v788_v30  ;;  %v8776_v30 = vld [vmem:[%s8555_s28 + $0x50] sm:$0xff] }
  0x34   : > { %7499 = vmatpush3.bf16.msra.mxu0 %v7496_v27  ;;  %6392 = vmatprep.mubr.f32.mxu0 %v789_v31  ;;  %v7536_v27 = vpack.c.bf16 %v5153_v24, %v5152_v23  ;;  %v8779_v31 = vld [vmem:[%s8555_s28 + $0x60] sm:$0xff]  ;;  %v5195_v23 = vld [vmem:[%s10721_s1 + $0x288] sm:$0xff] }
  0x35   : > { %7501 = vmatprep.subr.bf16.mxu0 %v7500_v32  ;;  %v5044_v24 = vld [vmem:[%s10721_s1 + $0xa0] sm:$0xff] }
  0x37   : > { %6393 = vmatmul.mubr.f32.gmra.mrb[2].mxu0 %v8603_v35 }
  0x38   : > { %6395 = vmatprep.mubr.f32.mxu0 %v8606_v36  ;;  %7503 = vmatpush3.bf16.msra.mxu0 %v7500_v32  ;;  %v7540_v32 = vpack.c.bf16 %v5155_v29, %v5154_v28  ;;  %v8864_v28 = vld [vmem:[%s8555_s28 + $0xc0] sm:$0xff] }
  0x39   : > { %7505 = vmatprep.subr.bf16.mxu0 %v7504_v37 }
  0x3b   : > { %6396 = vmatmul.mubr.f32.gmra.mrb[4].mxu0 %v8617_v40 }
  0x3c   : > { %6398 = vmatprep.mubr.f32.mxu0 %v8620_v41  ;;  %7507 = vmatpush3.bf16.msra.mxu0 %v7504_v37  ;;  %v8790_v37 = vld [vmem:[%s8555_s28 + $0x68] sm:$0xff] }
  0x3d   : > { %7509 = vmatprep.subr.bf16.mxu0 %v7508_v42 }
  0x3f   : > { %6399 = vmatmul.mubr.f32.gmra.mrb[6].mxu0 %v8631_v45 }
  0x40   : > { %6401 = vmatprep.mubr.f32.mxu0 %v8634_v46  ;;  %7511 = vmatpush3.bf16.msra.mxu0 %v7508_v42  ;;  %v5158_v42 = vld [vmem:[%s10721_s1 + $0x250] sm:$0xff] }
  0x41   : > { %7513 = vmatprep.subr.bf16.mxu0 %v7512_v47  ;;  %v7548_v48 = vpack.c.bf16 %v5159_v43, %v5158_v42  ;;  %v5047_v42 = vld [vmem:[%s10721_s1 + $0xb8] sm:$0xff]  ;;  %v8883_v43 = vld [vmem:[%s8555_s28 + $0xe0] sm:$0xff] }
  0x43   : > { %6402 = vmatmul.mubr.f32.gmra.mrb[8].mxu0 %v8645_v50 }
  0x44   : > { %6404 = vmatprep.mubr.f32.mxu0 %v8648_v51  ;;  %7515 = vmatpush3.bf16.msra.mxu0 %v7512_v47  ;;  %v8807_v47 = vld [vmem:[%s8555_s28 + $0x88] sm:$0xff] }
  0x45   : > { %7517 = vmatprep.subr.bf16.mxu0 %v7516_v52 }
  0x47   : > { %6405 = vmatmul.mubr.f32.gmra.mrb[10].mxu0 %v8659_v55 }
  0x48   : > { %6407 = vmatprep.mubr.f32.mxu0 %v8662_v56  ;;  %7519 = vmatpush3.bf16.msra.mxu0 %v7516_v52  ;;  %v5161_v52 = vld [vmem:[%s10721_s1 + $0x268] sm:$0xff] }
  0x49   : > { %7521 = vmatprep.subr.bf16.mxu0 %v7520_v57 }
  0x4b   : > { %6408 = vmatmul.mubr.f32.gmra.mrb[12].mxu0 %v8673_v60 }
  0x4c   : > { %6410 = vmatprep.mubr.f32.mxu0 %v8676_v61  ;;  %7523 = vmatpush3.bf16.msra.mxu0 %v7520_v57  ;;  %v8824_v57 = vld [vmem:[%s8555_s28 + $0x90] sm:$0xff] }
  0x4d   : > { %7525 = vmatprep.subr.bf16.mxu0 %v7524_v62 }
  0x4f   : > { %6411 = vmatmul.mubr.f32.gmra.mrb[14].mxu0 %v8687_v1 }
  0x50   : > { %6413 = vmatprep.mubr.f32.mxu0 %v8690_v2  ;;  %7527 = vmatpush3.bf16.msra.mxu0 %v7524_v62  ;;  %v7552_v62 = vpack.c.bf16 %v5161_v52, %v5160_v49  ;;  %v5048_v49 = vld [vmem:[%s10721_s1 + $0xc0] sm:$0xff]  ;;  %v5049_v52 = vld [vmem:[%s10721_s1 + $0xc8] sm:$0xff] }
  0x51   : > { %7529 = vmatprep.subr.bf16.mxu0 %v7528_v3  ;;  %v7416_v54 = vpack.c.bf16 %v5049_v52, %v5048_v49  ;;  %v310_v49 = vld [vmem:[%s8555_s28 + $0x1] sm:$0xff] }
  0x52   : > { %v8946_v52 = vld [vmem:[%s8555_s28 + $0x140] sm:$0xff]  ;;  %6235 = vmatprep.mubr.f32.mxu1 %v310_v49 }
  0x53   : > { %6414 = vmatmul.mubr.f32.gmra.mrb[16].mxu0 %v8695_v4  ;;  %10781 = vst [vmem:[#allocation3_spill] sm:$0xff] %v8946_v52  ;;  %v5198_v49 = vld [vmem:[%s10721_s1 + $0x2a0] sm:$0xff] }
  0x54   : > { %6416 = vmatprep.mubr.f32.mxu0 %v8698_v5 }
  0x57   : > { %6417 = vmatmul.mubr.f32.gmra.mrb[18].mxu0 %v8703_v6 }
  0x58   : > { %6419 = vmatprep.mubr.f32.mxu0 %v8706_v7 }
  0x5b   : > { %6420 = vmatmul.mubr.f32.gmra.mrb[20].mxu0 %v8711_v8 }
  0x5c   : > { %6422 = vmatprep.mubr.f32.mxu0 %v8714_v9 }
  0x5f   : > { %6423 = vmatmul.mubr.f32.gmra.mrb[22].mxu0 %v8719_v10 }
  0x60   : > { %6425 = vmatprep.mubr.f32.mxu0 %v8722_v11 }
  0x63   : > { %6426 = vmatmul.mubr.f32.gmra.mrb[24].mxu0 %v8727_v12 }
  0x64   : > { %6428 = vmatprep.mubr.f32.mxu0 %v8730_v13 }
  0x67   : > { %6429 = vmatmul.mubr.f32.gmra.mrb[26].mxu0 %v8735_v14 }
  0x68   : > { %6431 = vmatprep.mubr.f32.mxu0 %v8738_v15 }
  0x6b   : > { %6432 = vmatmul.mubr.f32.gmra.mrb[28].mxu0 %v8743_v16 }
  0x6c   : > { %6466 = vmatprep.mubr.f32.mxu0 %v5072_v17  ;;  %v8841_v17 = vld [vmem:[%s8555_s28 + $0xa8] sm:$0xff] }
  0x6f   : > { %6467 = vmatmul.mubr.f32.vlgmr.msra.gmra.mrb[0].mxu0 %v5073_v20  ;;  %v7556_v20 = vpack.c.bf16 %v5163_v0, %v5162_v63  ;;  %v8906_v63 = vld [vmem:[%s8555_s28 + $0x100] sm:$0xff]  ;;  %v5051_v0 = vld [vmem:[%s10721_s1 + $0xd8] sm:$0xff] }
  0x70   : > { %7531 = vmatpush3.bf16.msra.mxu0 %v7528_v3  ;;  %6469 = vmatprep.mubr.f32.mxu0 %v5074_v21  ;;  %v5042_v3 = vld [vmem:[%s10721_s1 + $0x90] sm:$0xff] }
  0x71   : > { %7533 = vmatprep.subr.bf16.mxu0 %v7532_v22  ;;  %v7404_v21 = vpack.c.bf16 %v5043_v18, %v5042_v3  ;;  %v8912_v3 = vld [vmem:[%s8555_s28 + $0x108] sm:$0xff] }
  0x73   : > { %6470 = vmatmul.mubr.f32.gmra.mrb[2].mxu0 %v8762_v25  ;;  %7405 = vmatprep.subr.bf16.mxu1 %v7404_v21 }
  0x74   : > { %6472 = vmatprep.mubr.f32.mxu0 %v8765_v26  ;;  %7535 = vmatpush3.bf16.msra.mxu0 %v7532_v22  ;;  %v5194_v22 = vld [vmem:[%s10721_s1 + $0x280] sm:$0xff] }
  0x75   : > { %7537 = vmatprep.subr.bf16.mxu0 %v7536_v27  ;;  %v8869_v33 = vpack.c.bf16 %v5195_v23, %v5194_v22  ;;  %7407 = vmatpush3.bf16.msra.mxu1 %v7404_v21  ;;  %v5053_v21 = vld [vmem:[%s10721_s1 + $0xe8] sm:$0xff]  ;;  %v8923_v22 = vld [vmem:[%s8555_s28 + $0x110] sm:$0xff] }
  0x77   : > { %6473 = vmatmul.mubr.f32.gmra.mrb[4].mxu0 %v8776_v30 }
  0x78   : > { %6475 = vmatprep.mubr.f32.mxu0 %v8779_v31  ;;  %7539 = vmatpush3.bf16.msra.mxu0 %v7536_v27  ;;  %v5045_v27 = vld [vmem:[%s10721_s1 + $0xa8] sm:$0xff] }
  0x79   : > { %7541 = vmatprep.subr.bf16.mxu0 %v7540_v32  ;;  %v7408_v29 = vpack.c.bf16 %v5045_v27, %v5044_v24  ;;  %v8926_v24 = vld [vmem:[%s8555_s28 + $0x120] sm:$0xff]  ;;  %v8931_v27 = vld [vmem:[%s8555_s28 + $0x128] sm:$0xff] }
  0x7b   : > { %6476 = vmatmul.mubr.f32.gmra.mrb[6].mxu0 %v8790_v37  ;;  %7409 = vmatprep.subr.bf16.mxu1 %v7408_v29 }
  0x7c   : > { %6478 = vmatprep.mubr.f32.mxu0 %v8793_v38  ;;  %7543 = vmatpush3.bf16.msra.mxu0 %v7540_v32  ;;  %v8867_v32 = vld [vmem:[%s8555_s28 + $0xc8] sm:$0xff] }
  0x7d   : > { %7545 = vmatprep.subr.bf16.mxu0 %v7544_v39  ;;  %7411 = vmatpush3.bf16.msra.mxu1 %v7408_v29  ;;  %v5054_v29 = vld [vmem:[%s10721_s1 + $0xf0] sm:$0xff] }
  0x7f   : > { %6479 = vmatmul.mubr.f32.gmra.mrb[8].mxu0 %v8804_v44 }
  0x80   : > { %6481 = vmatprep.mubr.f32.mxu0 %v8807_v47  ;;  %7547 = vmatpush3.bf16.msra.mxu0 %v7544_v39  ;;  %v8877_v39 = vld [vmem:[%s8555_s28 + $0xd0] sm:$0xff] }
  0x81   : > { %7549 = vmatprep.subr.bf16.mxu0 %v7548_v48 }
  0x83   : > { %6482 = vmatmul.mubr.f32.gmra.mrb[10].mxu0 %v8824_v57 }
  0x84   : > { %6484 = vmatprep.mubr.f32.mxu0 %v8827_v59  ;;  %7551 = vmatpush3.bf16.msra.mxu0 %v7548_v48  ;;  %v7412_v48 = vpack.c.bf16 %v5047_v42, %v5046_v34  ;;  %v5055_v34 = vld [vmem:[%s10721_s1 + $0xf8] sm:$0xff]  ;;  %v8940_v42 = vld [vmem:[%s8555_s28 + $0x130] sm:$0xff] }
  0x85   : > { %7553 = vmatprep.subr.bf16.mxu0 %v7552_v62 }
  0x86   : > { %7413 = vmatprep.subr.bf16.mxu1 %v7412_v48 }
  0x87   : > { %6485 = vmatmul.mubr.f32.gmra.mrb[12].mxu0 %v8841_v17  ;;  %7415 = vmatpush3.bf16.msra.mxu1 %v7412_v48  ;;  %v7428_v48 = vpack.c.bf16 %v5055_v34, %v5054_v29  ;;  %v5119_v29 = vld [vmem:[%s8555_s28 + $0x29] sm:$0xff]  ;;  %v5120_v34 = vld [vmem:[%s8555_s28 + $0x31] sm:$0xff] }
  0x88   : > { %6487 = vmatprep.mubr.f32.mxu0 %v8847_v19  ;;  %7555 = vmatpush3.bf16.msra.mxu0 %v7552_v62  ;;  %v5050_v62 = vld [vmem:[%s10721_s1 + $0xd0] sm:$0xff] }
  0x89   : > { %7557 = vmatprep.subr.bf16.mxu0 %v7556_v20  ;;  %7417 = vmatprep.subr.bf16.mxu1 %v7416_v54  ;;  %v7420_v18 = vpack.c.bf16 %v5051_v0, %v5050_v62  ;;  %v311_v62 = vld [vmem:[%s8555_s28 + $0x9] sm:$0xff] }
  0x8a   : > { %v8955_v0 = vld [vmem:[%s8555_s28 + $0x150] sm:$0xff] }
  0x8b   : > { %6488 = vmatmul.mubr.f32.gmra.mrb[14].mxu0 %v8864_v28  ;;  %7419 = vmatpush3.bf16.msra.mxu1 %v7416_v54  ;;  %v8949_v54 = vld [vmem:[%s8555_s28 + $0x148] sm:$0xff]  ;;  %10783 = vst [vmem:[#allocation5_spill] sm:$0xff] %v8955_v0 }
  0x8c   : > { %6490 = vmatprep.mubr.f32.mxu0 %v8867_v32  ;;  %7559 = vmatpush3.bf16.msra.mxu0 %v7556_v20  ;;  %v5052_v20 = vld [vmem:[%s10721_s1 + $0xe0] sm:$0xff]  ;;  %10782 = vst [vmem:[#allocation4_spill] sm:$0xff] %v8949_v54 }
  0x8d   : > { %7561 = vmatprep.subr.bf16.mxu0 %v8869_v33  ;;  %7421 = vmatprep.subr.bf16.mxu1 %v7420_v18  ;;  %v7424_v23 = vpack.c.bf16 %v5053_v21, %v5052_v20  ;;  %v5118_v20 = vld [vmem:[%s8555_s28 + $0x21] sm:$0xff]  ;;  %v5196_v21 = vld [vmem:[%s10721_s1 + $0x290] sm:$0xff] }
  0x8f   : > { %6491 = vmatmul.mubr.f32.gmra.mrb[16].mxu0 %v8877_v39  ;;  %7423 = vmatpush3.bf16.msra.mxu1 %v7420_v18  ;;  %v312_v18 = vld [vmem:[%s8555_s28 + $0x11] sm:$0xff] }
  0x90   : > { %6493 = vmatprep.mubr.f32.mxu0 %v8883_v43  ;;  %7425 = vmatprep.subr.bf16.mxu1 %v7424_v23 }
  0x93   : > { %6494 = vmatmul.mubr.f32.gmra.mrb[18].mxu0 %v8895_v53  ;;  %7427 = vmatpush3.bf16.msra.mxu1 %v7424_v23  ;;  %v5197_v23 = vld [vmem:[%s10721_s1 + $0x298] sm:$0xff] }
  0x94   : > { %6496 = vmatprep.mubr.f32.mxu0 %v8898_v58  ;;  %7429 = vmatprep.subr.bf16.mxu1 %v7428_v48 }
  0x97   : > { %6497 = vmatmul.mubr.f32.gmra.mrb[20].mxu0 %v8906_v63  ;;  %7431 = vmatpush3.bf16.msra.mxu1 %v7428_v48  ;;  %v7564_v48 = vpack.c.bf16 %v5197_v23, %v5196_v21  ;;  %v5200_v23 = vld [vmem:[%s10721_s1 + $0x2b0] sm:$0xff] }
  0x98   : > { %6499 = vmatprep.mubr.f32.mxu0 %v8912_v3 }
  0x9a   : > { %6236 = vmatmul.mubr.f32.vlgmr.msra.gmra.mrb[0].mxu1 %v311_v62  ;;  %v5199_v62 = vld [vmem:[%s10721_s1 + $0x2a8] sm:$0xff] }
  0x9b   : > { %6500 = vmatmul.mubr.f32.gmra.mrb[22].mxu0 %v8923_v22  ;;  %6238 = vmatprep.mubr.f32.mxu1 %v312_v18  ;;  %v8976_v18 = vld [vmem:[%s8555_s28 + $0x41] sm:$0xff]  ;;  %v7568_v21 = vpack.c.bf16 %v5199_v62, %v5198_v49 }
  0x9c   : > { %6502 = vmatprep.mubr.f32.mxu0 %v8926_v24  ;;  %10784 = vst [vmem:[#allocation6_spill] sm:$0xff] %v8976_v18  ;;  %v5202_v49 = vld [vmem:[%s10721_s1 + $0x2c0] sm:$0xff]  ;;  %v5203_v62 = vld [vmem:[%s10721_s1 + $0x2c8] sm:$0xff] }
  0x9e   : > { %6239 = vmatmul.mubr.f32.gmra.mrb[2].mxu1 %v5118_v20 }
  0x9f   : > { %6503 = vmatmul.mubr.f32.gmra.mrb[24].mxu0 %v8931_v27  ;;  %6241 = vmatprep.mubr.f32.mxu1 %v5119_v29 }
  0xa0   : > { %6505 = vmatprep.mubr.f32.mxu0 %v8940_v42 }
  0xa2   : > { %6242 = vmatmul.mubr.f32.gmra.mrb[4].mxu1 %v5120_v34 }
  0xa3   : > { %6506 = vmatmul.mubr.f32.gmra.mrb[26].mxu0 %v8946_v52  ;;  %6244 = vmatprep.mubr.f32.mxu1 %v8976_v18  ;;  %v5209_v52 = vld [vmem:[%s10721_s1 + $0x2f8] sm:$0xff] }
  0xa4   : > { %6508 = vmatprep.mubr.f32.mxu0 %v8949_v54  ;;  %v5208_v54 = vld [vmem:[%s10721_s1 + $0x2f0] sm:$0xff] }
  0xa7   : > { %6509 = vmatmul.mubr.f32.gmra.mrb[28].mxu0 %v8955_v0  ;;  %v5201_v0 = vld [vmem:[%s10721_s1 + $0x2b8] sm:$0xff] }
  0xa8   : > { %6543 = vmatprep.mubr.f32.mxu0 %v5118_v20  ;;  %v8979_v20 = vld [vmem:[%s8555_s28 + $0x49] sm:$0xff] }
  0xa9   : > { %10785 = vst [vmem:[#allocation7_spill] sm:$0xff] %v8979_v20  ;;  %6245 = vmatmul.mubr.f32.gmra.mrb[6].mxu1 %v8979_v20 }
  0xab   : > { %6544 = vmatmul.mubr.f32.vlgmr.msra.gmra.mrb[0].mxu0 %v5119_v29  ;;  %v8994_v29 = vld [vmem:[%s8555_s28 + $0x61] sm:$0xff] }
  0xac   : > { %7563 = vmatpush3.bf16.msra.mxu0 %v8869_v33  ;;  %6546 = vmatprep.mubr.f32.mxu0 %v5120_v34  ;;  %v8991_v33 = vld [vmem:[%s8555_s28 + $0x51] sm:$0xff]  ;;  %10787 = vst [vmem:[#allocation9_spill] sm:$0xff] %v8994_v29  ;;  %v7572_v34 = vpack.c.bf16 %v5201_v0, %v5200_v23  ;;  %v7576_v23 = vpack.c.bf16 %v5203_v62, %v5202_v49  ;;  %v9026_v49 = vld [vmem:[%s8555_s28 + $0x89] sm:$0xff] }
  0xad   : > { %7565 = vmatprep.subr.bf16.mxu0 %v7564_v48  ;;  %10786 = vst [vmem:[#allocation8_spill] sm:$0xff] %v8991_v33  ;;  %6247 = vmatprep.mubr.f32.mxu1 %v8991_v33  ;;  %v9010_v0 = vld [vmem:[%s8555_s28 + $0x71] sm:$0xff]  ;;  %10791 = vst [vmem:[#allocation13_spill] sm:$0xff] %v9026_v49 }
  0xae   : > { %10789 = vst [vmem:[#allocation11_spill] sm:$0xff] %v9010_v0  ;;  %6248 = vmatmul.mubr.f32.gmra.mrb[8].mxu1 %v8994_v29 }
  0xaf   : > { %6547 = vmatmul.mubr.f32.gmra.mrb[2].mxu0 %v8976_v18  ;;  %v5205_v18 = vld [vmem:[%s10721_s1 + $0x2d8] sm:$0xff] }
  0xb0   : > { %6549 = vmatprep.mubr.f32.mxu0 %v8979_v20  ;;  %7567 = vmatpush3.bf16.msra.mxu0 %v7564_v48  ;;  %v9007_v48 = vld [vmem:[%s8555_s28 + $0x69] sm:$0xff] }
  0xb1   : > { %7569 = vmatprep.subr.bf16.mxu0 %v7568_v21  ;;  %10788 = vst [vmem:[#allocation10_spill] sm:$0xff] %v9007_v48  ;;  %v5204_v20 = vld [vmem:[%s10721_s1 + $0x2d0] sm:$0xff]  ;;  %6250 = vmatprep.mubr.f32.mxu1 %v9007_v48 }
  0xb2   : > { %v7580_v62 = vpack.c.bf16 %v5205_v18, %v5204_v20  ;;  %6251 = vmatmul.mubr.f32.gmra.mrb[10].mxu1 %v9010_v0  ;;  %v295_v18 = vld [vmem:[%s10721_s1 + $0x8] sm:$0xff]  ;;  %v9045_v20 = vld [vmem:[%s8555_s28 + $0x91] sm:$0xff] }
  0xb3   : > { %6550 = vmatmul.mubr.f32.gmra.mrb[4].mxu0 %v8991_v33  ;;  %10792 = vst [vmem:[#allocation14_spill] sm:$0xff] %v9045_v20  ;;  %v9048_v33 = vld [vmem:[%s8555_s28 + $0xa1] sm:$0xff] }
  0xb4   : > { %6552 = vmatprep.mubr.f32.mxu0 %v8994_v29  ;;  %7571 = vmatpush3.bf16.msra.mxu0 %v7568_v21  ;;  %v9023_v21 = vld [vmem:[%s8555_s28 + $0x81] sm:$0xff]  ;;  %10793 = vst [vmem:[#allocation15_spill] sm:$0xff] %v9048_v33 }
  0xb5   : > { %7573 = vmatprep.subr.bf16.mxu0 %v7572_v34  ;;  %10790 = vst [vmem:[#allocation12_spill] sm:$0xff] %v9023_v21  ;;  %v5206_v29 = vld [vmem:[%s10721_s1 + $0x2e0] sm:$0xff]  ;;  %6253 = vmatprep.mubr.f32.mxu1 %v9023_v21 }
  0xb6   : > { %6254 = vmatmul.mubr.f32.gmra.mrb[12].mxu1 %v9026_v49 }
  0xb7   : > { %6553 = vmatmul.mubr.f32.gmra.mrb[6].mxu0 %v9007_v48  ;;  %v5207_v48 = vld [vmem:[%s10721_s1 + $0x2e8] sm:$0xff]  ;;  %6256 = vmatprep.mubr.f32.mxu1 %v9045_v20 }
  0xb8   : > { %6555 = vmatprep.mubr.f32.mxu0 %v9010_v0  ;;  %7575 = vmatpush3.bf16.msra.mxu0 %v7572_v34  ;;  %v294_v34 = vld [vmem:[%s10721_s1] sm:$0xff] }
  0xb9   : > { %7577 = vmatprep.subr.bf16.mxu0 %v7576_v23  ;;  %v7432_v0 = vpack.c.bf16 %v295_v18, %v294_v34  ;;  %v9070_v34 = vld [vmem:[%s8555_s28 + $0xb1] sm:$0xff]  ;;  %v7588_v18 = vpack.c.bf16 %v5209_v52, %v5208_v54  ;;  %v298_v52 = vld [vmem:[%s10721_s1 + $0x20] sm:$0xff]  ;;  %v299_v54 = vld [vmem:[%s10721_s1 + $0x28] sm:$0xff] }
  0xba   : > { %6257 = vmatmul.mubr.f32.gmra.mrb[14].mxu1 %v9048_v33 }
  0xbb   : > { %6556 = vmatmul.mubr.f32.gmra.mrb[8].mxu0 %v9023_v21  ;;  %v7584_v21 = vpack.c.bf16 %v5207_v48, %v5206_v29  ;;  %7433 = vmatprep.subr.bf16.mxu1 %v7432_v0  ;;  %v296_v29 = vld [vmem:[%s10721_s1 + $0x10] sm:$0xff] }
  0xbc   : > { %6558 = vmatprep.mubr.f32.mxu0 %v9026_v49  ;;  %7579 = vmatpush3.bf16.msra.mxu0 %v7576_v23  ;;  %v9064_v48 = vld [vmem:[%s8555_s28 + $0xa9] sm:$0xff]  ;;  %v297_v23 = vld [vmem:[%s10721_s1 + $0x18] sm:$0xff] }
  0xbd   : > { %7581 = vmatprep.subr.bf16.mxu0 %v7580_v62  ;;  %7435 = vmatpush3.bf16.msra.mxu1 %v7432_v0  ;;  %10794 = vst [vmem:[#allocation16_spill] sm:$0xff] %v9064_v48  ;;  %v7436_v0 = vpack.c.bf16 %v297_v23, %v296_v29  ;;  %v9089_v29 = vld [vmem:[%s8555_s28 + $0xc1] sm:$0xff]  ;;  %v7440_v23 = vpack.c.bf16 %v299_v54, %v298_v52  ;;  %v300_v49 = vld [vmem:[%s10721_s1 + $0x30] sm:$0xff] }
  0xbe   : > { %6259 = vmatprep.mubr.f32.mxu1 %v9064_v48  ;;  %v303_v52 = vld [vmem:[%s10721_s1 + $0x48] sm:$0xff] }
  0xbf   : > { %6559 = vmatmul.mubr.f32.gmra.mrb[10].mxu0 %v9045_v20  ;;  %v5240_v20 = vld [vmem:[%s10721_s1 + $0x300] sm:$0xff]  ;;  %7437 = vmatprep.subr.bf16.mxu1 %v7436_v0  ;;  %v9124_v54 = vld [vmem:[%s8555_s28 + $0xe9] sm:$0xff] }
  0xc0   : > { %6561 = vmatprep.mubr.f32.mxu0 %v9048_v33  ;;  %7583 = vmatpush3.bf16.msra.mxu0 %v7580_v62  ;;  %v5241_v62 = vld [vmem:[%s10721_s1 + $0x308] sm:$0xff]  ;;  %10798 = vst [vmem:[#allocation20_spill] sm:$0xff] %v9124_v54 }
  0xc1   : > { %7585 = vmatprep.subr.bf16.mxu0 %v7584_v21  ;;  %v9092_v33 = vld [vmem:[%s8555_s28 + $0xc9] sm:$0xff]  ;;  %6260 = vmatmul.mubr.f32.gmra.mrb[16].mxu1 %v9070_v34 }
  0xc2   : > { %10795 = vst [vmem:[#allocation17_spill] sm:$0xff] %v9092_v33  ;;  %7439 = vmatpush3.bf16.msra.mxu1 %v7436_v0  ;;  %6262 = vmatprep.mubr.f32.mxu1 %v9089_v29  ;;  %v9110_v0 = vld [vmem:[%s8555_s28 + $0xe1] sm:$0xff] }
  0xc3   : > { %6562 = vmatmul.mubr.f32.gmra.mrb[12].mxu0 %v9064_v48  ;;  %v9094_v48 = vpack.c.bf16 %v5241_v62, %v5240_v20  ;;  %7441 = vmatprep.subr.bf16.mxu1 %v7440_v23  ;;  %v301_v20 = vld [vmem:[%s10721_s1 + $0x38] sm:$0xff]  ;;  %10797 = vst [vmem:[#allocation19_spill] sm:$0xff] %v9110_v0 }
  0xc4   : > { %6564 = vmatprep.mubr.f32.mxu0 %v9070_v34  ;;  %7587 = vmatpush3.bf16.msra.mxu0 %v7584_v21  ;;  %v9104_v21 = vld [vmem:[%s8555_s28 + $0xd1] sm:$0xff]  ;;  %v7444_v62 = vpack.c.bf16 %v301_v20, %v300_v49 }
  0xc5   : > { %7589 = vmatprep.subr.bf16.mxu0 %v7588_v18  ;;  %10796 = vst [vmem:[#allocation18_spill] sm:$0xff] %v9104_v21  ;;  %6263 = vmatmul.mubr.f32.gmra.mrb[18].mxu1 %v9092_v33  ;;  %v304_v20 = vld [vmem:[%s10721_s1 + $0x50] sm:$0xff] }
  0xc6   : > { %7443 = vmatpush3.bf16.msra.mxu1 %v7440_v23  ;;  %6265 = vmatprep.mubr.f32.mxu1 %v9104_v21  ;;  %v9127_v23 = vld [vmem:[%s8555_s28 + $0xf1] sm:$0xff] }
  0xc7   : > { %6565 = vmatmul.mubr.f32.gmra.mrb[14].mxu0 %v9089_v29  ;;  %7445 = vmatprep.subr.bf16.mxu1 %v7444_v62  ;;  %10799 = vst [vmem:[#allocation21_spill] sm:$0xff] %v9127_v23 }
  0xc8   : > { %6567 = vmatprep.mubr.f32.mxu0 %v9092_v33  ;;  %7591 = vmatpush3.bf16.msra.mxu0 %v7588_v18  ;;  %v302_v18 = vld [vmem:[%s10721_s1 + $0x40] sm:$0xff]  ;;  %v9186_v33 = vld [vmem:[%s8555_s28 + $0x149] sm:$0xff] }
  0xc9   : > { %7593 = vmatprep.subr.bf16.mxu0 %v9094_v48  ;;  %v7448_v49 = vpack.c.bf16 %v303_v52, %v302_v18  ;;  %6266 = vmatmul.mubr.f32.gmra.mrb[20].mxu1 %v9110_v0  ;;  %v305_v18 = vld [vmem:[%s10721_s1 + $0x58] sm:$0xff]  ;;  %10806 = vst [vmem:[#allocation28_spill] sm:$0xff] %v9186_v33 }
  0xca   : > { %7447 = vmatpush3.bf16.msra.mxu1 %v7444_v62  ;;  %6268 = vmatprep.mubr.f32.mxu1 %v9124_v54  ;;  %v9143_v62 = vld [vmem:[%s8555_s28 + $0x109] sm:$0xff]  ;;  %v7452_v52 = vpack.c.bf16 %v305_v18, %v304_v20  ;;  %v9159_v20 = vld [vmem:[%s8555_s28 + $0x121] sm:$0xff] }
  0xcb   : > { %6568 = vmatmul.mubr.f32.gmra.mrb[16].mxu0 %v9104_v21  ;;  %7449 = vmatprep.subr.bf16.mxu1 %v7448_v49  ;;  %v9137_v21 = vld [vmem:[%s8555_s28 + $0x101] sm:$0xff]  ;;  %10801 = vst [vmem:[#allocation23_spill] sm:$0xff] %v9143_v62  ;;  %v9166_v18 = vld [vmem:[%s8555_s28 + $0x129] sm:$0xff] }
  0xcc   : > { %6570 = vmatprep.mubr.f32.mxu0 %v9110_v0  ;;  %10800 = vst [vmem:[#allocation22_spill] sm:$0xff] %v9137_v21  ;;  %v307_v0 = vld [vmem:[%s10721_s1 + $0x68] sm:$0xff]  ;;  %10803 = vst [vmem:[#allocation25_spill] sm:$0xff] %v9166_v18 }
  0xcd   : > { %6269 = vmatmul.mubr.f32.gmra.mrb[22].mxu1 %v9127_v23 }
  0xce   : > { %7451 = vmatpush3.bf16.msra.mxu1 %v7448_v49  ;;  %6271 = vmatprep.mubr.f32.mxu1 %v9137_v21 }
  0xcf   : > { %6571 = vmatmul.mubr.f32.gmra.mrb[18].mxu0 %v9124_v54  ;;  %7453 = vmatprep.subr.bf16.mxu1 %v7452_v52  ;;  %v306_v54 = vld [vmem:[%s10721_s1 + $0x60] sm:$0xff] }
  0xd0   : > { %6573 = vmatprep.mubr.f32.mxu0 %v9127_v23  ;;  %v9156_v23 = vld [vmem:[%s8555_s28 + $0x111] sm:$0xff]  ;;  %v7456_v49 = vpack.c.bf16 %v307_v0, %v306_v54 }
  0xd1   : > { %10802 = vst [vmem:[#allocation24_spill] sm:$0xff] %v9156_v23  ;;  %6272 = vmatmul.mubr.f32.gmra.mrb[24].mxu1 %v9143_v62  ;;  %v308_v0 = vld [vmem:[%s10721_s1 + $0x70] sm:$0xff]  ;;  %v309_v54 = vld [vmem:[%s10721_s1 + $0x78] sm:$0xff] }
  0xd2   : > { %7455 = vmatpush3.bf16.msra.mxu1 %v7452_v52  ;;  %6274 = vmatprep.mubr.f32.mxu1 %v9156_v23  ;;  %v9175_v52 = vld [vmem:[%s8555_s28 + $0x131] sm:$0xff] }
  0xd3   : > { %6574 = vmatmul.mubr.f32.gmra.mrb[20].mxu0 %v9137_v21  ;;  %7457 = vmatprep.subr.bf16.mxu1 %v7456_v49  ;;  %10804 = vst [vmem:[#allocation26_spill] sm:$0xff] %v9175_v52  ;;  %v9183_v21 = vld [vmem:[%s8555_s28 + $0x141] sm:$0xff] }
  0xd4   : > { %6576 = vmatprep.mubr.f32.mxu0 %v9143_v62  ;;  %v264_v62 = vld [vmem:[%s8555_s28] sm:$0xff]  ;;  %10805 = vst [vmem:[#allocation27_spill] sm:$0xff] %v9183_v21 }
  0xd5   : > { %6275 = vmatmul.mubr.f32.gmra.mrb[26].mxu1 %v9159_v20 }
  0xd6   : > { %7459 = vmatpush3.bf16.msra.mxu1 %v7456_v49  ;;  %6277 = vmatprep.mubr.f32.mxu1 %v9166_v18  ;;  %v9193_v49 = vld [vmem:[%s8555_s28 + $0x151] sm:$0xff] }
  0xd7   : > { %6577 = vmatmul.mubr.f32.gmra.mrb[22].mxu0 %v9156_v23  ;;  %v7460_v23 = vpack.c.bf16 %v309_v54, %v308_v0  ;;  %v265_v0 = vld [vmem:[%s8555_s28 + $0x8] sm:$0xff]  ;;  %10807 = vst [vmem:[#allocation29_spill] sm:$0xff] %v9193_v49  ;;  %v266_v54 = vld [vmem:[%s8555_s28 + $0x10] sm:$0xff] }
  0xd8   : > { %6579 = vmatprep.mubr.f32.mxu0 %v9159_v20 }
  0xd9   : > { %7461 = vmatprep.subr.bf16.mxu1 %v7460_v23  ;;  %6278 = vmatmul.mubr.f32.gmra.mrb[28].mxu1 %v9175_v52 }
  0xda   : > { %7463 = vmatpush3.bf16.msra.mxu1 %v7460_v23  ;;  %6312 = vmatprep.mubr.f32.mxu1 %v264_v62  ;;  %v5243_v23 = vld [vmem:[%s10721_s1 + $0x318] sm:$0xff]  ;;  %v267_v62 = vld [vmem:[%s8555_s28 + $0x20] sm:$0xff] }
  0xdb   : > { %6580 = vmatmul.mubr.f32.gmra.mrb[24].mxu0 %v9166_v18  ;;  %v5242_v18 = vld [vmem:[%s10721_s1 + $0x310] sm:$0xff] }
  0xdc   : > { %6582 = vmatprep.mubr.f32.mxu0 %v9175_v52  ;;  %v5245_v52 = vld [vmem:[%s10721_s1 + $0x328] sm:$0xff] }
  0xdd   : > { %6313 = vmatmul.mubr.f32.vlgmr.msra.gmra.mrb[0].mxu1 %v265_v0  ;;  %v5244_v0 = vld [vmem:[%s10721_s1 + $0x320] sm:$0xff] }
  0xde   : > { %6315 = vmatprep.mubr.f32.mxu1 %v266_v54  ;;  %v269_v54 = vld [vmem:[%s8555_s28 + $0x30] sm:$0xff] }
  0xdf   : > { %6583 = vmatmul.mubr.f32.gmra.mrb[26].mxu0 %v9183_v21  ;;  %v268_v21 = vld [vmem:[%s8555_s28 + $0x28] sm:$0xff] }
  0xe0   : > { %6585 = vmatprep.mubr.f32.mxu0 %v9186_v33  ;;  %v7596_v33 = vpack.c.bf16 %v5243_v23, %v5242_v18  ;;  %v5246_v18 = vld [vmem:[%s10721_s1 + $0x330] sm:$0xff]  ;;  %v273_v23 = vld [vmem:[%s8555_s28 + $0x60] sm:$0xff] }
  0xe1   : > { %6316 = vmatmul.mubr.f32.gmra.mrb[2].mxu1 %v267_v62  ;;  %v5251_v62 = vld [vmem:[%s10721_s1 + $0x358] sm:$0xff] }
  0xe2   : > { %6318 = vmatprep.mubr.f32.mxu1 %v268_v21  ;;  %v5247_v21 = vld [vmem:[%s10721_s1 + $0x338] sm:$0xff] }
  0xe3   : > { %6586 = vmatmul.mubr.f32.gmra.mrb[28].mxu0 %v9193_v49  ;;  %v270_v49 = vld [vmem:[%s8555_s28 + $0x40] sm:$0xff] }
  0xe4   : > { %6620 = vmatprep.mubr.f32.mxu0 %v8603_v35  ;;  %v7600_v35 = vpack.c.bf16 %v5245_v52, %v5244_v0  ;;  %v5248_v52 = vld [vmem:[%s10721_s1 + $0x340] sm:$0xff]  ;;  %v275_v0 = vld [vmem:[%s8555_s28 + $0x70] sm:$0xff] }
  0xe5   : > { %6319 = vmatmul.mubr.f32.gmra.mrb[4].mxu1 %v269_v54  ;;  %v5252_v54 = vld [vmem:[%s10721_s1 + $0x360] sm:$0xff] }
  0xe6   : > { %6321 = vmatprep.mubr.f32.mxu1 %v270_v49  ;;  %v5249_v49 = vld [vmem:[%s10721_s1 + $0x348] sm:$0xff] }
  0xe7   : > { %6621 = vmatmul.mubr.f32.vlgmr.msra.gmra.mrb[0].mxu0 %v8606_v36  ;;  %v271_v36 = vld [vmem:[%s8555_s28 + $0x48] sm:$0xff] }
  0xe8   : > { %7595 = vmatpush3.bf16.msra.mxu0 %v9094_v48  ;;  %6623 = vmatprep.mubr.f32.mxu0 %v8617_v40  ;;  %v272_v48 = vld [vmem:[%s8555_s28 + $0x50] sm:$0xff]  ;;  %v7604_v40 = vpack.c.bf16 %v5247_v21, %v5246_v18  ;;  %v277_v18 = vld [vmem:[%s8555_s28 + $0x88] sm:$0xff] }
  0xe9   : > { %7597 = vmatprep.subr.bf16.mxu0 %v7596_v33  ;;  %6322 = vmatmul.mubr.f32.gmra.mrb[6].mxu1 %v271_v36  ;;  %v5254_v21 = vld [vmem:[%s10721_s1 + $0x370] sm:$0xff]  ;;  %v5255_v36 = vld [vmem:[%s10721_s1 + $0x378] sm:$0xff] }
  0xea   : > { %6324 = vmatprep.mubr.f32.mxu1 %v272_v48  ;;  %v279_v48 = vld [vmem:[%s8555_s28 + $0xa0] sm:$0xff] }
  0xeb   : > { %6624 = vmatmul.mubr.f32.gmra.mrb[2].mxu0 %v8620_v41  ;;  %v274_v41 = vld [vmem:[%s8555_s28 + $0x68] sm:$0xff] }
  0xec   : > { %6626 = vmatprep.mubr.f32.mxu0 %v8631_v45  ;;  %7599 = vmatpush3.bf16.msra.mxu0 %v7596_v33  ;;  %v7608_v45 = vpack.c.bf16 %v5249_v49, %v5248_v52  ;;  %v5250_v33 = vld [vmem:[%s10721_s1 + $0x350] sm:$0xff]  ;;  %v5287_v52 = vld [vmem:[%s10721_s1 + $0x388] sm:$0xff] }
  0xed   : > { %7601 = vmatprep.subr.bf16.mxu0 %v7600_v35  ;;  %6325 = vmatmul.mubr.f32.gmra.mrb[8].mxu1 %v273_v23  ;;  %v281_v49 = vld [vmem:[%s8555_s28 + $0xb0] sm:$0xff]  ;;  %v283_v23 = vld [vmem:[%s8555_s28 + $0xc8] sm:$0xff] }
  0xee   : > { %6327 = vmatprep.mubr.f32.mxu1 %v274_v41  ;;  %v284_v41 = vld [vmem:[%s8555_s28 + $0xd0] sm:$0xff] }
  0xef   : > { %6627 = vmatmul.mubr.f32.gmra.mrb[4].mxu0 %v8634_v46  ;;  %v276_v46 = vld [vmem:[%s8555_s28 + $0x80] sm:$0xff] }
  0xf0   : > { %6629 = vmatprep.mubr.f32.mxu0 %v8645_v50  ;;  %7603 = vmatpush3.bf16.msra.mxu0 %v7600_v35  ;;  %v7612_v50 = vpack.c.bf16 %v5251_v62, %v5250_v33  ;;  %v5253_v35 = vld [vmem:[%s10721_s1 + $0x368] sm:$0xff] }
  0xf1   : > { %7605 = vmatprep.subr.bf16.mxu0 %v7604_v40  ;;  %6328 = vmatmul.mubr.f32.gmra.mrb[10].mxu1 %v275_v0  ;;  %v9304_v33 = vld [vmem:[%s8555_s28 + $0x14a] sm:$0xff] }
  0xf2   : > { %6330 = vmatprep.mubr.f32.mxu1 %v276_v46  ;;  %v5291_v62 = vld [vmem:[%s10721_s1 + $0x3a8] sm:$0xff]  ;;  %v5293_v46 = vld [vmem:[%s10721_s1 + $0x3b8] sm:$0xff] }
  0xf3   : > { %6630 = vmatmul.mubr.f32.gmra.mrb[6].mxu0 %v8648_v51  ;;  %v278_v51 = vld [vmem:[%s8555_s28 + $0x90] sm:$0xff] }
  0xf4   : > { %6632 = vmatprep.mubr.f32.mxu0 %v8659_v55  ;;  %7607 = vmatpush3.bf16.msra.mxu0 %v7604_v40  ;;  %v7616_v55 = vpack.c.bf16 %v5253_v35, %v5252_v54  ;;  %v5286_v40 = vld [vmem:[%s10721_s1 + $0x380] sm:$0xff]  ;;  %v5297_v54 = vld [vmem:[%s10721_s1 + $0x3d8] sm:$0xff]  ;;  %v5299_v35 = vld [vmem:[%s10721_s1 + $0x3e8] sm:$0xff] }
  0xf5   : > { %7609 = vmatprep.subr.bf16.mxu0 %v7608_v45  ;;  %6331 = vmatmul.mubr.f32.gmra.mrb[12].mxu1 %v277_v18  ;;  %v5301_v18 = vld [vmem:[%s10721_s1 + $0x3f8] sm:$0xff] }
  0xf6   : > { %6333 = vmatprep.mubr.f32.mxu1 %v278_v51  ;;  %v5333_v51 = vld [vmem:[%s10721_s1 + $0x408] sm:$0xff] }
  0xf7   : > { %6633 = vmatmul.mubr.f32.gmra.mrb[8].mxu0 %v8662_v56  ;;  %v280_v56 = vld [vmem:[%s8555_s28 + $0xa8] sm:$0xff] }
  0xf8   : > { %6635 = vmatprep.mubr.f32.mxu0 %v8673_v60  ;;  %7611 = vmatpush3.bf16.msra.mxu0 %v7608_v45  ;;  %v7620_v60 = vpack.c.bf16 %v5255_v36, %v5254_v21  ;;  %v289_v45 = vld [vmem:[%s8555_s28 + $0x108] sm:$0xff]  ;;  %v5356_v21 = vld [vmem:[%s10723_s3 + $0x90] sm:$0xff]  ;;  %v5357_v36 = vld [vmem:[%s10723_s3 + $0x98] sm:$0xff] }
  0xf9   : > { %7613 = vmatprep.subr.bf16.mxu0 %v7612_v50  ;;  %6334 = vmatmul.mubr.f32.gmra.mrb[14].mxu1 %v279_v48  ;;  %v5336_v48 = vld [vmem:[%s10721_s1 + $0x420] sm:$0xff] }
  0xfa   : > { %6336 = vmatprep.mubr.f32.mxu1 %v280_v56  ;;  %v5337_v56 = vld [vmem:[%s10721_s1 + $0x428] sm:$0xff] }
  0xfb   : > { %6636 = vmatmul.mubr.f32.gmra.mrb[10].mxu0 %v8676_v61  ;;  %v282_v61 = vld [vmem:[%s8555_s28 + $0xc0] sm:$0xff] }
  0xfc   : > { %6638 = vmatprep.mubr.f32.mxu0 %v8687_v1  ;;  %7615 = vmatpush3.bf16.msra.mxu0 %v7612_v50  ;;  %v7624_v1 = vpack.c.bf16 %v5287_v52, %v5286_v40  ;;  %v5295_v50 = vld [vmem:[%s10721_s1 + $0x3c8] sm:$0xff]  ;;  %v10812_v40 = vld [vmem:[#allocation7_spill] sm:$0xff]  ;;  %v10813_v52 = vld [vmem:[#allocation8_spill] sm:$0xff] }
  0xfd   : > { %7617 = vmatprep.subr.bf16.mxu0 %v7616_v55  ;;  %6337 = vmatmul.mubr.f32.gmra.mrb[16].mxu1 %v281_v49  ;;  %v7664_v49 = vpack.c.bf16 %v5337_v56, %v5336_v48  ;;  %v5312_v48 = vld [vmem:[%s8555_s28 + $0xaa] sm:$0xff]  ;;  %v5313_v56 = vld [vmem:[%s8555_s28 + $0xb2] sm:$0xff] }
  0xfe   : > { %6339 = vmatprep.mubr.f32.mxu1 %v282_v61  ;;  %v5338_v61 = vld [vmem:[%s10721_s1 + $0x430] sm:$0xff] }
  0xff   : > { %6639 = vmatmul.mubr.f32.gmra.mrb[12].mxu0 %v8690_v2  ;;  %v285_v2 = vld [vmem:[%s8555_s28 + $0xe0] sm:$0xff] }
 0x100   : > { %6641 = vmatprep.mubr.f32.mxu0 %v8695_v4  ;;  %7619 = vmatpush3.bf16.msra.mxu0 %v7616_v55  ;;  %v286_v4 = vld [vmem:[%s8555_s28 + $0xe8] sm:$0xff] }
 0x101   : > { %7621 = vmatprep.subr.bf16.mxu0 %v7620_v60  ;;  %6340 = vmatmul.mubr.f32.gmra.mrb[18].mxu1 %v283_v23  ;;  %v10814_v23 = vld [vmem:[#allocation9_spill] sm:$0xff] }
 0x102   : > { %6342 = vmatprep.mubr.f32.mxu1 %v284_v41  ;;  %v10815_v41 = vld [vmem:[#allocation10_spill] sm:$0xff] }
 0x103   : > { %6642 = vmatmul.mubr.f32.gmra.mrb[14].mxu0 %v8698_v5  ;;  %v287_v5 = vld [vmem:[%s8555_s28 + $0xf0] sm:$0xff] }
 0x104   : > { %6644 = vmatprep.mubr.f32.mxu0 %v8703_v6  ;;  %7623 = vmatpush3.bf16.msra.mxu0 %v7620_v60  ;;  %v288_v6 = vld [vmem:[%s8555_s28 + $0x100] sm:$0xff]  ;;  %v7692_v60 = vpack.c.bf16 %v5357_v36, %v5356_v21  ;;  %v5310_v21 = vld [vmem:[%s8555_s28 + $0x92] sm:$0xff] }
 0x105   : > { %7625 = vmatprep.subr.bf16.mxu0 %v7624_v1  ;;  %6343 = vmatmul.mubr.f32.gmra.mrb[20].mxu1 %v285_v2  ;;  %v5311_v36 = vld [vmem:[%s8555_s28 + $0xa2] sm:$0xff] }
 0x106   : > { %6345 = vmatprep.mubr.f32.mxu1 %v286_v4  ;;  %v5358_v4 = vld [vmem:[%s10723_s3 + $0xa0] sm:$0xff] }
 0x107   : > { %6645 = vmatmul.mubr.f32.gmra.mrb[16].mxu0 %v8706_v7  ;;  %v290_v7 = vld [vmem:[%s8555_s28 + $0x110] sm:$0xff] }
 0x108   : > { %6647 = vmatprep.mubr.f32.mxu0 %v8711_v8  ;;  %v291_v8 = vld [vmem:[%s8555_s28 + $0x120] sm:$0xff] }
 0x109   : > { %6346 = vmatmul.mubr.f32.gmra.mrb[22].mxu1 %v287_v5  ;;  %v5359_v5 = vld [vmem:[%s10723_s3 + $0xa8] sm:$0xff] }
 0x10a   : > { %6348 = vmatprep.mubr.f32.mxu1 %v288_v6  ;;  %v5340_v6 = vld [vmem:[%s10721_s1 + $0x440] sm:$0xff] }
 0x10b   : > { %6648 = vmatmul.mubr.f32.gmra.mrb[18].mxu0 %v8714_v9  ;;  %v292_v9 = vld [vmem:[%s8555_s28 + $0x128] sm:$0xff] }
 0x10c   : > { %6650 = vmatprep.mubr.f32.mxu0 %v8719_v10  ;;  %v293_v10 = vld [vmem:[%s8555_s28 + $0x130] sm:$0xff] }
 0x10d   : > { %6349 = vmatmul.mubr.f32.gmra.mrb[24].mxu1 %v289_v45  ;;  %v5341_v45 = vld [vmem:[%s10721_s1 + $0x448] sm:$0xff] }
 0x10e   : > { %6351 = vmatprep.mubr.f32.mxu1 %v290_v7  ;;  %v7696_v7 = vpack.c.bf16 %v5359_v5, %v5358_v4  ;;  %v5320_v4 = vld [vmem:[%s8555_s28 + $0x102] sm:$0xff] }
 0x10f   : > { %6651 = vmatmul.mubr.f32.gmra.mrb[20].mxu0 %v8722_v11  ;;  %v9301_v11 = vld [vmem:[%s8555_s28 + $0x142] sm:$0xff] }
 0x110   : > { %6653 = vmatprep.mubr.f32.mxu0 %v8727_v12  ;;  %v9309_v12 = vld [vmem:[%s8555_s28 + $0x152] sm:$0xff] }
 0x111   : > { %6352 = vmatmul.mubr.f32.gmra.mrb[26].mxu1 %v291_v8  ;;  %v10816_v8 = vld [vmem:[#allocation11_spill] sm:$0xff] }
 0x112   : > { %6354 = vmatprep.mubr.f32.mxu1 %v292_v9  ;;  %v10817_v9 = vld [vmem:[#allocation12_spill] sm:$0xff] }
 0x113   : > { %6654 = vmatmul.mubr.f32.gmra.mrb[22].mxu0 %v8730_v13  ;;  %v5288_v13 = vld [vmem:[%s10721_s1 + $0x390] sm:$0xff] }
 0x114   : > { %6656 = vmatprep.mubr.f32.mxu0 %v8735_v14  ;;  %v5289_v14 = vld [vmem:[%s10721_s1 + $0x398] sm:$0xff] }
 0x115   : > { %6355 = vmatmul.mubr.f32.gmra.mrb[28].mxu1 %v293_v10  ;;  %v7672_v10 = vpack.c.bf16 %v5341_v45, %v5340_v6  ;;  %v5321_v6 = vld [vmem:[%s8555_s28 + $0x10a] sm:$0xff] }
 0x117   : > { %6657 = vmatmul.mubr.f32.gmra.mrb[24].mxu0 %v8738_v15  ;;  %v7628_v15 = vpack.c.bf16 %v5289_v14, %v5288_v13  ;;  %v5342_v13 = vld [vmem:[%s10721_s1 + $0x450] sm:$0xff]  ;;  %v5343_v14 = vld [vmem:[%s10721_s1 + $0x458] sm:$0xff] }
 0x118   : > { %6659 = vmatprep.mubr.f32.mxu0 %v8743_v16  ;;  %v5290_v16 = vld [vmem:[%s10721_s1 + $0x3a0] sm:$0xff] }
 0x119   : > { %v7632_v0 = vpack.c.bf16 %v5291_v62, %v5290_v16  ;;  %v10819_v16 = vld [vmem:[#allocation14_spill] sm:$0xff]  ;;  %v7676_v62 = vpack.c.bf16 %v5343_v14, %v5342_v13 }
 0x11a   : > { %v5324_v13 = vld [vmem:[%s8555_s28 + $0x12a] sm:$0xff] }
 0x11b   : > { %6660 = vmatmul.mubr.f32.gmra.mrb[26].mxu0 %v9301_v11 }
 0x11c   : > { %6662 = vmatprep.mubr.f32.mxu0 %v9304_v33 }
 0x11f   : > { %6663 = vmatmul.mubr.f32.gmra.mrb[28].mxu0 %v9309_v12 }
 0x120   : > { %6697 = vmatprep.mubr.f32.mxu0 %v8762_v25  ;;  %v5292_v25 = vld [vmem:[%s10721_s1 + $0x3b0] sm:$0xff] }
 0x123   : > { %6698 = vmatmul.mubr.f32.vlgmr.msra.gmra.mrb[0].mxu0 %v8765_v26  ;;  %v7636_v26 = vpack.c.bf16 %v5293_v46, %v5292_v25  ;;  %v5361_v25 = vld [vmem:[%s10723_s3 + $0xb8] sm:$0xff]  ;;  %v5344_v46 = vld [vmem:[%s10721_s1 + $0x460] sm:$0xff] }
 0x124   : > { %7627 = vmatpush3.bf16.msra.mxu0 %v7624_v1  ;;  %6700 = vmatprep.mubr.f32.mxu0 %v8776_v30  ;;  %v5294_v30 = vld [vmem:[%s10721_s1 + $0x3c0] sm:$0xff]  ;;  %v5339_v1 = vld [vmem:[%s10721_s1 + $0x438] sm:$0xff] }
 0x125   : > { %7629 = vmatprep.subr.bf16.mxu0 %v7628_v15  ;;  %v7668_v2 = vpack.c.bf16 %v5339_v1, %v5338_v61  ;;  %v5318_v1 = vld [vmem:[%s8555_s28 + $0xea] sm:$0xff] }
 0x127   : > { %6701 = vmatmul.mubr.f32.gmra.mrb[2].mxu0 %v8779_v31  ;;  %v7640_v31 = vpack.c.bf16 %v5295_v50, %v5294_v30  ;;  %v10820_v50 = vld [vmem:[#allocation15_spill] sm:$0xff] }
 0x128   : > { %6703 = vmatprep.mubr.f32.mxu0 %v8790_v37  ;;  %7631 = vmatpush3.bf16.msra.mxu0 %v7628_v15  ;;  %v5296_v37 = vld [vmem:[%s10721_s1 + $0x3d0] sm:$0xff]  ;;  %v10818_v15 = vld [vmem:[#allocation13_spill] sm:$0xff] }
 0x129   : > { %7633 = vmatprep.subr.bf16.mxu0 %v7632_v0 }
 0x12b   : > { %6704 = vmatmul.mubr.f32.gmra.mrb[4].mxu0 %v8793_v38  ;;  %v7644_v38 = vpack.c.bf16 %v5297_v54, %v5296_v37  ;;  %v5346_v54 = vld [vmem:[%s10721_s1 + $0x470] sm:$0xff] }
 0x12c   : > { %6706 = vmatprep.mubr.f32.mxu0 %v8804_v44  ;;  %7635 = vmatpush3.bf16.msra.mxu0 %v7632_v0  ;;  %v5298_v44 = vld [vmem:[%s10721_s1 + $0x3e0] sm:$0xff]  ;;  %v5360_v0 = vld [vmem:[%s10723_s3 + $0xb0] sm:$0xff] }
 0x12d   : > { %7637 = vmatprep.subr.bf16.mxu0 %v7636_v26  ;;  %v7700_v30 = vpack.c.bf16 %v5361_v25, %v5360_v0 }
 0x12f   : > { %6707 = vmatmul.mubr.f32.gmra.mrb[6].mxu0 %v8807_v47  ;;  %v7648_v47 = vpack.c.bf16 %v5299_v35, %v5298_v44  ;;  %v10822_v35 = vld [vmem:[#allocation17_spill] sm:$0xff] }
 0x130   : > { %6709 = vmatprep.mubr.f32.mxu0 %v8824_v57  ;;  %7639 = vmatpush3.bf16.msra.mxu0 %v7636_v26  ;;  %v5300_v57 = vld [vmem:[%s10721_s1 + $0x3f0] sm:$0xff]  ;;  %v5345_v26 = vld [vmem:[%s10721_s1 + $0x468] sm:$0xff] }
 0x131   : > { %7641 = vmatprep.subr.bf16.mxu0 %v7640_v31  ;;  %v7680_v37 = vpack.c.bf16 %v5345_v26, %v5344_v46  ;;  %v5329_v46 = vld [vmem:[%s8555_s28 + $0x162] sm:$0xff] }
 0x133   : > { %6710 = vmatmul.mubr.f32.gmra.mrb[8].mxu0 %v8827_v59  ;;  %v7652_v59 = vpack.c.bf16 %v5301_v18, %v5300_v57  ;;  %v10824_v57 = vld [vmem:[#allocation19_spill] sm:$0xff]  ;;  %v10825_v18 = vld [vmem:[#allocation20_spill] sm:$0xff] }
 0x134   : > { %6712 = vmatprep.mubr.f32.mxu0 %v8841_v17  ;;  %7643 = vmatpush3.bf16.msra.mxu0 %v7640_v31  ;;  %v5332_v17 = vld [vmem:[%s10721_s1 + $0x400] sm:$0xff]  ;;  %v10821_v31 = vld [vmem:[#allocation16_spill] sm:$0xff] }
 0x135   : > { %7645 = vmatprep.subr.bf16.mxu0 %v7644_v38 }
 0x137   : > { %6713 = vmatmul.mubr.f32.gmra.mrb[10].mxu0 %v8847_v19  ;;  %v7656_v19 = vpack.c.bf16 %v5333_v51, %v5332_v17  ;;  %v10829_v17 = vld [vmem:[#allocation24_spill] sm:$0xff]  ;;  %v10830_v51 = vld [vmem:[#allocation25_spill] sm:$0xff] }
 0x138   : > { %6715 = vmatprep.mubr.f32.mxu0 %v8864_v28  ;;  %7647 = vmatpush3.bf16.msra.mxu0 %v7644_v38  ;;  %v10808_v28 = vld [vmem:[#allocation3_spill] sm:$0xff]  ;;  %v5347_v38 = vld [vmem:[%s10721_s1 + $0x478] sm:$0xff] }
 0x139   : > { %7649 = vmatprep.subr.bf16.mxu0 %v7648_v47  ;;  %v7684_v44 = vpack.c.bf16 %v5347_v38, %v5346_v54 }
 0x13b   : > { %6716 = vmatmul.mubr.f32.gmra.mrb[12].mxu0 %v8867_v32  ;;  %v10809_v32 = vld [vmem:[#allocation4_spill] sm:$0xff] }
 0x13c   : > { %6718 = vmatprep.mubr.f32.mxu0 %v8877_v39  ;;  %7651 = vmatpush3.bf16.msra.mxu0 %v7648_v47  ;;  %v10810_v39 = vld [vmem:[#allocation5_spill] sm:$0xff]  ;;  %v10823_v47 = vld [vmem:[#allocation18_spill] sm:$0xff] }
 0x13d   : > { %7653 = vmatprep.subr.bf16.mxu0 %v7652_v59 }
 0x13f   : > { %6719 = vmatmul.mubr.f32.gmra.mrb[14].mxu0 %v8883_v43  ;;  %v5237_v43 = vld [vmem:[%s8555_s28 + $0x160] sm:$0xff] }
 0x140   : > { %6721 = vmatprep.mubr.f32.mxu0 %v8895_v53  ;;  %7655 = vmatpush3.bf16.msra.mxu0 %v7652_v59  ;;  %v5238_v53 = vld [vmem:[%s8555_s28 + $0x168] sm:$0xff]  ;;  %v10828_v59 = vld [vmem:[#allocation23_spill] sm:$0xff] }
 0x141   : > { %7657 = vmatprep.subr.bf16.mxu0 %v7656_v19 }
 0x143   : > { %6722 = vmatmul.mubr.f32.gmra.mrb[16].mxu0 %v8898_v58  ;;  %v5354_v58 = vld [vmem:[%s10723_s3 + $0x80] sm:$0xff] }
 0x144   : > { %6724 = vmatprep.mubr.f32.mxu0 %v8906_v63  ;;  %v5355_v63 = vld [vmem:[%s10723_s3 + $0x88] sm:$0xff] }
 0x147   : > { %6725 = vmatmul.mubr.f32.gmra.mrb[18].mxu0 %v8912_v3  ;;  %v7688_v3 = vpack.c.bf16 %v5355_v63, %v5354_v58  ;;  %v5285_v58 = vld [vmem:[%s8555_s28 + $0x171] sm:$0xff] }
 0x148   : > { %6727 = vmatprep.mubr.f32.mxu0 %v8923_v22  ;;  %v5239_v22 = vld [vmem:[%s8555_s28 + $0x170] sm:$0xff] }
 0x149   : > { %7689 = vmatprep.subr.bf16.mxu1 %v7688_v3  ;;  %v5303_v63 = vld [vmem:[%s8555_s28 + $0x4a] sm:$0xff] }
 0x14a   : > { %7691 = vmatpush3.bf16.msra.mxu1 %v7688_v3  ;;  %v5304_v3 = vld [vmem:[%s8555_s28 + $0x52] sm:$0xff] }
 0x14b   : > { %6728 = vmatmul.mubr.f32.gmra.mrb[20].mxu0 %v8926_v24  ;;  %v5334_v24 = vld [vmem:[%s10721_s1 + $0x410] sm:$0xff]  ;;  %7693 = vmatprep.subr.bf16.mxu1 %v7692_v60 }
 0x14c   : > { %6730 = vmatprep.mubr.f32.mxu0 %v8931_v27  ;;  %v5335_v27 = vld [vmem:[%s10721_s1 + $0x418] sm:$0xff] }
 0x14d   : > { %v7660_v55 = vpack.c.bf16 %v5335_v27, %v5334_v24  ;;  %v5306_v24 = vld [vmem:[%s8555_s28 + $0x6a] sm:$0xff]  ;;  %v5307_v27 = vld [vmem:[%s8555_s28 + $0x72] sm:$0xff] }
 0x14e   : > { %7695 = vmatpush3.bf16.msra.mxu1 %v7692_v60  ;;  %v5314_v60 = vld [vmem:[%s8555_s28 + $0xc2] sm:$0xff] }
 0x14f   : > { %6731 = vmatmul.mubr.f32.gmra.mrb[22].mxu0 %v8940_v42  ;;  %v10811_v42 = vld [vmem:[#allocation6_spill] sm:$0xff]  ;;  %7697 = vmatprep.subr.bf16.mxu1 %v7696_v7 }
 0x150   : > { %6733 = vmatprep.mubr.f32.mxu0 %v10808_v28  ;;  %v10832_v28 = vld [vmem:[#allocation27_spill] sm:$0xff] }
 0x152   : > { %7699 = vmatpush3.bf16.msra.mxu1 %v7696_v7  ;;  %v5322_v7 = vld [vmem:[%s8555_s28 + $0x112] sm:$0xff] }
 0x153   : > { %6734 = vmatmul.mubr.f32.gmra.mrb[24].mxu0 %v10809_v32  ;;  %7701 = vmatprep.subr.bf16.mxu1 %v7700_v30  ;;  %v10833_v32 = vld [vmem:[#allocation28_spill] sm:$0xff] }
 0x154   : > { %6736 = vmatprep.mubr.f32.mxu0 %v10810_v39  ;;  %v10834_v39 = vld [vmem:[#allocation29_spill] sm:$0xff] }
 0x156   : > { %7703 = vmatpush3.bf16.msra.mxu1 %v7700_v30  ;;  %v5330_v30 = vld [vmem:[%s8555_s28 + $0x16a] sm:$0xff] }
 0x157   : > { %6737 = vmatmul.mubr.f32.gmra.mrb[26].mxu0 %v5237_v43  ;;  %v5283_v43 = vld [vmem:[%s8555_s28 + $0x161] sm:$0xff] }
 0x158   : > { %6739 = vmatprep.mubr.f32.mxu0 %v5238_v53  ;;  %v5284_v53 = vld [vmem:[%s8555_s28 + $0x169] sm:$0xff] }
 0x15b   : > { %6740 = vmatmul.mubr.f32.gmra.mrb[28].mxu0 %v5239_v22  ;;  %v5305_v22 = vld [vmem:[%s8555_s28 + $0x62] sm:$0xff] }
 0x15c   : > { %6774 = vmatprep.mubr.f32.mxu0 %v10811_v42  ;;  %v5308_v42 = vld [vmem:[%s8555_s28 + $0x82] sm:$0xff] }
 0x15f   : > { %6775 = vmatmul.mubr.f32.vlgmr.msra.gmra.mrb[0].mxu0 %v10812_v40  ;;  %v5315_v40 = vld [vmem:[%s8555_s28 + $0xca] sm:$0xff] }
 0x160   : > { %7659 = vmatpush3.bf16.msra.mxu0 %v7656_v19  ;;  %6777 = vmatprep.mubr.f32.mxu0 %v10813_v52  ;;  %v10831_v19 = vld [vmem:[#allocation26_spill] sm:$0xff]  ;;  %v5316_v52 = vld [vmem:[%s8555_s28 + $0xd2] sm:$0xff] }
 0x161   : > { %7661 = vmatprep.subr.bf16.mxu0 %v7660_v55 }
 0x163   : > { %6778 = vmatmul.mubr.f32.gmra.mrb[2].mxu0 %v10814_v23 }
 0x164   : > { %6780 = vmatprep.mubr.f32.mxu0 %v10815_v41  ;;  %7663 = vmatpush3.bf16.msra.mxu0 %v7660_v55  ;;  %v5309_v55 = vld [vmem:[%s8555_s28 + $0x8a] sm:$0xff]  ;;  %v5319_v41 = vld [vmem:[%s8555_s28 + $0xf2] sm:$0xff] }
 0x165   : > { %7665 = vmatprep.subr.bf16.mxu0 %v7664_v49 }
 0x167   : > { %6781 = vmatmul.mubr.f32.gmra.mrb[4].mxu0 %v10816_v8 }
 0x168   : > { %6783 = vmatprep.mubr.f32.mxu0 %v10817_v9  ;;  %7667 = vmatpush3.bf16.msra.mxu0 %v7664_v49  ;;  %v5317_v49 = vld [vmem:[%s8555_s28 + $0xe2] sm:$0xff] }
 0x169   : > { %7669 = vmatprep.subr.bf16.mxu0 %v7668_v2  ;;  %v5323_v9 = vld [vmem:[%s8555_s28 + $0x122] sm:$0xff] }
 0x16b   : > { %6784 = vmatmul.mubr.f32.gmra.mrb[6].mxu0 %v10818_v15  ;;  %v5325_v15 = vld [vmem:[%s8555_s28 + $0x132] sm:$0xff] }
 0x16c   : > { %6786 = vmatprep.mubr.f32.mxu0 %v10819_v16  ;;  %7671 = vmatpush3.bf16.msra.mxu0 %v7668_v2 }
 0x16d   : > { %7673 = vmatprep.subr.bf16.mxu0 %v7672_v10 }
 0x16f   : > { %6787 = vmatmul.mubr.f32.gmra.mrb[8].mxu0 %v10820_v50 }
 0x170   : > { %6789 = vmatprep.mubr.f32.mxu0 %v10821_v31  ;;  %7675 = vmatpush3.bf16.msra.mxu0 %v7672_v10  ;;  %v5331_v31 = vld [vmem:[%s8555_s28 + $0x172] sm:$0xff] }
 0x171   : > { %7677 = vmatprep.subr.bf16.mxu0 %v7676_v62 }
 0x173   : > { %6790 = vmatmul.mubr.f32.gmra.mrb[10].mxu0 %v9070_v34  ;;  %v10826_v34 = vld [vmem:[#allocation21_spill] sm:$0xff] }
 0x174   : > { %6792 = vmatprep.mubr.f32.mxu0 %v9089_v29  ;;  %7679 = vmatpush3.bf16.msra.mxu0 %v7676_v62  ;;  %v10827_v29 = vld [vmem:[#allocation22_spill] sm:$0xff] }
 0x175   : > { %7681 = vmatprep.subr.bf16.mxu0 %v7680_v37 }
 0x177   : > { %6793 = vmatmul.mubr.f32.gmra.mrb[12].mxu0 %v10822_v35 }
 0x178   : > { %6795 = vmatprep.mubr.f32.mxu0 %v10823_v47  ;;  %7683 = vmatpush3.bf16.msra.mxu0 %v7680_v37 }
 0x179   : > { %7685 = vmatprep.subr.bf16.mxu0 %v7684_v44 }
 0x17b   : > { %6796 = vmatmul.mubr.f32.gmra.mrb[14].mxu0 %v10824_v57 }
 0x17c   : > { %6798 = vmatprep.mubr.f32.mxu0 %v10825_v18  ;;  %7687 = vmatpush3.bf16.msra.mxu0 %v7684_v44 }
 0x17f   : > { %6799 = vmatmul.mubr.f32.gmra.mrb[16].mxu0 %v10826_v34 }
 0x180   : > { %6801 = vmatprep.mubr.f32.mxu0 %v10827_v29 }
 0x183   : > { %6802 = vmatmul.mubr.f32.gmra.mrb[18].mxu0 %v10828_v59 }
 0x184   : > { %6804 = vmatprep.mubr.f32.mxu0 %v10829_v17 }
 0x187   : > { %6805 = vmatmul.mubr.f32.gmra.mrb[20].mxu0 %v9159_v20  ;;  %v5302_v20 = vld [vmem:[%s8555_s28 + $0x42] sm:$0xff] }
 0x188   : > { %6807 = vmatprep.mubr.f32.mxu0 %v10830_v51 }
 0x18b   : > { %6808 = vmatmul.mubr.f32.gmra.mrb[22].mxu0 %v10831_v19  ;;  %v5362_v19 = vld [vmem:[%s10723_s3 + $0xc0] sm:$0xff] }
 0x18c   : > { %6810 = vmatprep.mubr.f32.mxu0 %v10832_v28  ;;  %v5363_v28 = vld [vmem:[%s10723_s3 + $0xc8] sm:$0xff] }
 0x18f   : > { %6811 = vmatmul.mubr.f32.gmra.mrb[24].mxu0 %v10833_v32  ;;  %v7704_v32 = vpack.c.bf16 %v5363_v28, %v5362_v19 }
 0x190   : > { %6813 = vmatprep.mubr.f32.mxu0 %v10834_v39  ;;  %v5364_v39 = vld [vmem:[%s10723_s3 + $0xd0] sm:$0xff] }
 0x191   : > { %7705 = vmatprep.subr.bf16.mxu1 %v7704_v32 }
 0x192   : > { %7707 = vmatpush3.bf16.msra.mxu1 %v7704_v32 }
 0x193   : > { %6814 = vmatmul.mubr.f32.gmra.mrb[26].mxu0 %v5283_v43  ;;  %v5365_v43 = vld [vmem:[%s10723_s3 + $0xd8] sm:$0xff] }
 0x194   : > { %6816 = vmatprep.mubr.f32.mxu0 %v5284_v53  ;;  %v7708_v53 = vpack.c.bf16 %v5365_v43, %v5364_v39 }
 0x196   : > { %7709 = vmatprep.subr.bf16.mxu1 %v7708_v53 }
 0x197   : > { %6817 = vmatmul.mubr.f32.gmra.mrb[28].mxu0 %v5285_v58  ;;  %7711 = vmatpush3.bf16.msra.mxu1 %v7708_v53  ;;  %v5366_v58 = vld [vmem:[%s10723_s3 + $0xe0] sm:$0xff] }
 0x198   : > { %6851 = vmatprep.mubr.f32.mxu0 %v5302_v20  ;;  %v5367_v20 = vld [vmem:[%s10723_s3 + $0xe8] sm:$0xff] }
 0x19b   : > { %6852 = vmatmul.mubr.f32.vlgmr.msra.gmra.mrb[0].mxu0 %v5303_v63  ;;  %v7712_v63 = vpack.c.bf16 %v5367_v20, %v5366_v58 }
 0x19c   : > { %6854 = vmatprep.mubr.f32.mxu0 %v5304_v3  ;;  %v5368_v3 = vld [vmem:[%s10723_s3 + $0xf0] sm:$0xff] }
 0x19d   : > { %7713 = vmatprep.subr.bf16.mxu1 %v7712_v63 }
 0x19e   : > { %7715 = vmatpush3.bf16.msra.mxu1 %v7712_v63 }
 0x19f   : > { %6855 = vmatmul.mubr.f32.gmra.mrb[2].mxu0 %v5305_v22  ;;  %v5369_v22 = vld [vmem:[%s10723_s3 + $0xf8] sm:$0xff] }
 0x1a0   : > { %6857 = vmatprep.mubr.f32.mxu0 %v5306_v24  ;;  %v7716_v24 = vpack.c.bf16 %v5369_v22, %v5368_v3 }
 0x1a2   : > { %7717 = vmatprep.subr.bf16.mxu1 %v7716_v24 }
 0x1a3   : > { %6858 = vmatmul.mubr.f32.gmra.mrb[4].mxu0 %v5307_v27  ;;  %7719 = vmatpush3.bf16.msra.mxu1 %v7716_v24  ;;  %v3151_v27 = vld [vmem:[%s10723_s3] sm:$0xff] }
 0x1a4   : > { %6860 = vmatprep.mubr.f32.mxu0 %v5308_v42  ;;  %v3152_v42 = vld [vmem:[%s10723_s3 + $0x8] sm:$0xff] }
 0x1a7   : > { %6861 = vmatmul.mubr.f32.gmra.mrb[6].mxu0 %v5309_v55  ;;  %v9606_v55 = vpack.c.bf16 %v3152_v42, %v3151_v27 }
 0x1a8   : > { %6863 = vmatprep.mubr.f32.mxu0 %v5310_v21  ;;  %v2912_v21 = vlaneseq }
 0x1a9   : > { %7721 = vmatprep.subr.bf16.mxu1 %v9606_v55 }
 0x1ab   : > { %6864 = vmatmul.mubr.f32.gmra.mrb[8].mxu0 %v5311_v36  ;;  %v2913_v36 = vshrl.u32 %v2912_v21, 7 }
 0x1ac   : > { %6866 = vmatprep.mubr.f32.mxu0 %v5312_v48  ;;  %v9613_v48 = vstv %s5350_s7  ;;  %s5037_s7 = sshll.u32 %s10932_s6, 1 }
 0x1ad   : > { %vm2919_vm0 = vcmp.ge.s32.totalorder %v9613_v48, 0  ;;  %vm2929_vm1 = vcmp.lt.s32.totalorder %v9613_v48, 16  ;;  %v2904_v19 = vadd.s32 2, %v9613_v48  ;;  %v2905_v27 = vadd.s32 3, %v9613_v48  ;;  %s260_s9 = sadd.s32 %s5038_s8, %s5037_s7 }
 0x1ae   : > { %vm9626_vm2 = vmand %vm2919_vm0, %vm2929_vm1  ;;  %s5039_s11 = sshll.u32 %s260_s9, 3 }
 0x1af   : > { %6867 = vmatmul.mubr.f32.gmra.mrb[10].mxu0 %v5313_v56  ;;  %v9615_v56 = vadd.s32 4294967295, %v2913_v36  ;;  %vm2921_vm11 = vcmp.ge.s32.totalorder %v2904_v19, 0  ;;  %vm2931_vm12 = vcmp.lt.s32.totalorder %v2904_v19, 16  ;;  %vm2922_vm15 = vcmp.ge.s32.totalorder %v2905_v27, 0  ;;  %s10659_s19 = scalar_lea.vmem %s10725_s5, %s5039_s11 }
 0x1b0   : > { %6869 = vmatprep.mubr.f32.mxu0 %v5314_v60  ;;  %v9502_v61 = vpop.f32.mrb[0].mxu1  ;;  %v2903_v60 = vadd.s32 1, %v9613_v48  ;;  %vm9694_vm14 = vmand %vm2921_vm11, %vm2931_vm12  ;;  %vm2932_vm0 = vcmp.lt.s32.totalorder %v2905_v27, 16 }
 0x1b1   : > { %v9505_v23 = vpop.f32.mrb[1].mxu1  ;;  %vm10753_vm3 = vcmp.ge.s32.totalorder %v9615_v56, 0 }
 0x1b2   : > { %vm2920_vm4 = vcmp.ge.s32.totalorder %v2903_v60, 0  ;;  %vm2930_vm5 = vcmp.lt.s32.totalorder %v2903_v60, 16  ;;  %vm9644_vm6 = vmand %vm9626_vm2, %vm10753_vm3 }
 0x1b3   : > { %6870 = vmatmul.mubr.f32.gmra.mrb[12].mxu0 %v5315_v40  ;;  %v2915_v40 = vadd.s32 16, %v2913_v36  ;;  %vm9650_vm7 = vmand %vm2920_vm4, %vm2930_vm5 }
 0x1b4   : > { %6872 = vmatprep.mubr.f32.mxu0 %v5316_v52  ;;  %v9508_v2 = vpop.f32.mrb[2].mxu1  ;;  %vm9671_vm9 = vmand %vm9650_vm7, %vm10753_vm3 }
 0x1b5   : > { %v9511_v5 = vpop.f32.mrb[3].mxu1  ;;  %vm9707_vm1 = vmand %vm9694_vm14, %vm10753_vm3 }
 0x1b6   : > { %vm9725_vm4 = vmand %vm2922_vm15, %vm2932_vm0 }
 0x1b7   : > { %6873 = vmatmul.mubr.f32.gmra.mrb[14].mxu0 %v5317_v49  ;;  %v9623_v49 = vld [vmem:[%s10722_s2] ss:$0 sm:$0xff]  ;;  %vm9744_vm5 = vmand %vm9725_vm4, %vm10753_vm3 }
 0x1b8   : > { %6875 = vmatprep.mubr.f32.mxu0 %v5318_v1  ;;  %v9514_v45 = vpop.f32.mrb[4].mxu1 }
 0x1b9   : > { %v9517_v8 = vpop.f32.mrb[5].mxu1 }
 0x1bb   : > { %6876 = vmatmul.mubr.f32.gmra.mrb[16].mxu0 %v5319_v41 }
 0x1bc   : > { %6878 = vmatprep.mubr.f32.mxu0 %v5320_v4  ;;  %v9520_v10 = vpop.f32.mrb[6].mxu1 }
 0x1bd   : > { %v9523_v14 = vpop.f32.mrb[7].mxu1 }
 0x1bf   : > { %6879 = vmatmul.mubr.f32.gmra.mrb[18].mxu0 %v5321_v6 }
 0x1c0   : > { %6881 = vmatprep.mubr.f32.mxu0 %v5322_v7  ;;  %v9526_v16 = vpop.f32.mrb[8].mxu1  ;;  %v9632_v7 = vadd.s32 4294967295, %v2915_v40 }
 0x1c1   : > { %v9528_v62 = vpop.f32.mrb[9].mxu1 }
 0x1c2   : > { %vm10756_vm8 = vcmp.lt.s32.totalorder %v9632_v7, 16 }
 0x1c3   : > { %6882 = vmatmul.mubr.f32.gmra.mrb[20].mxu0 %v5323_v9  ;;  %vm2987_vm10 = vmand %vm9626_vm2, %vm10756_vm8 }
 0x1c4   : > { %6884 = vmatprep.mubr.f32.mxu0 %v5324_v13  ;;  %v9531_v0 = vpop.f32.mrb[10].mxu1  ;;  %vm2990_vm13 = vmand %vm9650_vm7, %vm10756_vm8 }
 0x1c5   : > { %v9533_v25 = vpop.f32.mrb[11].mxu1 }
 0x1c7   : > { %6885 = vmatmul.mubr.f32.gmra.mrb[22].mxu0 %v5325_v15 }
 0x1c8   : > { %6887 = vmatprep.mubr.f32.mxu0 %v9301_v11  ;;  %v9538_v26 = vpop.f32.mrb[12].mxu1 }
 0x1c9   : > { %v9541_v50 = vpop.f32.mrb[13].mxu1 }
 0x1cb   : > { %6888 = vmatmul.mubr.f32.gmra.mrb[24].mxu0 %v9304_v33 }
 0x1cc   : > { %6890 = vmatprep.mubr.f32.mxu0 %v9309_v12  ;;  %v9544_v37 = vpop.f32.mrb[14].mxu1 }
 0x1cd   : > { %v9546_v11 = vpop.f32.mrb[15].mxu1 }
 0x1cf   : > { %6891 = vmatmul.mubr.f32.gmra.mrb[26].mxu0 %v5329_v46 }
 0x1d0   : > { %6893 = vmatprep.mubr.f32.mxu0 %v5330_v30  ;;  %v9548_v54 = vpop.f32.mrb[16].mxu1 }
 0x1d1   : > { %v9550_v38 = vpop.f32.mrb[17].mxu1 }
 0x1d3   : > { %6894 = vmatmul.mubr.f32.gmra.mrb[28].mxu0 %v5331_v31 }
 0x1d4   : > { %v9552_v33 = vpop.f32.mrb[18].mxu1 }
 0x1d5   : > { %v9554_v12 = vpop.f32.mrb[19].mxu1 }
 0x1d8   : > { %v9556_v44 = vpop.f32.mrb[20].mxu1 }
 0x1d9   : > { %v9558_v35 = vpop.f32.mrb[21].mxu1 }
 0x1dc   : > { %v9560_v47 = vpop.f32.mrb[22].mxu1 }
 0x1dd   : > { %v9562_v57 = vpop.f32.mrb[23].mxu1 }
 0x1e0   : > { %v9564_v18 = vpop.f32.mrb[24].mxu1 }
 0x1e1   : > { %v9566_v34 = vpop.f32.mrb[25].mxu1 }
 0x1e4   : > { %v9568_v29 = vpop.f32.mrb[26].mxu1 }
 0x1e5   : > { %v9570_v59 = vpop.f32.mrb[27].mxu1 }
 0x1e8   : > { %v9572_v17 = vpop.f32.mrb[28].mxu1 }
 0x1e9   : > { %v9574_v51 = vpop.f32.mrb[29].mxu1 }
 0x26e   : > { %v6853_v52 = vpop.f32.mrb[0].mxu0 }
 0x26f   : > { %v7976_v1 = vadd.f32 %v6853_v52, %v9502_v61  ;;  %v2654_v4 = vpop.f32.mrb[1].mxu0 }
 0x270   : > { %v7977_v6 = vadd.f32 %v2654_v4, %v9505_v23 }
 0x271   : > { %v9635_v9 = vadd.f32 %v7976_v1, %v9623_v49 }
 0x272   : > { %v9638_v13 = vadd.f32 %v7977_v6, %v9623_v49  ;;  %v6856_v15 = vpop.f32.mrb[2].mxu0 }
 0x273   : > { %v10761_v23 = vmax.f32 %v9635_v9, 0.0  ;;  %v7978_v46 = vadd.f32 %v6856_v15, %v9508_v2  ;;  %v2664_v31 = vpop.f32.mrb[3].mxu0 }
 0x274   : > { %v10764_v28 = vmax.f32 %v9638_v13, 0.0  ;;  %v7979_v32 = vadd.f32 %v2664_v31, %v9511_v5  ;;  %v5411_v31 = vld [vmem:[%s10723_s3 + $0x248] sm:$0xff] }
 0x275   : > { %v3076_v39 = vsel %vm9626_vm2, %v10761_v23, 0.0  ;;  %v2843_v2 = vadd.f32 %v7978_v46, %v9623_v49 }
 0x276   : > { %3106 = vst [vmem:[#allocation2 + $0x8] sm:$0xff] %v3076_v39  ;;  %v3075_v43 = vsel %vm9644_vm6, %v10764_v28, 0.0  ;;  %v2842_v53 = vadd.f32 %v7979_v32, %v9623_v49  ;;  %v6859_v58 = vpop.f32.mrb[4].mxu0  ;;  %v3153_v39 = vld [vmem:[%s10723_s3 + $0x10] sm:$0xff] }
 0x277   : > { %3105 = vst [vmem:[#allocation2] sm:$0xff] %v3075_v43  ;;  %v9676_v20 = vmax.f32 %v2843_v2, 0.0  ;;  %v7980_v63 = vadd.f32 %v6859_v58, %v9514_v45  ;;  %v2674_v3 = vpop.f32.mrb[5].mxu0  ;;  %v3154_v2 = vld [vmem:[%s10723_s3 + $0x18] sm:$0xff] }
 0x278   : > { %v2872_v22 = vmax.f32 %v2842_v53, 0.0  ;;  %v7981_v24 = vadd.f32 %v2674_v3, %v9517_v8  ;;  %v2906_v3 = vadd.s32 4, %v9613_v48 }
 0x279   : > { %v3078_v42 = vsel %vm9671_vm9, %v9676_v20, 0.0  ;;  %v2845_v21 = vadd.f32 %v7980_v63, %v9623_v49 }
 0x27a   : > { %3108 = vst [vmem:[#allocation2 + $0x18] sm:$0xff] %v3078_v42  ;;  %v3077_v45 = vsel %vm2987_vm10, %v2872_v22, 0.0  ;;  %v2844_v36 = vadd.f32 %v7981_v24, %v9623_v49  ;;  %v6862_v60 = vpop.f32.mrb[6].mxu0  ;;  %vm9755_vm10 = vmand %vm9694_vm14, %vm10756_vm8  ;;  %vm2923_vm11 = vcmp.ge.s32.totalorder %v2906_v3, 0  ;;  %vm2933_vm12 = vcmp.lt.s32.totalorder %v2906_v3, 16 }
 0x27b   : > { %3107 = vst [vmem:[#allocation2 + $0x10] sm:$0xff] %v3077_v45  ;;  %v2875_v40 = vmax.f32 %v2845_v21, 0.0  ;;  %v7982_v52 = vadd.f32 %v6862_v60, %v9520_v10  ;;  %v2684_v1 = vpop.f32.mrb[7].mxu0  ;;  %vm9791_vm15 = vmand %vm2923_vm11, %vm2933_vm12  ;;  %v5414_v45 = vld [vmem:[%s10723_s3 + $0x260] sm:$0xff] }
 0x27c   : > { %v9699_v4 = vmax.f32 %v2844_v36, 0.0  ;;  %v7983_v6 = vadd.f32 %v2684_v1, %v9523_v14  ;;  %vm9817_vm11 = vmand %vm9791_vm15, %vm10753_vm3 }
 0x27d   : > { %v3080_v15 = vsel %vm2990_vm13, %v2875_v40, 0.0  ;;  %v2847_v46 = vadd.f32 %v7982_v52, %v9623_v49  ;;  %vm9779_vm13 = vmand %vm9725_vm4, %vm10756_vm8 }
 0x27e   : > { %3110 = vst [vmem:[#allocation2 + $0x28] sm:$0xff] %v3080_v15  ;;  %v3079_v10 = vsel %vm9650_vm7, %v9699_v4, 0.0  ;;  %v2846_v14 = vadd.f32 %v7983_v6, %v9623_v49  ;;  %v6865_v19 = vpop.f32.mrb[8].mxu0  ;;  %v3167_v32 = vld [vmem:[#allocation2 + $0x1] sm:$0xff] }
 0x27f   : > { %3109 = vst [vmem:[#allocation2 + $0x20] sm:$0xff] %v3079_v10  ;;  %v9721_v43 = vmax.f32 %v2847_v46, 0.0  ;;  %v7984_v53 = vadd.f32 %v6865_v19, %v9526_v16  ;;  %v2694_v63 = vpop.f32.mrb[9].mxu0  ;;  %6928 = vmatprep.mubr.f32.mxu1 %v3167_v32  ;;  %v7724_v16 = vpack.c.bf16 %v3154_v2, %v3153_v39  ;;  %v3155_v15 = vld [vmem:[%s10723_s3 + $0x20] sm:$0xff]  ;;  %v3156_v46 = vld [vmem:[%s10723_s3 + $0x28] sm:$0xff]  ;;  %v2907_v19 = vadd.s32 5, %v9613_v48 }
 0x280   : > { %v9730_v22 = vmax.f32 %v2846_v14, 0.0  ;;  %v7985_v24 = vadd.f32 %v2694_v63, %v9528_v62 }
 0x281   : > { %v3082_v42 = vsel %vm9694_vm14, %v9721_v43, 0.0  ;;  %v2849_v21 = vadd.f32 %v7984_v53, %v9623_v49  ;;  %vm2924_vm0 = vcmp.ge.s32.totalorder %v2907_v19, 0 }
 0x282   : > { %3112 = vst [vmem:[#allocation2 + $0x38] sm:$0xff] %v3082_v42  ;;  %v3081_v27 = vsel %vm9707_vm1, %v9730_v22, 0.0  ;;  %v2848_v62 = vadd.f32 %v7985_v24, %v9623_v49  ;;  %v6868_v36 = vpop.f32.mrb[10].mxu0  ;;  %v3168_v60 = vld [vmem:[#allocation2 + $0x9] sm:$0xff]  ;;  %v7728_v24 = vpack.c.bf16 %v3156_v46, %v3155_v15 }
 0x283   : > { %3111 = vst [vmem:[#allocation2 + $0x30] sm:$0xff] %v3081_v27  ;;  %v9749_v40 = vmax.f32 %v2849_v21, 0.0  ;;  %v7986_v1 = vadd.f32 %v6868_v36, %v9531_v0  ;;  %v2704_v6 = vpop.f32.mrb[11].mxu0  ;;  %6929 = vmatmul.mubr.f32.vlgmr.msra.gmra.mrb[30].mxu1 %v3168_v60  ;;  %v10855_v27 = vmov 0  ;;  %v3157_v36 = vld [vmem:[%s10723_s3 + $0x30] sm:$0xff]  ;;  %v3158_v60 = vld [vmem:[%s10723_s3 + $0x38] sm:$0xff] }
 0x284   : > { %v2878_v10 = vmax.f32 %v2848_v62, 0.0  ;;  %v7987_v14 = vadd.f32 %v2704_v6, %v9533_v25  ;;  %7723 = vmatpush3.bf16.msra.mxu1 %v9606_v55  ;;  %v10856_v27 = vsel %vm9791_vm15, 4294967295, %v10855_v27  ;;  %v2908_v25 = vadd.s32 6, %v9613_v48 }
 0x285   : > { %v3084_v0 = vsel %vm9744_vm5, %v9749_v40, 0.0  ;;  %v2851_v32 = vadd.f32 %v7986_v1, %v9623_v49  ;;  %7725 = vmatprep.subr.bf16.mxu1 %v7724_v16 }
 0x286   : > { %3114 = vst [vmem:[#allocation2 + $0x48] sm:$0xff] %v3084_v0  ;;  %v3083_v39 = vsel %vm9755_vm10, %v2878_v10, 0.0  ;;  %v2850_v55 = vadd.f32 %v7987_v14, %v9623_v49  ;;  %v6871_v2 = vpop.f32.mrb[12].mxu0  ;;  %v9784_v53 = vld [vmem:[#allocation2 + $0x19] sm:$0xff]  ;;  %v9786_v63 = vld [vmem:[#allocation2 + $0x21] sm:$0xff]  ;;  %vm2934_vm10 = vcmp.lt.s32.totalorder %v2907_v19, 16 }
 0x287   : > { %3113 = vst [vmem:[#allocation2 + $0x40] sm:$0xff] %v3083_v39  ;;  %v2881_v42 = vmax.f32 %v2851_v32, 0.0  ;;  %v7988_v21 = vadd.f32 %v6871_v2, %v9538_v26  ;;  %v2714_v62 = vpop.f32.mrb[13].mxu0  ;;  %6931 = vmatprep.mubr.f32.mxu1 %v9784_v53  ;;  %vm9828_vm12 = vmand %vm2924_vm0, %vm2934_vm10  ;;  %v10859_v32 = vmov 0  ;;  %v3160_v2 = vld [vmem:[%s10723_s3 + $0x48] sm:$0xff] }
 0x288   : > { %v9802_v52 = vmax.f32 %v2850_v55, 0.0  ;;  %v7989_v26 = vadd.f32 %v2714_v62, %v9541_v50  ;;  %6932 = vmatmul.mubr.f32.gmra.mrb[32].mxu1 %v9786_v63  ;;  %v10860_v32 = vsel %vm9828_vm12, 4294967295, %v10859_v32  ;;  %v3159_v55 = vld [vmem:[%s10723_s3 + $0x40] sm:$0xff]  ;;  %vm2999_vm0 = vmand %vm9791_vm15, %vm10756_vm8  ;;  %v5417_v50 = vld [vmem:[%s10723_s3 + $0x278] sm:$0xff] }
 0x289   : > { %v3086_v3 = vsel %vm9779_vm13, %v2881_v42, 0.0  ;;  %v2853_v1 = vadd.f32 %v7988_v21, %v9623_v49  ;;  %7727 = vmatpush3.bf16.msra.mxu1 %v7724_v16  ;;  %v7732_v16 = vpack.c.bf16 %v3158_v60, %v3157_v36  ;;  %vm9854_vm13 = vmand %vm9828_vm12, %vm10753_vm3  ;;  %v10861_v36 = vmov 0 }
 0x28a   : > { %3116 = vst [vmem:[#allocation2 + $0x58] sm:$0xff] %v3086_v3  ;;  %v3085_v6 = vsel %vm9725_vm4, %v9802_v52, 0.0  ;;  %v2852_v15 = vadd.f32 %v7989_v26, %v9623_v49  ;;  %v6874_v46 = vpop.f32.mrb[14].mxu0  ;;  %v9821_v10 = vld [vmem:[#allocation2 + $0x31] sm:$0xff]  ;;  %7729 = vmatprep.subr.bf16.mxu1 %v7728_v24  ;;  %v10862_v36 = vsel %vm9854_vm13, 4294967295, %v10861_v36  ;;  %vm2935_vm3 = vcmp.lt.s32.totalorder %v2908_v25, 16  ;;  %vm9885_vm10 = vmand %vm9828_vm12, %vm10756_vm8 }
 0x28b   : > { %3115 = vst [vmem:[#allocation2 + $0x50] sm:$0xff] %v3085_v6  ;;  %v9823_v14 = vmax.f32 %v2853_v1, 0.0  ;;  %v7990_v0 = vadd.f32 %v6874_v46, %v9544_v37  ;;  %v2724_v39 = vpop.f32.mrb[15].mxu0  ;;  %6934 = vmatprep.mubr.f32.mxu1 %v9821_v10  ;;  %v3162_v46 = vld [vmem:[%s10723_s3 + $0x58] sm:$0xff]  ;;  %vm10869_vm8 = vcmp.ge.s32.totalorder %v9615_v56, 0 }
 0x28c   : > { %v9840_v37 = vmax.f32 %v2852_v15, 0.0  ;;  %v7991_v19 = vadd.f32 %v2724_v39, %v9546_v11  ;;  %v3161_v15 = vld [vmem:[%s10723_s3 + $0x50] sm:$0xff] }
 0x28d   : > { %v3088_v42 = vsel %vm9791_vm15, %v9823_v14, 0.0  ;;  %v2855_v21 = vadd.f32 %v7990_v0, %v9623_v49  ;;  %7731 = vmatpush3.bf16.msra.mxu1 %v7728_v24  ;;  %v7736_v24 = vpack.c.bf16 %v3160_v2, %v3159_v55  ;;  %v2909_v55 = vadd.s32 7, %v9613_v48 }
 0x28e   : > { %3118 = vst [vmem:[#allocation2 + $0x68] sm:$0xff] %v3088_v42  ;;  %v3087_v62 = vsel %vm9817_vm11, %v9840_v37, 0.0  ;;  %v2854_v11 = vadd.f32 %v7991_v19, %v9623_v49  ;;  %v6877_v60 = vpop.f32.mrb[16].mxu0  ;;  %v9859_v26 = vld [vmem:[#allocation2 + $0x39] sm:$0xff]  ;;  %7733 = vmatprep.subr.bf16.mxu1 %v7732_v16 }
 0x28f   : > { %3117 = vst [vmem:[#allocation2 + $0x60] sm:$0xff] %v3087_v62  ;;  %v9861_v3 = vmax.f32 %v2855_v21, 0.0  ;;  %v7992_v1 = vadd.f32 %v6877_v60, %v9548_v54  ;;  %v2734_v6 = vpop.f32.mrb[17].mxu0  ;;  %6935 = vmatmul.mubr.f32.gmra.mrb[34].mxu1 %v9859_v26  ;;  %v7740_v60 = vpack.c.bf16 %v3162_v46, %v3161_v15  ;;  %v3164_v15 = vld [vmem:[%s10723_s3 + $0x68] sm:$0xff] }
 0x290   : > { %v2884_v0 = vmax.f32 %v2854_v11, 0.0  ;;  %v7993_v39 = vadd.f32 %v2734_v6, %v9550_v38  ;;  %v10867_v6 = vmov 0 }
 0x291   : > { %v3090_v54 = vsel %vm9854_vm13, %v9861_v3, 0.0  ;;  %v2857_v2 = vadd.f32 %v7992_v1, %v9623_v49  ;;  %7735 = vmatpush3.bf16.msra.mxu1 %v7732_v16 }
 0x292   : > { %3120 = vst [vmem:[#allocation2 + $0x78] sm:$0xff] %v3090_v54  ;;  %v3089_v19 = vsel %vm2999_vm0, %v2884_v0, 0.0  ;;  %v2856_v38 = vadd.f32 %v7993_v39, %v9623_v49  ;;  %v6880_v21 = vpop.f32.mrb[18].mxu0  ;;  %v9890_v62 = vld [vmem:[#allocation2 + $0x49] sm:$0xff]  ;;  %v9892_v11 = vld [vmem:[#allocation2 + $0x51] sm:$0xff]  ;;  %7737 = vmatprep.subr.bf16.mxu1 %v7736_v24  ;;  %vm10866_vm0 = vcmp.ge.s32.totalorder %v2908_v25, 0 }
 0x293   : > { %10865 = vst [vmem:[#allocation3_spill] sm:$0xff] %v9892_v11  ;;  %3119 = vst [vmem:[#allocation2 + $0x70] sm:$0xff] %v3089_v19  ;;  %v2887_v16 = vmax.f32 %v2857_v2, 0.0  ;;  %v7994_v1 = vadd.f32 %v6880_v21, %v9552_v33  ;;  %v2744_v0 = vpop.f32.mrb[19].mxu0  ;;  %6937 = vmatprep.mubr.f32.mxu1 %v9890_v62  ;;  %v3163_v39 = vld [vmem:[%s10723_s3 + $0x60] sm:$0xff] }
 0x294   : > { %vm9897_vm13 = vmand %vm10866_vm0, %vm2935_vm3  ;;  %v9908_v46 = vmax.f32 %v2856_v38, 0.0  ;;  %v7995_v33 = vadd.f32 %v2744_v0, %v9554_v12  ;;  %6938 = vmatmul.mubr.f32.gmra.mrb[36].mxu1 %v9892_v11  ;;  %vm2926_vm3 = vcmp.ge.s32.totalorder %v2909_v55, 0  ;;  %vm2936_vm0 = vcmp.lt.s32.totalorder %v2909_v55, 16 }
 0x295   : > { %v10868_v6 = vsel %vm9897_vm13, 4294967295, %v10867_v6  ;;  %v3092_v25 = vsel %vm9885_vm10, %v2887_v16, 0.0  ;;  %v2859_v54 = vadd.f32 %v7994_v1, %v9623_v49  ;;  %7739 = vmatpush3.bf16.msra.mxu1 %v7736_v24  ;;  %vm9923_vm15 = vmand %vm9897_vm13, %vm10869_vm8  ;;  %v10870_v12 = vmov 0 }
 0x296   : > { %3122 = vst [vmem:[#allocation2 + $0x88] sm:$0xff] %v3092_v25  ;;  %v3091_v2 = vsel %vm9828_vm12, %v9908_v46, 0.0  ;;  %v2858_v19 = vadd.f32 %v7995_v33, %v9623_v49  ;;  %v10871_v12 = vsel %vm9923_vm15, 4294967295, %v10870_v12  ;;  %v6883_v42 = vpop.f32.mrb[20].mxu0  ;;  %v9927_v38 = vld [vmem:[#allocation2 + $0x61] sm:$0xff]  ;;  %7741 = vmatprep.subr.bf16.mxu1 %v7740_v60  ;;  %v7744_v24 = vpack.c.bf16 %v3164_v15, %v3163_v39  ;;  %vm9934_vm10 = vmand %vm2926_vm3, %vm2936_vm0  ;;  %v3165_v39 = vld [vmem:[%s10723_s3 + $0x70] sm:$0xff] }
 0x297   : > { %10872 = vst [vmem:[#allocation4_spill] sm:$0xff] %v9927_v38  ;;  %3121 = vst [vmem:[#allocation2 + $0x80] sm:$0xff] %v3091_v2  ;;  %v9929_v21 = vmax.f32 %v2859_v54, 0.0  ;;  %v7996_v16 = vadd.f32 %v6883_v42, %v9556_v44  ;;  %v2754_v0 = vpop.f32.mrb[21].mxu0  ;;  %6940 = vmatprep.mubr.f32.mxu1 %v9927_v38  ;;  %v2910_v33 = vadd.s32 8, %v9613_v48  ;;  %v3166_v15 = vld [vmem:[%s10723_s3 + $0x78] sm:$0xff] }
 0x298   : > { %v9946_v44 = vmax.f32 %v2858_v19, 0.0  ;;  %v7997_v55 = vadd.f32 %v2754_v0, %v9558_v35  ;;  %vm9960_vm3 = vmand %vm9934_vm10, %vm10869_vm8  ;;  %v10875_v19 = vmov 0  ;;  %vm10878_vm0 = vcmp.lt.s32.totalorder %v9632_v7, 16 }
 0x299   : > { %v3094_v25 = vsel %vm9897_vm13, %v9929_v21, 0.0  ;;  %v2861_v54 = vadd.f32 %v7996_v16, %v9623_v49  ;;  %7743 = vmatpush3.bf16.msra.mxu1 %v7740_v60  ;;  %v10876_v19 = vsel %vm9960_vm3, 4294967295, %v10875_v19  ;;  %v7748_v60 = vpack.c.bf16 %v3166_v15, %v3165_v39  ;;  %v5371_v39 = vld [vmem:[%s10723_s3 + $0x108] sm:$0xff]  ;;  %vm9991_vm8 = vmand %vm9934_vm10, %vm10878_vm0 }
 0x29a   : > { %3124 = vst [vmem:[#allocation2 + $0x98] sm:$0xff] %v3094_v25  ;;  %v3093_v2 = vsel %vm9923_vm15, %v9946_v44, 0.0  ;;  %v2860_v35 = vadd.f32 %v7997_v55, %v9623_v49  ;;  %v6886_v42 = vpop.f32.mrb[22].mxu0  ;;  %v9965_v0 = vld [vmem:[#allocation2 + $0x69] sm:$0xff]  ;;  %7745 = vmatprep.subr.bf16.mxu1 %v7744_v24  ;;  %vm3005_vm15 = vmand %vm9897_vm13, %vm10878_vm0  ;;  %v5370_v55 = vld [vmem:[%s10723_s3 + $0x100] sm:$0xff]  ;;  %vm2937_vm12 = vcmp.lt.s32.totalorder %v2910_v33, 16 }
 0x29b   : > { %10877 = vst [vmem:[#allocation5_spill] sm:$0xff] %v9965_v0  ;;  %3123 = vst [vmem:[#allocation2 + $0x90] sm:$0xff] %v3093_v2  ;;  %v9967_v16 = vmax.f32 %v2861_v54, 0.0  ;;  %v7998_v25 = vadd.f32 %v6886_v42, %v9560_v47  ;;  %v2764_v23 = vpop.f32.mrb[23].mxu0  ;;  %6941 = vmatmul.mubr.f32.gmra.mrb[38].mxu1 %v9965_v0  ;;  %v2911_v2 = vadd.s32 9, %v9613_v48 }
 0x29c   : > { %v2890_v15 = vmax.f32 %v2860_v35, 0.0  ;;  %v7999_v54 = vadd.f32 %v2764_v23, %v9562_v57 }
 0x29d   : > { %v3096_v47 = vsel %vm9960_vm3, %v9967_v16, 0.0  ;;  %v2863_v42 = vadd.f32 %v7998_v25, %v9623_v49  ;;  %7747 = vmatpush3.bf16.msra.mxu1 %v7744_v24  ;;  %v10000_v25 = vpack.c.bf16 %v5371_v39, %v5370_v55  ;;  %vm2928_vm3 = vcmp.ge.s32.totalorder %v2911_v2, 0 }
 0x29e   : > { %3126 = vst [vmem:[#allocation2 + $0xa8] sm:$0xff] %v3096_v47  ;;  %v3095_v28 = vsel %vm3005_vm15, %v2890_v15, 0.0  ;;  %v2862_v57 = vadd.f32 %v7999_v54, %v9623_v49  ;;  %v6889_v48 = vpop.f32.mrb[24].mxu0  ;;  %v9996_v23 = vld [vmem:[#allocation2 + $0x79] sm:$0xff]  ;;  %v9998_v0 = vld [vmem:[#allocation2 + $0x81] sm:$0xff]  ;;  %7749 = vmatprep.subr.bf16.mxu1 %v7748_v60  ;;  %vm10881_vm15 = vcmp.ge.s32.totalorder %v2910_v33, 0 }
 0x29f   : > { %3125 = vst [vmem:[#allocation2 + $0xa0] sm:$0xff] %v3095_v28  ;;  %v2893_v24 = vmax.f32 %v2863_v42, 0.0  ;;  %v8000_v15 = vadd.f32 %v6889_v48, %v9564_v18  ;;  %vm10005_vm0 = vmand %vm10881_vm15, %vm2937_vm12  ;;  %v2774_v38 = vpop.f32.mrb[25].mxu0  ;;  %6943 = vmatprep.mubr.f32.mxu1 %v9996_v23  ;;  %vm2938_vm13 = vcmp.lt.s32.totalorder %v2911_v2, 16  ;;  %vm10884_vm12 = vcmp.ge.s32.totalorder %v9615_v56, 0 }
 0x2a0   : > { %v10010_v54 = vmax.f32 %v2862_v57, 0.0  ;;  %v8001_v11 = vadd.f32 %v2774_v38, %v9566_v34  ;;  %6944 = vmatmul.mubr.f32.gmra.mrb[40].mxu1 %v9998_v0  ;;  %vm10025_vm15 = vmand %vm10005_vm0, %vm10884_vm12  ;;  %v10885_v34 = vmov 0  ;;  %v10892_v2 = vmov 0 }
 0x2a1   : > { %v3098_v18 = vsel %vm9991_vm8, %v2893_v24, 0.0  ;;  %v2865_v28 = vadd.f32 %v8000_v15, %v9623_v49  ;;  %7751 = vmatpush3.bf16.msra.mxu1 %v7748_v60  ;;  %v10886_v34 = vsel %vm10025_vm15, 4294967295, %v10885_v34  ;;  %vm10036_vm8 = vmand %vm2928_vm3, %vm2938_vm13 }
 0x2a2   : > { %3128 = vst [vmem:[#allocation2 + $0xb8] sm:$0xff] %v3098_v18  ;;  %v3097_v33 = vsel %vm9934_vm10, %v10010_v54, 0.0  ;;  %v2864_v55 = vadd.f32 %v8001_v11, %v9623_v49  ;;  %v6892_v38 = vpop.f32.mrb[26].mxu0  ;;  %v10029_v39 = vld [vmem:[#allocation2 + $0x91] sm:$0xff]  ;;  %7753 = vmatprep.subr.bf16.mxu1 %v10000_v25  ;;  %v10887_v11 = vmov 0  ;;  %vm10891_vm13 = vmmov %vm10884_vm12  ;;  %vm10895_vm12 = vcmp.lt.s32.totalorder %v9632_v7, 16 }
 0x2a3   : > { %3127 = vst [vmem:[#allocation2 + $0xb0] sm:$0xff] %v3097_v33  ;;  %v10032_v60 = vmax.f32 %v2865_v28, 0.0  ;;  %v8002_v42 = vadd.f32 %v6892_v38, %v9568_v29  ;;  %v10888_v11 = vsel %vm10036_vm8, 4294967295, %v10887_v11  ;;  %v2784_v35 = vpop.f32.mrb[27].mxu0  ;;  %6946 = vmatprep.mubr.f32.mxu1 %v10029_v39  ;;  %vm10057_vm3 = vmand %vm10036_vm8, %vm10891_vm13  ;;  %v5373_v7 = vld [vmem:[%s10723_s3 + $0x118] sm:$0xff] }
 0x2a4   : > { %10889 = vst [vmem:[#allocation6_spill] sm:$0xff] %v10888_v11  ;;  %v10041_v57 = vmax.f32 %v2864_v55, 0.0  ;;  %v8003_v48 = vadd.f32 %v2784_v35, %v9570_v59  ;;  %v10893_v2 = vsel %vm10057_vm3, 4294967295, %v10892_v2  ;;  %vm10896_vm13 = vmmov %vm10895_vm12  ;;  %v10266_v11 = vld [vmem:[#allocation2 + $0x92] sm:$0xff] }
 0x2a5   : > { %v3100_v24 = vsel %vm10005_vm0, %v10032_v60, 0.0  ;;  %v10048_v15 = vadd.f32 %v8002_v42, %v9623_v49  ;;  %10894 = vst [vmem:[#allocation8_spill] sm:$0xff] %v10893_v2 }
 0x2a6   : > { %3130 = vst [vmem:[#allocation2 + $0xc8] sm:$0xff] %v3100_v24  ;;  %v3099_v29 = vsel %vm10025_vm15, %v10041_v57, 0.0  ;;  %v2866_v59 = vadd.f32 %v8003_v48, %v9623_v49  ;;  %v6895_v18 = vpop.f32.mrb[28].mxu0  ;;  %v10062_v28 = vld [vmem:[#allocation2 + $0x99] sm:$0xff]  ;;  %vm3011_vm15 = vmand %vm10005_vm0, %vm10895_vm12 }
 0x2a7   : > { %10890 = vst [vmem:[#allocation7_spill] sm:$0xff] %v10048_v15  ;;  %3129 = vst [vmem:[#allocation2 + $0xc0] sm:$0xff] %v3099_v29  ;;  %v10776_v33 = vmax.f32 %v10048_v15, 0.0  ;;  %v8004_v56 = vadd.f32 %v6895_v18, %v9572_v17  ;;  %v2794_v55 = vpop.f32.mrb[29].mxu0  ;;  %6947 = vmatmul.mubr.f32.gmra.mrb[42].mxu1 %v10062_v28  ;;  %v5372_v18 = vld [vmem:[%s10723_s3 + $0x110] sm:$0xff]  ;;  %v5405_v15 = vld [vmem:[%s10723_s3 + $0x218] sm:$0xff] }
 0x2a8   : > { %v2896_v38 = vmax.f32 %v2866_v59, 0.0  ;;  %v8005_v42 = vadd.f32 %v2794_v55, %v9574_v51  ;;  %vm3014_vm12 = vmand %vm10036_vm8, %vm10896_vm13  ;;  %v10898_v55 = vmax.f32 %v9638_v13, 0.0  ;;  %v10899_v13 = vmax.f32 %v9635_v9, 0.0  ;;  %v5378_v9 = vld [vmem:[%s10723_s3 + $0x140] sm:$0xff] }
 0x2a9   : > { %v3102_v35 = vsel %vm10057_vm3, %v10776_v33, 0.0  ;;  %v2869_v48 = vadd.f32 %v8004_v56, %v9623_v49  ;;  %vm10903_vm13 = vnez %v10871_v12  ;;  %v5401_v33 = vld [vmem:[%s10723_s3 + $0x1f8] sm:$0xff]  ;;  %v5422_v12 = vld [vmem:[%s10723_s3 + $0x2a0] sm:$0xff] }
 0x2aa   : > { %3132 = vst [vmem:[#allocation2 + $0xd8] sm:$0xff] %v3102_v35  ;;  %v3101_v24 = vsel %vm3011_vm15, %v2896_v38, 0.0  ;;  %v10082_v17 = vadd.f32 %v8005_v42, %v9623_v49  ;;  %v10084_v29 = vld [vmem:[#allocation2 + $0xa9] sm:$0xff]  ;;  %v10086_v51 = vld [vmem:[#allocation2 + $0xb1] sm:$0xff]  ;;  %v7756_v42 = vpack.c.bf16 %v5373_v7, %v5372_v18  ;;  %v5374_v35 = vld [vmem:[%s10723_s3 + $0x120] sm:$0xff]  ;;  %vm10902_vm15 = vnez %v10860_v32 }
 0x2ab   : > { %3131 = vst [vmem:[#allocation2 + $0xd0] sm:$0xff] %v3101_v24  ;;  %v2899_v59 = vmax.f32 %v2869_v48, 0.0  ;;  %6949 = vmatprep.mubr.f32.mxu1 %v10084_v29  ;;  %v5375_v48 = vld [vmem:[%s10723_s3 + $0x128] sm:$0xff]  ;;  %v5376_v24 = vld [vmem:[%s10723_s3 + $0x130] sm:$0xff]  ;;  %v5418_v32 = vld [vmem:[%s10723_s3 + $0x280] sm:$0xff] }
 0x2ac   : > { %10897 = vst [vmem:[#allocation9_spill] sm:$0xff] %v10082_v17  ;;  %v10775_v56 = vmax.f32 %v10082_v17, 0.0  ;;  %6950 = vmatmul.mubr.f32.gmra.mrb[44].mxu1 %v10086_v51  ;;  %v7760_v61 = vpack.c.bf16 %v5375_v48, %v5374_v35  ;;  %v5380_v7 = vld [vmem:[%s10723_s3 + $0x150] sm:$0xff]  ;;  %v5403_v17 = vld [vmem:[%s10723_s3 + $0x208] sm:$0xff] }
 0x2ad   : > { %v3104_v49 = vsel %vm3014_vm12, %v2899_v59, 0.0  ;;  %8385 = vmatprep.mubr.msk.f32.mxu1 %vm9644_vm6, %v10898_v55  ;;  %v5377_v59 = vld [vmem:[%s10723_s3 + $0x138] sm:$0xff]  ;;  %vm10901_vm6 = vnez %v10862_v36  ;;  %v5384_v48 = vld [vmem:[%s10723_s3 + $0x170] sm:$0xff]  ;;  %vm10904_vm12 = vnez %v10868_v6  ;;  %v10915_v47 = vld [vmem:[#allocation6_spill] sm:$0xff] }
 0x2ae   : > { %3134 = vst [vmem:[#allocation2 + $0xe8] sm:$0xff] %v3104_v49  ;;  %v3103_v38 = vsel %vm10036_vm8, %v10775_v56, 0.0  ;;  %v7764_v41 = vpack.c.bf16 %v5377_v59, %v5376_v24  ;;  %v5381_v49 = vld [vmem:[%s10723_s3 + $0x158] sm:$0xff]  ;;  %v5386_v24 = vld [vmem:[%s10723_s3 + $0x180] sm:$0xff]  ;;  %v5387_v59 = vld [vmem:[%s10723_s3 + $0x188] sm:$0xff]  ;;  %vm10905_vm8 = vnez %v10876_v19 }
 0x2af   : > { %3133 = vst [vmem:[#allocation2 + $0xe0] sm:$0xff] %v3103_v38  ;;  %v7772_v55 = vpack.c.bf16 %v5381_v49, %v5380_v7  ;;  %v5382_v38 = vld [vmem:[%s10723_s3 + $0x160] sm:$0xff]  ;;  %v3491_v49 = vld [vmem:[#allocation2 + $0xa] sm:$0xff]  ;;  %v5421_v6 = vld [vmem:[%s10723_s3 + $0x298] sm:$0xff] }
 0x2b0   : > { %8386 = vmatmul.mubr.msk.f32.vlgmr.msra.gmra.mrb[30].mxu1 %vm9626_vm2, %v10899_v13  ;;  %vm10900_vm2 = vnez %v10856_v27  ;;  %v5385_v13 = vld [vmem:[%s10723_s3 + $0x178] sm:$0xff]  ;;  %v10278_v2 = vld [vmem:[#allocation2 + $0xaa] sm:$0xff] }
 0x2b1   : > { %8387 = vmatprep.mubr.msk.f32.mxu1 %vm9671_vm9, %v9676_v20  ;;  %7755 = vmatpush3.bf16.msra.mxu1 %v10000_v25  ;;  %v5379_v25 = vld [vmem:[%s10723_s3 + $0x148] sm:$0xff]  ;;  %v10254_v56 = vld [vmem:[#allocation2 + $0x7a] sm:$0xff]  ;;  %v10910_v1 = vld [vmem:[#allocation7_spill] sm:$0xff] }
 0x2b2   : > { %7757 = vmatprep.subr.bf16.mxu1 %v7756_v42  ;;  %v7768_v18 = vpack.c.bf16 %v5379_v25, %v5378_v9  ;;  %v5388_v9 = vld [vmem:[%s10723_s3 + $0x190] sm:$0xff]  ;;  %v5389_v25 = vld [vmem:[%s10723_s3 + $0x198] sm:$0xff] }
 0x2b3   : > { %v7788_v7 = vpack.c.bf16 %v5389_v25, %v5388_v9  ;;  %v5394_v9 = vld [vmem:[%s10723_s3 + $0x1c0] sm:$0xff]  ;;  %v5395_v25 = vld [vmem:[%s10723_s3 + $0x1c8] sm:$0xff]  ;;  %v5425_v19 = vld [vmem:[%s10723_s3 + $0x2b8] sm:$0xff] }
 0x2b4   : > { %8388 = vmatmul.mubr.msk.f32.gmra.mrb[32].mxu1 %vm9650_vm7, %v9699_v4 }
 0x2b5   : > { %8389 = vmatprep.mubr.msk.f32.mxu1 %vm9707_vm1, %v9730_v22  ;;  %7759 = vmatpush3.bf16.msra.mxu1 %v7756_v42  ;;  %v5383_v42 = vld [vmem:[%s10723_s3 + $0x168] sm:$0xff] }
 0x2b6   : > { %7761 = vmatprep.subr.bf16.mxu1 %v7760_v61  ;;  %v7776_v35 = vpack.c.bf16 %v5383_v42, %v5382_v38  ;;  %v5391_v38 = vld [vmem:[%s10723_s3 + $0x1a8] sm:$0xff]  ;;  %v10206_v42 = vld [vmem:[#allocation2 + $0x1a] sm:$0xff] }
 0x2b8   : > { %8390 = vmatmul.mubr.msk.f32.gmra.mrb[34].mxu1 %vm9694_vm14, %v9721_v43 }
 0x2b9   : > { %8391 = vmatprep.mubr.msk.f32.mxu1 %vm9744_vm5, %v9749_v40  ;;  %7763 = vmatpush3.bf16.msra.mxu1 %v7760_v61  ;;  %v7780_v61 = vpack.c.bf16 %v5385_v13, %v5384_v48  ;;  %v10209_v48 = vld [vmem:[#allocation2 + $0x22] sm:$0xff]  ;;  %v5392_v13 = vld [vmem:[%s10723_s3 + $0x1b0] sm:$0xff] }
 0x2ba   : > { %7765 = vmatprep.subr.bf16.mxu1 %v7764_v41 }
 0x2bc   : > { %8392 = vmatmul.mubr.msk.f32.gmra.mrb[36].mxu1 %vm9725_vm4, %v9802_v52 }
 0x2bd   : > { %8393 = vmatprep.mubr.msk.f32.mxu1 %vm9817_vm11, %v9840_v37  ;;  %7767 = vmatpush3.bf16.msra.mxu1 %v7764_v41  ;;  %v7784_v41 = vpack.c.bf16 %v5387_v59, %v5386_v24  ;;  %v10218_v24 = vld [vmem:[#allocation2 + $0x32] sm:$0xff] }
 0x2be   : > { %7769 = vmatprep.subr.bf16.mxu1 %v7768_v18 }
 0x2c0   : > { %8394 = vmatmul.mubr.msk.f32.gmra.mrb[38].mxu1 %vm10900_vm2, %v9823_v14 }
 0x2c1   : > { %8395 = vmatprep.mubr.msk.f32.mxu1 %vm10901_vm6, %v9861_v3  ;;  %7771 = vmatpush3.bf16.msra.mxu1 %v7768_v18  ;;  %v3490_v18 = vld [vmem:[#allocation2 + $0x2] sm:$0xff] }
 0x2c2   : > { %7773 = vmatprep.subr.bf16.mxu1 %v7772_v55 }
 0x2c4   : > { %8396 = vmatmul.mubr.msk.f32.gmra.mrb[40].mxu1 %vm10902_vm15, %v9908_v46 }
 0x2c5   : > { %8397 = vmatprep.mubr.msk.f32.mxu1 %vm10903_vm13, %v9946_v44  ;;  %7775 = vmatpush3.bf16.msra.mxu1 %v7772_v55  ;;  %v5390_v55 = vld [vmem:[%s10723_s3 + $0x1a0] sm:$0xff] }
 0x2c6   : > { %7777 = vmatprep.subr.bf16.mxu1 %v7776_v35 }
 0x2c8   : > { %8398 = vmatmul.mubr.msk.f32.gmra.mrb[42].mxu1 %vm10904_vm12, %v9929_v21 }
 0x2c9   : > { %8399 = vmatprep.mubr.msk.f32.mxu1 %vm10905_vm8, %v9967_v16  ;;  %7779 = vmatpush3.bf16.msra.mxu1 %v7776_v35  ;;  %v7792_v35 = vpack.c.bf16 %v5391_v38, %v5390_v55  ;;  %v5396_v55 = vld [vmem:[%s10723_s3 + $0x1d0] sm:$0xff]  ;;  %v5397_v38 = vld [vmem:[%s10723_s3 + $0x1d8] sm:$0xff] }
 0x2ca   : > { %7781 = vmatprep.subr.bf16.mxu1 %v7780_v61 }
 0x2cc   : > { %8400 = vmatmul.mubr.msk.f32.gmra.mrb[44].mxu1 %vm9934_vm10, %v10010_v54 }
 0x2cd   : > { %7783 = vmatpush3.bf16.msra.mxu1 %v7780_v61  ;;  %7040 = vmatprep.mubr.f32.mxu1 %v3490_v18  ;;  %v5393_v61 = vld [vmem:[%s10723_s3 + $0x1b8] sm:$0xff]  ;;  %v10230_v18 = vld [vmem:[#allocation2 + $0x4a] sm:$0xff] }
 0x2ce   : > { %7785 = vmatprep.subr.bf16.mxu1 %v7784_v41  ;;  %v7796_v59 = vpack.c.bf16 %v5393_v61, %v5392_v13  ;;  %v10242_v13 = vld [vmem:[#allocation2 + $0x62] sm:$0xff]  ;;  %v10245_v61 = vld [vmem:[#allocation2 + $0x6a] sm:$0xff] }
 0x2d0   : > { %7041 = vmatmul.mubr.f32.vlgmr.msra.gmra.mrb[30].mxu1 %v3491_v49  ;;  %v10233_v49 = vld [vmem:[#allocation2 + $0x52] sm:$0xff] }
 0x2d1   : > { %7043 = vmatprep.mubr.f32.mxu1 %v10206_v42  ;;  %7787 = vmatpush3.bf16.msra.mxu1 %v7784_v41  ;;  %v10221_v41 = vld [vmem:[#allocation2 + $0x3a] sm:$0xff] }
 0x2d2   : > { %7789 = vmatprep.subr.bf16.mxu1 %v7788_v7 }
 0x2d4   : > { %7044 = vmatmul.mubr.f32.gmra.mrb[32].mxu1 %v10209_v48 }
 0x2d5   : > { %7046 = vmatprep.mubr.f32.mxu1 %v10218_v24  ;;  %7791 = vmatpush3.bf16.msra.mxu1 %v7788_v7  ;;  %v7800_v7 = vpack.c.bf16 %v5395_v25, %v5394_v9  ;;  %v5398_v9 = vld [vmem:[%s10723_s3 + $0x1e0] sm:$0xff]  ;;  %v5399_v25 = vld [vmem:[%s10723_s3 + $0x1e8] sm:$0xff] }
 0x2d6   : > { %7793 = vmatprep.subr.bf16.mxu1 %v7792_v35 }
 0x2d8   : > { %7047 = vmatmul.mubr.f32.gmra.mrb[34].mxu1 %v10221_v41 }
 0x2d9   : > { %7049 = vmatprep.mubr.f32.mxu1 %v10230_v18  ;;  %7795 = vmatpush3.bf16.msra.mxu1 %v7792_v35  ;;  %v7804_v35 = vpack.c.bf16 %v5397_v38, %v5396_v55  ;;  %v10257_v55 = vld [vmem:[#allocation2 + $0x82] sm:$0xff]  ;;  %v5400_v38 = vld [vmem:[%s10723_s3 + $0x1f0] sm:$0xff] }
 0x2da   : > { %7797 = vmatprep.subr.bf16.mxu1 %v7796_v59 }
 0x2dc   : > { %7050 = vmatmul.mubr.f32.gmra.mrb[36].mxu1 %v10233_v49 }
 0x2dd   : > { %7052 = vmatprep.mubr.f32.mxu1 %v10242_v13  ;;  %7799 = vmatpush3.bf16.msra.mxu1 %v7796_v59  ;;  %v7808_v59 = vpack.c.bf16 %v5399_v25, %v5398_v9  ;;  %v10269_v9 = vld [vmem:[#allocation2 + $0x9a] sm:$0xff] }
 0x2de   : > { %7801 = vmatprep.subr.bf16.mxu1 %v7800_v7  ;;  %v5402_v25 = vld [vmem:[%s10723_s3 + $0x200] sm:$0xff] }
 0x2e0   : > { %7053 = vmatmul.mubr.f32.gmra.mrb[38].mxu1 %v10245_v61 }
 0x2e1   : > { %7055 = vmatprep.mubr.f32.mxu1 %v10254_v56  ;;  %7803 = vmatpush3.bf16.msra.mxu1 %v7800_v7  ;;  %v7812_v7 = vpack.c.bf16 %v5401_v33, %v5400_v38  ;;  %v10281_v33 = vld [vmem:[#allocation2 + $0xb2] sm:$0xff] }
 0x2e2   : > { %7805 = vmatprep.subr.bf16.mxu1 %v7804_v35  ;;  %v5404_v38 = vld [vmem:[%s10723_s3 + $0x210] sm:$0xff] }
 0x2e4   : > { %7056 = vmatmul.mubr.f32.gmra.mrb[40].mxu1 %v10257_v55 }
 0x2e5   : > { %7058 = vmatprep.mubr.f32.mxu1 %v10266_v11  ;;  %7807 = vmatpush3.bf16.msra.mxu1 %v7804_v35  ;;  %v7816_v35 = vpack.c.bf16 %v5403_v17, %v5402_v25  ;;  %v5406_v17 = vld [vmem:[%s10723_s3 + $0x220] sm:$0xff]  ;;  %v5407_v25 = vld [vmem:[%s10723_s3 + $0x228] sm:$0xff] }
 0x2e6   : > { %7809 = vmatprep.subr.bf16.mxu1 %v7808_v59  ;;  %v7824_v5 = vpack.c.bf16 %v5407_v25, %v5406_v17  ;;  %v5430_v25 = vld [vmem:[%s10723_s3 + $0x2e0] sm:$0xff] }
 0x2e8   : > { %7059 = vmatmul.mubr.f32.gmra.mrb[42].mxu1 %v10269_v9 }
 0x2e9   : > { %7061 = vmatprep.mubr.f32.mxu1 %v10278_v2  ;;  %7811 = vmatpush3.bf16.msra.mxu1 %v7808_v59  ;;  %v7820_v59 = vpack.c.bf16 %v5405_v15, %v5404_v38  ;;  %v5409_v15 = vld [vmem:[%s10723_s3 + $0x238] sm:$0xff] }
 0x2ea   : > { %7813 = vmatprep.subr.bf16.mxu1 %v7812_v7  ;;  %v5429_v38 = vld [vmem:[%s10723_s3 + $0x2d8] sm:$0xff] }
 0x2ec   : > { %7062 = vmatmul.mubr.f32.gmra.mrb[44].mxu1 %v10281_v33 }
 0x2ed   : > { %7815 = vmatpush3.bf16.msra.mxu1 %v7812_v7  ;;  %8401 = vmatprep.mubr.msk.f32.mxu1 %vm9671_vm9, %v9676_v20  ;;  %v5408_v20 = vld [vmem:[%s10723_s3 + $0x230] sm:$0xff]  ;;  %vm10916_vm9 = vnez %v10915_v47 }
 0x2ee   : > { %7817 = vmatprep.subr.bf16.mxu1 %v7816_v35  ;;  %v7828_v30 = vpack.c.bf16 %v5409_v15, %v5408_v20  ;;  %v10907_v7 = vld [vmem:[#allocation3_spill] sm:$0xff]  ;;  %v5433_v15 = vld [vmem:[%s10723_s3 + $0x2f8] sm:$0xff] }
 0x2f0   : > { %8402 = vmatmul.mubr.msk.f32.vlgmr.msra.gmra.mrb[30].mxu1 %vm9650_vm7, %v9699_v4  ;;  %v5410_v4 = vld [vmem:[%s10723_s3 + $0x240] sm:$0xff]  ;;  %vm10906_vm7 = vnez %v10886_v34 }
 0x2f1   : > { %8403 = vmatprep.mubr.msk.f32.mxu1 %vm9707_vm1, %v9730_v22  ;;  %7819 = vmatpush3.bf16.msra.mxu1 %v7816_v35  ;;  %v7832_v8 = vpack.c.bf16 %v5411_v31, %v5410_v4  ;;  %v5413_v22 = vld [vmem:[%s10723_s3 + $0x258] sm:$0xff]  ;;  %v5435_v4 = vld [vmem:[%s10723_s3 + $0x308] sm:$0xff] }
 0x2f2   : > { %7821 = vmatprep.subr.bf16.mxu1 %v7820_v59  ;;  %v10908_v35 = vld [vmem:[#allocation4_spill] sm:$0xff]  ;;  %v10442_v31 = vld [vmem:[#allocation2 + $0xc1] sm:$0xff] }
 0x2f4   : > { %8404 = vmatmul.mubr.msk.f32.gmra.mrb[32].mxu1 %vm9694_vm14, %v9721_v43  ;;  %v5412_v43 = vld [vmem:[%s10723_s3 + $0x250] sm:$0xff] }
 0x2f5   : > { %8405 = vmatprep.mubr.msk.f32.mxu1 %vm9744_vm5, %v9749_v40  ;;  %7823 = vmatpush3.bf16.msra.mxu1 %v7820_v59  ;;  %v7836_v58 = vpack.c.bf16 %v5413_v22, %v5412_v43  ;;  %v5415_v40 = vld [vmem:[%s10723_s3 + $0x268] sm:$0xff]  ;;  %v10909_v59 = vld [vmem:[#allocation5_spill] sm:$0xff]  ;;  %v5436_v22 = vld [vmem:[%s10723_s3 + $0x310] sm:$0xff] }
 0x2f6   : > { %7825 = vmatprep.subr.bf16.mxu1 %v7824_v5  ;;  %v7840_v27 = vpack.c.bf16 %v5415_v40, %v5414_v45  ;;  %v10445_v43 = vld [vmem:[#allocation2 + $0xc9] sm:$0xff]  ;;  %v5438_v40 = vld [vmem:[%s10723_s3 + $0x320] sm:$0xff] }
 0x2f8   : > { %8406 = vmatmul.mubr.msk.f32.gmra.mrb[34].mxu1 %vm9725_vm4, %v9802_v52  ;;  %v5416_v52 = vld [vmem:[%s10723_s3 + $0x270] sm:$0xff] }
 0x2f9   : > { %8407 = vmatprep.mubr.msk.f32.mxu1 %vm9817_vm11, %v9840_v37  ;;  %7827 = vmatpush3.bf16.msra.mxu1 %v7824_v5  ;;  %v5419_v37 = vld [vmem:[%s10723_s3 + $0x288] sm:$0xff] }
 0x2fa   : > { %7829 = vmatprep.subr.bf16.mxu1 %v7828_v30  ;;  %v7848_v36 = vpack.c.bf16 %v5419_v37, %v5418_v32  ;;  %v5431_v5 = vld [vmem:[%s10723_s3 + $0x2e8] sm:$0xff] }
 0x2fb   : > { %v7872_v20 = vpack.c.bf16 %v5431_v5, %v5430_v25  ;;  %v5443_v32 = vld [vmem:[%s10723_s3 + $0x348] sm:$0xff]  ;;  %v5454_v25 = vld [vmem:[%s10723_s3 + $0x3a0] sm:$0xff] }
 0x2fc   : > { %8408 = vmatmul.mubr.msk.f32.gmra.mrb[36].mxu1 %vm10900_vm2, %v9823_v14  ;;  %v7844_v14 = vpack.c.bf16 %v5417_v50, %v5416_v52  ;;  %v5441_v50 = vld [vmem:[%s10723_s3 + $0x338] sm:$0xff]  ;;  %v5455_v5 = vld [vmem:[%s10723_s3 + $0x3a8] sm:$0xff] }
 0x2fd   : > { %8409 = vmatprep.mubr.msk.f32.mxu1 %vm10901_vm6, %v9861_v3  ;;  %7831 = vmatpush3.bf16.msra.mxu1 %v7828_v30  ;;  %v5420_v3 = vld [vmem:[%s10723_s3 + $0x290] sm:$0xff]  ;;  %v5434_v30 = vld [vmem:[%s10723_s3 + $0x300] sm:$0xff] }
 0x2fe   : > { %7833 = vmatprep.subr.bf16.mxu1 %v7832_v8 }
 0x300   : > { %8410 = vmatmul.mubr.msk.f32.gmra.mrb[38].mxu1 %vm10902_vm15, %v9908_v46  ;;  %v7852_v46 = vpack.c.bf16 %v5421_v6, %v5420_v3  ;;  %v5445_v3 = vld [vmem:[%s10723_s3 + $0x358] sm:$0xff] }
 0x301   : > { %8411 = vmatprep.mubr.msk.f32.mxu1 %vm10903_vm13, %v9946_v44  ;;  %7835 = vmatpush3.bf16.msra.mxu1 %v7832_v8  ;;  %v7880_v8 = vpack.c.bf16 %v5435_v4, %v5434_v30  ;;  %v5457_v30 = vld [vmem:[%s10723_s3 + $0x3b8] sm:$0xff]  ;;  %v4272_v4 = vld [vmem:[#allocation2 + $0x60] sm:$0xff] }
 0x302   : > { %7837 = vmatprep.subr.bf16.mxu1 %v7836_v58 }
 0x304   : > { %8412 = vmatmul.mubr.msk.f32.gmra.mrb[40].mxu1 %vm10904_vm12, %v9929_v21  ;;  %v5423_v21 = vld [vmem:[%s10723_s3 + $0x2a8] sm:$0xff] }
 0x305   : > { %8413 = vmatprep.mubr.msk.f32.mxu1 %vm10905_vm8, %v9967_v16  ;;  %7839 = vmatpush3.bf16.msra.mxu1 %v7836_v58  ;;  %v7856_v44 = vpack.c.bf16 %v5423_v21, %v5422_v12  ;;  %v5427_v16 = vld [vmem:[%s10723_s3 + $0x2c8] sm:$0xff]  ;;  %v5437_v58 = vld [vmem:[%s10723_s3 + $0x318] sm:$0xff] }
 0x306   : > { %7841 = vmatprep.subr.bf16.mxu1 %v7840_v27  ;;  %v7884_v45 = vpack.c.bf16 %v5437_v58, %v5436_v22  ;;  %v5447_v12 = vld [vmem:[%s10723_s3 + $0x368] sm:$0xff]  ;;  %v5458_v58 = vld [vmem:[%s10723_s3 + $0x3c0] sm:$0xff] }
 0x307   : > { %v4273_v22 = vld [vmem:[#allocation2 + $0x68] sm:$0xff] }
 0x308   : > { %8414 = vmatmul.mubr.msk.f32.gmra.mrb[42].mxu1 %vm9934_vm10, %v10010_v54 }
 0x309   : > { %8415 = vmatprep.mubr.msk.f32.mxu1 %vm10906_vm7, %v10041_v57  ;;  %7843 = vmatpush3.bf16.msra.mxu1 %v7840_v27  ;;  %v5439_v27 = vld [vmem:[%s10723_s3 + $0x328] sm:$0xff] }
 0x30a   : > { %7845 = vmatprep.subr.bf16.mxu1 %v7844_v14  ;;  %v7888_v52 = vpack.c.bf16 %v5439_v27, %v5438_v40  ;;  %v4274_v40 = vld [vmem:[#allocation2 + $0x78] sm:$0xff] }
 0x30c   : > { %8416 = vmatmul.mubr.msk.f32.gmra.mrb[44].mxu1 %vm10005_vm0, %v10032_v60 }
 0x30d   : > { %7847 = vmatpush3.bf16.msra.mxu1 %v7844_v14  ;;  %7152 = vmatprep.mubr.f32.mxu1 %v9784_v53  ;;  %v5424_v53 = vld [vmem:[%s10723_s3 + $0x2b0] sm:$0xff]  ;;  %v5442_v14 = vld [vmem:[%s10723_s3 + $0x340] sm:$0xff] }
 0x30e   : > { %7849 = vmatprep.subr.bf16.mxu1 %v7848_v36  ;;  %v7896_v37 = vpack.c.bf16 %v5443_v32, %v5442_v14  ;;  %v4277_v32 = vld [vmem:[#allocation2 + $0x98] sm:$0xff] }
 0x310   : > { %7153 = vmatmul.mubr.f32.vlgmr.msra.gmra.mrb[30].mxu1 %v9786_v63  ;;  %v7860_v63 = vpack.c.bf16 %v5425_v19, %v5424_v53  ;;  %v5449_v53 = vld [vmem:[%s10723_s3 + $0x378] sm:$0xff] }
 0x311   : > { %7155 = vmatprep.mubr.f32.mxu1 %v9821_v10  ;;  %7851 = vmatpush3.bf16.msra.mxu1 %v7848_v36  ;;  %v5426_v10 = vld [vmem:[%s10723_s3 + $0x2c0] sm:$0xff]  ;;  %v5444_v36 = vld [vmem:[%s10723_s3 + $0x350] sm:$0xff] }
 0x312   : > { %7853 = vmatprep.subr.bf16.mxu1 %v7852_v46  ;;  %v7900_v6 = vpack.c.bf16 %v5445_v3, %v5444_v36  ;;  %v5463_v36 = vld [vmem:[%s10723_s3 + $0x3e8] sm:$0xff] }
 0x313   : > { %v4278_v3 = vld [vmem:[#allocation2 + $0xa8] sm:$0xff] }
 0x314   : > { %7156 = vmatmul.mubr.f32.gmra.mrb[32].mxu1 %v9859_v26  ;;  %v7864_v26 = vpack.c.bf16 %v5427_v16, %v5426_v10  ;;  %v5451_v10 = vld [vmem:[%s10723_s3 + $0x388] sm:$0xff] }
 0x315   : > { %7158 = vmatprep.mubr.f32.mxu1 %v9890_v62  ;;  %7855 = vmatpush3.bf16.msra.mxu1 %v7852_v46  ;;  %v5428_v62 = vld [vmem:[%s10723_s3 + $0x2d0] sm:$0xff]  ;;  %v5446_v46 = vld [vmem:[%s10723_s3 + $0x360] sm:$0xff] }
 0x316   : > { %7857 = vmatprep.subr.bf16.mxu1 %v7856_v44  ;;  %v7868_v17 = vpack.c.bf16 %v5429_v38, %v5428_v62  ;;  %v7904_v21 = vpack.c.bf16 %v5447_v12, %v5446_v46  ;;  %v10510_v16 = vld [vmem:[#allocation2 + $0xc2] sm:$0xff]  ;;  %v5453_v62 = vld [vmem:[%s10723_s3 + $0x398] sm:$0xff]  ;;  %v4268_v38 = vld [vmem:[#allocation2 + $0x30] sm:$0xff] }
 0x317   : > { %v5464_v46 = vld [vmem:[%s10723_s3 + $0x3f0] sm:$0xff]  ;;  %v5465_v12 = vld [vmem:[%s10723_s3 + $0x3f8] sm:$0xff] }
 0x318   : > { %7159 = vmatmul.mubr.f32.gmra.mrb[34].mxu1 %v10907_v7 }
 0x319   : > { %7161 = vmatprep.mubr.f32.mxu1 %v10908_v35  ;;  %7859 = vmatpush3.bf16.msra.mxu1 %v7856_v44  ;;  %v5448_v44 = vld [vmem:[%s10723_s3 + $0x370] sm:$0xff] }
 0x31a   : > { %7861 = vmatprep.subr.bf16.mxu1 %v7860_v63  ;;  %v7908_v19 = vpack.c.bf16 %v5449_v53, %v5448_v44  ;;  %v10513_v35 = vld [vmem:[#allocation2 + $0xca] sm:$0xff]  ;;  %v5466_v44 = vld [vmem:[%s10723_s3 + $0x400] sm:$0xff] }
 0x31b   : > { %v5467_v53 = vld [vmem:[%s10723_s3 + $0x408] sm:$0xff] }
 0x31c   : > { %7162 = vmatmul.mubr.f32.gmra.mrb[36].mxu1 %v10909_v59  ;;  %v7944_v34 = vpack.c.bf16 %v5467_v53, %v5466_v44 }
 0x31d   : > { %7164 = vmatprep.mubr.f32.mxu1 %v9996_v23  ;;  %7863 = vmatpush3.bf16.msra.mxu1 %v7860_v63  ;;  %v5432_v23 = vld [vmem:[%s10723_s3 + $0x2f0] sm:$0xff]  ;;  %v5450_v63 = vld [vmem:[%s10723_s3 + $0x380] sm:$0xff] }
 0x31e   : > { %7865 = vmatprep.subr.bf16.mxu1 %v7864_v26  ;;  %v7912_v7 = vpack.c.bf16 %v5451_v10, %v5450_v63  ;;  %v5469_v63 = vld [vmem:[%s10723_s3 + $0x418] sm:$0xff]  ;;  %v10913_v10 = vld [vmem:[#allocation9_spill] sm:$0xff] }
 0x320   : > { %7165 = vmatmul.mubr.f32.gmra.mrb[38].mxu1 %v9998_v0  ;;  %v7876_v0 = vpack.c.bf16 %v5433_v15, %v5432_v23  ;;  %v7920_v23 = vpack.c.bf16 %v5455_v5, %v5454_v25  ;;  %v4271_v15 = vld [vmem:[#allocation2 + $0x50] sm:$0xff] }
 0x321   : > { %7167 = vmatprep.mubr.f32.mxu1 %v10029_v39  ;;  %7867 = vmatpush3.bf16.msra.mxu1 %v7864_v26  ;;  %v5452_v26 = vld [vmem:[%s10723_s3 + $0x390] sm:$0xff] }
 0x322   : > { %7869 = vmatprep.subr.bf16.mxu1 %v7868_v17  ;;  %v7916_v59 = vpack.c.bf16 %v5453_v62, %v5452_v26  ;;  %v4463_v62 = vld [vmem:[#allocation2 + $0x39] sm:$0xff]  ;;  %v4465_v5 = vld [vmem:[#allocation2 + $0x51] sm:$0xff] }
 0x324   : > { %7168 = vmatmul.mubr.f32.gmra.mrb[40].mxu1 %v10062_v28 }
 0x325   : > { %7170 = vmatprep.mubr.f32.mxu1 %v10084_v29  ;;  %7871 = vmatpush3.bf16.msra.mxu1 %v7868_v17  ;;  %v4269_v17 = vld [vmem:[#allocation2 + $0x38] sm:$0xff] }
 0x326   : > { %7873 = vmatprep.subr.bf16.mxu1 %v7872_v20 }
 0x328   : > { %7171 = vmatmul.mubr.f32.gmra.mrb[42].mxu1 %v10086_v51 }
 0x329   : > { %7173 = vmatprep.mubr.f32.mxu1 %v10442_v31  ;;  %7875 = vmatpush3.bf16.msra.mxu1 %v7872_v20  ;;  %v4270_v20 = vld [vmem:[#allocation2 + $0x48] sm:$0xff] }
 0x32a   : > { %7877 = vmatprep.subr.bf16.mxu1 %v7876_v0 }
 0x32c   : > { %7174 = vmatmul.mubr.f32.gmra.mrb[44].mxu1 %v10445_v43 }
 0x32d   : > { %7879 = vmatpush3.bf16.msra.mxu1 %v7876_v0  ;;  %7208 = vmatprep.mubr.f32.mxu1 %v10206_v42  ;;  %v5440_v42 = vld [vmem:[%s10723_s3 + $0x330] sm:$0xff] }
 0x32e   : > { %7881 = vmatprep.subr.bf16.mxu1 %v7880_v8  ;;  %v5456_v0 = vld [vmem:[%s10723_s3 + $0x3b0] sm:$0xff] }
 0x330   : > { %7209 = vmatmul.mubr.f32.vlgmr.msra.gmra.mrb[30].mxu1 %v10209_v48  ;;  %v7892_v48 = vpack.c.bf16 %v5441_v50, %v5440_v42  ;;  %v5460_v42 = vld [vmem:[%s10723_s3 + $0x3d0] sm:$0xff]  ;;  %v5461_v50 = vld [vmem:[%s10723_s3 + $0x3d8] sm:$0xff] }
 0x331   : > { %7211 = vmatprep.mubr.f32.mxu1 %v10218_v24  ;;  %7883 = vmatpush3.bf16.msra.mxu1 %v7880_v8  ;;  %v7924_v8 = vpack.c.bf16 %v5457_v30, %v5456_v0  ;;  %v7932_v14 = vpack.c.bf16 %v5461_v50, %v5460_v42  ;;  %v4467_v30 = vld [vmem:[#allocation2 + $0x69] sm:$0xff]  ;;  %v5478_v42 = vld [vmem:[%s10723_s3 + $0x460] sm:$0xff] }
 0x332   : > { %7885 = vmatprep.subr.bf16.mxu1 %v7884_v45  ;;  %v5479_v50 = vld [vmem:[%s10723_s3 + $0x468] sm:$0xff] }
 0x334   : > { %7212 = vmatmul.mubr.f32.gmra.mrb[32].mxu1 %v10221_v41 }
 0x335   : > { %7214 = vmatprep.mubr.f32.mxu1 %v10230_v18  ;;  %7887 = vmatpush3.bf16.msra.mxu1 %v7884_v45  ;;  %v5459_v45 = vld [vmem:[%s10723_s3 + $0x3c8] sm:$0xff] }
 0x336   : > { %7889 = vmatprep.subr.bf16.mxu1 %v7888_v52  ;;  %v7928_v27 = vpack.c.bf16 %v5459_v45, %v5458_v58  ;;  %v4469_v45 = vld [vmem:[#allocation2 + $0x81] sm:$0xff] }
 0x338   : > { %7215 = vmatmul.mubr.f32.gmra.mrb[34].mxu1 %v10233_v49 }
 0x339   : > { %7217 = vmatprep.mubr.f32.mxu1 %v10242_v13  ;;  %7891 = vmatpush3.bf16.msra.mxu1 %v7888_v52  ;;  %v4275_v52 = vld [vmem:[#allocation2 + $0x80] sm:$0xff] }
 0x33a   : > { %7893 = vmatprep.subr.bf16.mxu1 %v7892_v48 }
 0x33c   : > { %7218 = vmatmul.mubr.f32.gmra.mrb[36].mxu1 %v10245_v61 }
 0x33d   : > { %7220 = vmatprep.mubr.f32.mxu1 %v10254_v56  ;;  %7895 = vmatpush3.bf16.msra.mxu1 %v7892_v48  ;;  %v4276_v48 = vld [vmem:[#allocation2 + $0x90] sm:$0xff] }
 0x33e   : > { %7897 = vmatprep.subr.bf16.mxu1 %v7896_v37 }
 0x340   : > { %7221 = vmatmul.mubr.f32.gmra.mrb[38].mxu1 %v10257_v55 }
 0x341   : > { %7223 = vmatprep.mubr.f32.mxu1 %v10266_v11  ;;  %7899 = vmatpush3.bf16.msra.mxu1 %v7896_v37  ;;  %v5462_v37 = vld [vmem:[%s10723_s3 + $0x3e0] sm:$0xff] }
 0x342   : > { %7901 = vmatprep.subr.bf16.mxu1 %v7900_v6 }
 0x344   : > { %7224 = vmatmul.mubr.f32.gmra.mrb[40].mxu1 %v10269_v9 }
 0x345   : > { %7226 = vmatprep.mubr.f32.mxu1 %v10278_v2  ;;  %7903 = vmatpush3.bf16.msra.mxu1 %v7900_v6  ;;  %v7936_v6 = vpack.c.bf16 %v5463_v36, %v5462_v37 }
 0x346   : > { %7905 = vmatprep.subr.bf16.mxu1 %v7904_v21 }
 0x348   : > { %7227 = vmatmul.mubr.f32.gmra.mrb[42].mxu1 %v10281_v33 }
 0x349   : > { %7229 = vmatprep.mubr.f32.mxu1 %v10510_v16  ;;  %7907 = vmatpush3.bf16.msra.mxu1 %v7904_v21  ;;  %v7940_v21 = vpack.c.bf16 %v5465_v12, %v5464_v46  ;;  %v5488_v12 = vld [vmem:[%s8555_s28 + $0x8a] sm:$0xff] }
 0x34a   : > { %7909 = vmatprep.subr.bf16.mxu1 %v7908_v19 }
 0x34c   : > { %7230 = vmatmul.mubr.f32.gmra.mrb[44].mxu1 %v10513_v35 }
 0x34d   : > { %7911 = vmatpush3.bf16.msra.mxu1 %v7908_v19  ;;  %7264 = vmatprep.mubr.f32.mxu1 %v4268_v38  ;;  %v5470_v38 = vld [vmem:[%s10723_s3 + $0x420] sm:$0xff] }
 0x34e   : > { %7913 = vmatprep.subr.bf16.mxu1 %v7912_v7 }
 0x350   : > { %7265 = vmatmul.mubr.f32.vlgmr.msra.gmra.mrb[30].mxu1 %v4269_v17  ;;  %v4464_v17 = vld [vmem:[#allocation2 + $0x49] sm:$0xff] }
 0x351   : > { %7267 = vmatprep.mubr.f32.mxu1 %v4270_v20  ;;  %7915 = vmatpush3.bf16.msra.mxu1 %v7912_v7  ;;  %v10914_v7 = vmax.f32 %v10913_v10, 0.0  ;;  %v5472_v20 = vld [vmem:[%s10723_s3 + $0x430] sm:$0xff] }
 0x352   : > { %7917 = vmatprep.subr.bf16.mxu1 %v7916_v59  ;;  %v5490_v10 = vld [vmem:[%s8555_s28 + $0xaa] sm:$0xff] }
 0x354   : > { %7268 = vmatmul.mubr.f32.gmra.mrb[32].mxu1 %v4271_v15  ;;  %v4466_v15 = vld [vmem:[#allocation2 + $0x61] sm:$0xff] }
 0x355   : > { %7270 = vmatprep.mubr.f32.mxu1 %v4272_v4  ;;  %7919 = vmatpush3.bf16.msra.mxu1 %v7916_v59  ;;  %v5471_v59 = vld [vmem:[%s10723_s3 + $0x428] sm:$0xff]  ;;  %v5474_v4 = vld [vmem:[%s10723_s3 + $0x440] sm:$0xff] }
 0x356   : > { %7921 = vmatprep.subr.bf16.mxu1 %v7920_v23  ;;  %v7952_v25 = vpack.c.bf16 %v5471_v59, %v5470_v38 }
 0x358   : > { %7271 = vmatmul.mubr.f32.gmra.mrb[34].mxu1 %v4273_v22  ;;  %v4468_v22 = vld [vmem:[#allocation2 + $0x79] sm:$0xff] }
 0x359   : > { %7273 = vmatprep.mubr.f32.mxu1 %v4274_v40  ;;  %7923 = vmatpush3.bf16.msra.mxu1 %v7920_v23  ;;  %v5473_v23 = vld [vmem:[%s10723_s3 + $0x438] sm:$0xff]  ;;  %v5476_v40 = vld [vmem:[%s10723_s3 + $0x450] sm:$0xff] }
 0x35a   : > { %7925 = vmatprep.subr.bf16.mxu1 %v7924_v8  ;;  %v7956_v0 = vpack.c.bf16 %v5473_v23, %v5472_v20 }
 0x35c   : > { %7274 = vmatmul.mubr.f32.gmra.mrb[36].mxu1 %v4275_v52 }
 0x35d   : > { %7276 = vmatprep.mubr.f32.mxu1 %v4276_v48  ;;  %7927 = vmatpush3.bf16.msra.mxu1 %v7924_v8  ;;  %v5475_v8 = vld [vmem:[%s10723_s3 + $0x448] sm:$0xff]  ;;  %v7968_v48 = vpack.c.bf16 %v5479_v50, %v5478_v42 }
 0x35e   : > { %7929 = vmatprep.subr.bf16.mxu1 %v7928_v27  ;;  %v7960_v58 = vpack.c.bf16 %v5475_v8, %v5474_v4  ;;  %v5493_v42 = vld [vmem:[%s8555_s28 + $0xe2] sm:$0xff] }
 0x360   : > { %7277 = vmatmul.mubr.f32.gmra.mrb[38].mxu1 %v4277_v32  ;;  %v4477_v32 = vld [vmem:[#allocation2 + $0xe1] sm:$0xff] }
 0x361   : > { %7279 = vmatprep.mubr.f32.mxu1 %v4278_v3  ;;  %7931 = vmatpush3.bf16.msra.mxu1 %v7928_v27  ;;  %v5477_v27 = vld [vmem:[%s10723_s3 + $0x458] sm:$0xff] }
 0x362   : > { %7933 = vmatprep.subr.bf16.mxu1 %v7932_v14  ;;  %v7964_v52 = vpack.c.bf16 %v5477_v27, %v5476_v40 }
 0x364   : > { %8417 = vmatmul.mubr.msk.f32.gmra.mrb[40].mxu1 %vm9934_vm10, %v10010_v54  ;;  %v10911_v54 = vmax.f32 %v10910_v1, 0.0  ;;  %v5487_v1 = vld [vmem:[%s8555_s28 + $0x82] sm:$0xff] }
 0x365   : > { %8418 = vmatprep.mubr.msk.f32.mxu1 %vm10906_vm7, %v10041_v57  ;;  %7935 = vmatpush3.bf16.msra.mxu1 %v7932_v14  ;;  %v5468_v57 = vld [vmem:[%s10723_s3 + $0x410] sm:$0xff]  ;;  %v5481_v14 = vld [vmem:[%s10723_s3 + $0x478] sm:$0xff] }
 0x366   : > { %7937 = vmatprep.subr.bf16.mxu1 %v7936_v6  ;;  %v7948_v26 = vpack.c.bf16 %v5469_v63, %v5468_v57 }
 0x368   : > { %8419 = vmatmul.mubr.msk.f32.gmra.mrb[42].mxu1 %vm10005_vm0, %v10032_v60  ;;  %v4462_v60 = vld [vmem:[#allocation2 + $0x31] sm:$0xff] }
 0x369   : > { %8420 = vmatprep.mubr.msk.f32.mxu1 %vm10057_vm3, %v10911_v54  ;;  %7939 = vmatpush3.bf16.msra.mxu1 %v7936_v6 }
 0x36a   : > { %7941 = vmatprep.subr.bf16.mxu1 %v7940_v21 }
 0x36c   : > { %8421 = vmatmul.mubr.msk.f32.gmra.mrb[44].mxu1 %vm10916_vm9, %v10914_v7 }
 0x36d   : > { %7943 = vmatpush3.bf16.msra.mxu1 %v7940_v21  ;;  %7320 = vmatprep.mubr.f32.mxu1 %v4462_v60 }
 0x36e   : > { %7945 = vmatprep.subr.bf16.mxu1 %v7944_v34 }
 0x370   : > { %7321 = vmatmul.mubr.f32.vlgmr.msra.gmra.mrb[30].mxu1 %v4463_v62 }
 0x371   : > { %7323 = vmatprep.mubr.f32.mxu1 %v4464_v17  ;;  %7947 = vmatpush3.bf16.msra.mxu1 %v7944_v34 }
 0x372   : > { %7949 = vmatprep.subr.bf16.mxu1 %v7948_v26 }
 0x374   : > { %7324 = vmatmul.mubr.f32.gmra.mrb[32].mxu1 %v4465_v5  ;;  %v5492_v5 = vld [vmem:[%s8555_s28 + $0xca] sm:$0xff] }
 0x375   : > { %7326 = vmatprep.mubr.f32.mxu1 %v4466_v15  ;;  %7951 = vmatpush3.bf16.msra.mxu1 %v7948_v26  ;;  %v5489_v26 = vld [vmem:[%s8555_s28 + $0xa2] sm:$0xff] }
 0x376   : > { %7953 = vmatprep.subr.bf16.mxu1 %v7952_v25 }
 0x378   : > { %7327 = vmatmul.mubr.f32.gmra.mrb[34].mxu1 %v4467_v30 }
 0x379   : > { %7329 = vmatprep.mubr.f32.mxu1 %v4468_v22  ;;  %7955 = vmatpush3.bf16.msra.mxu1 %v7952_v25 }
 0x37a   : > { %7957 = vmatprep.subr.bf16.mxu1 %v7956_v0 }
 0x37c   : > { %7330 = vmatmul.mubr.f32.gmra.mrb[36].mxu1 %v4469_v45  ;;  %v5494_v45 = vld [vmem:[%s8555_s28 + $0xea] sm:$0xff] }
 0x37d   : > { %7332 = vmatprep.mubr.f32.mxu1 %v10029_v39  ;;  %7959 = vmatpush3.bf16.msra.mxu1 %v7956_v0  ;;  %v5480_v39 = vld [vmem:[%s10723_s3 + $0x470] sm:$0xff]  ;;  %v5491_v0 = vld [vmem:[%s8555_s28 + $0xc2] sm:$0xff] }
 0x37e   : > { %7961 = vmatprep.subr.bf16.mxu1 %v7960_v58 }
 0x380   : > { %7333 = vmatmul.mubr.f32.gmra.mrb[38].mxu1 %v10062_v28  ;;  %v7972_v28 = vpack.c.bf16 %v5481_v14, %v5480_v39 }
 0x381   : > { %7335 = vmatprep.mubr.f32.mxu1 %v10084_v29  ;;  %7963 = vmatpush3.bf16.msra.mxu1 %v7960_v58  ;;  %v4476_v29 = vld [vmem:[#allocation2 + $0xd9] sm:$0xff] }
 0x382   : > { %7965 = vmatprep.subr.bf16.mxu1 %v7964_v52 }
 0x384   : > { %7336 = vmatmul.mubr.f32.gmra.mrb[40].mxu1 %v10086_v51  ;;  %v4670_v51 = vld [vmem:[#allocation2 + $0xda] sm:$0xff] }
 0x385   : > { %7338 = vmatprep.mubr.f32.mxu1 %v10442_v31  ;;  %7967 = vmatpush3.bf16.msra.mxu1 %v7964_v52 }
 0x386   : > { %7969 = vmatprep.subr.bf16.mxu1 %v7968_v48 }
 0x388   : > { %7339 = vmatmul.mubr.f32.gmra.mrb[42].mxu1 %v10445_v43 }
 0x389   : > { %7341 = vmatprep.mubr.f32.mxu1 %v4476_v29  ;;  %7971 = vmatpush3.bf16.msra.mxu1 %v7968_v48  ;;  %v5496_v29 = vld [vmem:[%s8555_s28 + $0x10a] sm:$0xff] }
 0x38a   : > { %7973 = vmatprep.subr.bf16.mxu1 %v7972_v28 }
 0x38c   : > { %7342 = vmatmul.mubr.f32.gmra.mrb[44].mxu1 %v4477_v32 }
 0x38d   : > { %7975 = vmatpush3.bf16.msra.mxu1 %v7972_v28  ;;  %7376 = vmatprep.mubr.f32.mxu1 %v10218_v24  ;;  %v4671_v24 = vld [vmem:[#allocation2 + $0xe2] sm:$0xff] }
 0x390   : > { %7377 = vmatmul.mubr.f32.vlgmr.msra.gmra.mrb[30].mxu1 %v10221_v41 }
 0x391   : > { %7379 = vmatprep.mubr.f32.mxu1 %v10230_v18 }
 0x394   : > { %7380 = vmatmul.mubr.f32.gmra.mrb[32].mxu1 %v10233_v49  ;;  %v5483_v49 = vld [vmem:[%s8555_s28 + $0x42] sm:$0xff] }
 0x395   : > { %7382 = vmatprep.mubr.f32.mxu1 %v10242_v13 }
 0x398   : > { %7383 = vmatmul.mubr.f32.gmra.mrb[34].mxu1 %v10245_v61 }
 0x399   : > { %7385 = vmatprep.mubr.f32.mxu1 %v10254_v56  ;;  %v5484_v56 = vld [vmem:[%s8555_s28 + $0x4a] sm:$0xff] }
 0x39c   : > { %7386 = vmatmul.mubr.f32.gmra.mrb[36].mxu1 %v10257_v55 }
 0x39d   : > { %7388 = vmatprep.mubr.f32.mxu1 %v10266_v11  ;;  %v10650_v11 = vld [vmem:[%s10724_s4] ss:$0 sm:$0xff] }
 0x3a0   : > { %7389 = vmatmul.mubr.f32.gmra.mrb[38].mxu1 %v10269_v9 }
 0x3a1   : > { %7391 = vmatprep.mubr.f32.mxu1 %v10278_v2 }
 0x3a4   : > { %7392 = vmatmul.mubr.f32.gmra.mrb[40].mxu1 %v10281_v33  ;;  %v5486_v33 = vld [vmem:[%s8555_s28 + $0x6a] sm:$0xff] }
 0x3a5   : > { %7394 = vmatprep.mubr.f32.mxu1 %v10510_v16 }
 0x3a8   : > { %7395 = vmatmul.mubr.f32.gmra.mrb[42].mxu1 %v10513_v35  ;;  %v5485_v35 = vld [vmem:[%s8555_s28 + $0x62] sm:$0xff] }
 0x3a9   : > { %7397 = vmatprep.mubr.f32.mxu1 %v4670_v51 }
 0x3ac   : > { %7398 = vmatmul.mubr.f32.gmra.mrb[44].mxu1 %v4671_v24 }
 0x463   : > { %v7378_v2 = vpop.f32.mrb[30].mxu1 }
 0x464   : > { %v4858_v41 = vadd.f32 %v7378_v2, %v10650_v11  ;;  %v4755_v18 = vpop.f32.mrb[31].mxu1  ;;  %v5495_v2 = vld [vmem:[%s8555_s28 + $0x102] sm:$0xff] }
 0x465   : > { %v4857_v13 = vadd.f32 %v10650_v11, %v4755_v18 }
 0x466   : > { %v4890_v61 = vadd.f32 %v5484_v56, %v4858_v41 }
 0x467   : > { %v4889_v55 = vadd.f32 %v5483_v49, %v4857_v13  ;;  %v7381_v9 = vpop.f32.mrb[32].mxu1 }
 0x468   : > { %v4906_v31 = vmax.f32 %v4890_v61, 0.0  ;;  %v4860_v43 = vadd.f32 %v7381_v9, %v10650_v11  ;;  %v4765_v16 = vpop.f32.mrb[33].mxu1  ;;  %v5498_v61 = vld [vmem:[%s8555_s28 + $0x12a] sm:$0xff] }
 0x469   : > { %v4905_v37 = vmax.f32 %v4889_v55, 0.0  ;;  %v4859_v36 = vadd.f32 %v10650_v11, %v4765_v16 }
 0x46a   : > { %4922 = vst [vmem:[%s10659_s19 + $0x8] sm:$0xff] %v4906_v31  ;;  %v4892_v3 = vadd.f32 %v5486_v33, %v4860_v43  ;;  %v5497_v31 = vld [vmem:[%s8555_s28 + $0x122] sm:$0xff] }
 0x46b   : > { %4921 = vst [vmem:[%s10659_s19] sm:$0xff] %v4905_v37  ;;  %v4891_v6 = vadd.f32 %v5485_v35, %v4859_v36  ;;  %v7384_v46 = vpop.f32.mrb[34].mxu1 }
 0x46c   : > { %v4908_v21 = vmax.f32 %v4892_v3, 0.0  ;;  %v4862_v44 = vadd.f32 %v7384_v46, %v10650_v11  ;;  %v4775_v53 = vpop.f32.mrb[35].mxu1 }
 0x46d   : > { %v4907_v54 = vmax.f32 %v4891_v6, 0.0  ;;  %v4861_v19 = vadd.f32 %v10650_v11, %v4775_v53 }
 0x46e   : > { %4924 = vst [vmem:[%s10659_s19 + $0x18] sm:$0xff] %v4908_v21  ;;  %v4894_v34 = vadd.f32 %v5488_v12, %v4862_v44 }
 0x46f   : > { %4923 = vst [vmem:[%s10659_s19 + $0x10] sm:$0xff] %v4907_v54  ;;  %v4893_v57 = vadd.f32 %v5487_v1, %v4861_v19  ;;  %v7387_v63 = vpop.f32.mrb[36].mxu1 }
 0x470   : > { %v4910_v7 = vmax.f32 %v4894_v34, 0.0  ;;  %v4864_v47 = vadd.f32 %v7387_v63, %v10650_v11  ;;  %v4785_v60 = vpop.f32.mrb[37].mxu1 }
 0x471   : > { %v4909_v62 = vmax.f32 %v4893_v57, 0.0  ;;  %v4863_v38 = vadd.f32 %v10650_v11, %v4785_v60 }
 0x472   : > { %4926 = vst [vmem:[%s10659_s19 + $0x28] sm:$0xff] %v4910_v7  ;;  %v4896_v59 = vadd.f32 %v5490_v10, %v4864_v47 }
 0x473   : > { %4925 = vst [vmem:[%s10659_s19 + $0x20] sm:$0xff] %v4909_v62  ;;  %v4895_v17 = vadd.f32 %v5489_v26, %v4863_v38  ;;  %v7390_v25 = vpop.f32.mrb[38].mxu1 }
 0x474   : > { %v4912_v20 = vmax.f32 %v4896_v59, 0.0  ;;  %v4866_v23 = vadd.f32 %v7390_v25, %v10650_v11  ;;  %v4795_v15 = vpop.f32.mrb[39].mxu1 }
 0x475   : > { %v4911_v30 = vmax.f32 %v4895_v17, 0.0  ;;  %v4865_v4 = vadd.f32 %v10650_v11, %v4795_v15 }
 0x476   : > { %4928 = vst [vmem:[%s10659_s19 + $0x38] sm:$0xff] %v4912_v20  ;;  %v4898_v8 = vadd.f32 %v5492_v5, %v4866_v23 }
 0x477   : > { %4927 = vst [vmem:[%s10659_s19 + $0x30] sm:$0xff] %v4911_v30  ;;  %v4897_v22 = vadd.f32 %v5491_v0, %v4865_v4  ;;  %v7393_v58 = vpop.f32.mrb[40].mxu1 }
 0x478   : > { %v4914_v40 = vmax.f32 %v4898_v8, 0.0  ;;  %v4868_v27 = vadd.f32 %v7393_v58, %v10650_v11  ;;  %v4805_v52 = vpop.f32.mrb[41].mxu1 }
 0x479   : > { %v4913_v50 = vmax.f32 %v4897_v22, 0.0  ;;  %v4867_v48 = vadd.f32 %v10650_v11, %v4805_v52 }
 0x47a   : > { %4930 = vst [vmem:[%s10659_s19 + $0x48] sm:$0xff] %v4914_v40  ;;  %v4900_v39 = vadd.f32 %v5494_v45, %v4868_v27 }
 0x47b   : > { %4929 = vst [vmem:[%s10659_s19 + $0x40] sm:$0xff] %v4913_v50  ;;  %v4899_v14 = vadd.f32 %v5493_v42, %v4867_v48  ;;  %v7396_v28 = vpop.f32.mrb[42].mxu1 }
 0x47c   : > { %v4916_v32 = vmax.f32 %v4900_v39, 0.0  ;;  %v4870_v51 = vadd.f32 %v7396_v28, %v10650_v11  ;;  %v4815_v24 = vpop.f32.mrb[43].mxu1 }
 0x47d   : > { %v4915_v56 = vmax.f32 %v4899_v14, 0.0  ;;  %v4869_v41 = vadd.f32 %v10650_v11, %v4815_v24 }
 0x47e   : > { %4932 = vst [vmem:[%s10659_s19 + $0x58] sm:$0xff] %v4916_v32  ;;  %v4902_v18 = vadd.f32 %v5496_v29, %v4870_v51 }
 0x47f   : > { %4931 = vst [vmem:[%s10659_s19 + $0x50] sm:$0xff] %v4915_v56  ;;  %v4901_v49 = vadd.f32 %v5495_v2, %v4869_v41  ;;  %v7399_v13 = vpop.f32.mrb[44].mxu1 }
 0x480   : > { %v4918_v55 = vmax.f32 %v4902_v18, 0.0  ;;  %v4872_v9 = vadd.f32 %v7399_v13, %v10650_v11  ;;  %v4825_v33 = vpop.f32.mrb[45].mxu1 }
 0x481   : > { %v4917_v43 = vmax.f32 %v4901_v49, 0.0  ;;  %v4871_v16 = vadd.f32 %v10650_v11, %v4825_v33 }
 0x482   : > { %4934 = vst [vmem:[%s10659_s19 + $0x68] sm:$0xff] %v4918_v55  ;;  %v4904_v35 = vadd.f32 %v5498_v61, %v4872_v9 }
 0x483   : > { %4933 = vst [vmem:[%s10659_s19 + $0x60] sm:$0xff] %v4917_v43  ;;  %v4903_v37 = vadd.f32 %v5497_v31, %v4871_v16 }
 0x484   : > { %v4920_v36 = vmax.f32 %v4904_v35, 0.0 }
 0x485   : > { %v4919_v3 = vmax.f32 %v4903_v37, 0.0 }
 0x486   : > { %4936 = vst [vmem:[%s10659_s19 + $0x78] sm:$0xff] %v4920_v36 }
 0x487   : > { %4935 = vst [vmem:[%s10659_s19 + $0x70] sm:$0xff] %v4919_v3 }
 0x488 PF: > { %s15_s22 = sadd.s32 1, %s8460_s22   ;;  %s10917_s18 = smov %s8452_s20 }
 0x489   : > { %p12_p8 = scmp.ge.s32.totalorder %s15_s22, 6   ;;  %s10918_s19 = smov %s8456_s21 }
 0x48a   : > { %s10919_s20 = smov %s10922_s23  ;;  %s10920_s21 = smov %s10926_s24 }
 0x48b   :  { %14 = sbr.rel (!%p12_p8) target bundleno = 3 (0x3), region = 90 }

</bundles_post_ra>
